<compile_context>
chip_gen: v6e
topology: v6e:2x2x1
jax: 0.10.0
libtpu: 0.0.40
codegen_flags: <defaults>
</compile_context>

<pallas_src>
import jax
import jax.numpy as jnp
import numpy as np
from jax.experimental import pallas as pl
from jax.experimental.pallas import tpu as pltpu

# --- problem sizes (small, consistent with the module defaults) -------------
B = 2          # batch
C = 16         # num_filters
L = 64         # sequence length
STEPS = 3      # num_recurrent_steps
KMIX = 25      # mixer_amount
PAD = KMIX // 2
EPS = 1e-5
L_OUT = L - STEPS

BLK = 128              # per-batch lane block (>= L + 2*PAD, multiple of 128)
W = B * BLK            # folded lane width (lane-dense, multiple of 128)

# Roll-based im2col / x-shift correctness: every circular wrap must land on a
# zero lane, i.e. each 128-lane batch block needs >= PAD zero lanes on BOTH
# sides of its data window (left margin is PAD by construction, right margin
# is BLK - PAD - L).
assert BLK >= L + 2 * PAD and BLK - PAD - L >= PAD, (BLK, L, PAD)


def _roll(a, shift):
    """Static lane rotation (XLU slot); circular wraps land on zero lanes."""
    shift = shift % W
    if shift == 0:
        return a
    return pltpu.roll(a, shift=shift, axis=1)


# --- Pallas kernel -----------------------------------------------------------
def gru_kernel(xp_ref, wmf_ref, bm_ref, wxc_ref, whc_ref, bc_ref,
               h0_ref, gamma_ref, beta_ref, out_ref, m_ref):
    f32 = jnp.float32
    bf16 = jnp.bfloat16
    wmf = wmf_ref[...]                      # (C, KMIX*C)  bf16 mixer weight
    whc = whc_ref[...]                      # (C+2, C)     bf16 [w2h; w1h]

    # ---- hoisted, loop-invariant work --------------------------------------
    # Both 1x1-conv x-halves fused into ONE stacked matmul (rows [s2s2; s2s1]),
    # biases folded in; the per-step `x = x[:, :, 1:]` of the reference becomes
    # a static lane roll of this projection, precomputed for every step.
    gx = jnp.dot(wxc_ref[...], xp_ref[...].astype(bf16),
                 preferred_element_type=f32) + bc_ref[...]          # (C+2, W)
    gxs = [_roll(gx, -t) for t in range(STEPS)]
    bmb = jnp.broadcast_to(bm_ref[...], (C, W))            # mixer bias, once
    h = jnp.broadcast_to(h0_ref[...], (C, W))              # TrainableHState

    # Per-step validity masks (and the BN mask) hoisted out of the loop; the
    # shrinking window also implements the reference's h[:, :, :-1].
    pos = jax.lax.broadcasted_iota(jnp.int32, (1, W), 1) % BLK
    j = pos - PAD
    nonneg = j >= 0
    valids = [jnp.logical_and(nonneg, j < L - t) for t in range(STEPS)]
    bn_mask = jnp.logical_and(nonneg, j < L_OUT).astype(f32)

    for t in range(STEPS):                                  # static unroll
        hm = jnp.where(valids[t], h, 0.0)                   # conv zero padding

        # mixer: 25-tap conv as ONE bf16 matmul per step; the im2col RHS is
        # built with 25 XLU lane rolls stored (sublane/lane aligned, unmasked
        # vst) into a persistent VMEM scratch.
        for k in range(KMIX):
            m_ref[k * C:(k + 1) * C, :] = _roll(hm, PAD - k).astype(bf16)
        hmix = jnp.maximum(
            jnp.dot(wmf, m_ref[...], preferred_element_type=f32) + bmb,
            0.0)                                            # ReLU, (C, W) f32

        # Both h-halves fused into ONE matmul: w2h @ (hmix*rt) == (w2h@hmix)*rt
        # because rt broadcasts over channels -> one MXU push per step and the
        # matmul no longer waits behind sigmoid/rt.
        gh = jnp.dot(whc, hmix.astype(bf16), preferred_element_type=f32)
        gate = jax.nn.sigmoid(gxs[t][C:] + gh[C:])          # (2, W): [zt; rt]
        zt = gate[0:1, :]
        rt = gate[1:2, :]
        npre = gxs[t][:C] + gh[:C] * rt
        nt = npre * jax.nn.sigmoid(npre)                    # SiLU
        h = (1.0 - zt) * hmix + zt * nt
        # TODO(synk): at much larger W route sigmoid/SiLU through
        # pl.reciprocal(..., approx=True) (EUP slot); negligible at W=256.

    # ---- BatchNorm1d: training-mode batch stats, biased var, single pass ---
    # (single-pass E[x^2]-mean^2 is well conditioned here; switch to two-pass
    #  if activations ever have |mean| >> std).
    hv = h * bn_mask
    n = float(B * L_OUT)
    mean = jnp.sum(hv, axis=1, keepdims=True) / n
    var = jnp.sum(hv * hv, axis=1, keepdims=True) / n - mean * mean
    scale = gamma_ref[...] * jax.lax.rsqrt(var + EPS)
    shift = beta_ref[...] - mean * scale
    out_ref[...] = h * scale + shift                        # one FMA per elem
    # TODO(synk): running_mean / running_var buffer updates (training-mode
    # side effect of nn.BatchNorm1d) are not materialized as outputs.
    # TODO(synk): throughput scaling = widen W (more batch blocks per call);
    # on v7x shard lane blocks across the 2 TensorCores (pl.core_map /
    # parallel grid) and budget the (KMIX*C, W) bf16 im2col scratch
    # (800*W bytes) against the 64 MiB VMEM (set vmem_limit_bytes).


def parallel_gru_v7(x, h0, wm, bm, w1, b1, w2, b2, gamma, beta):
    # Wrapper-side layout plumbing only (lane-dense packing, weight stacking,
    # bf16 casts of MXU operands); all compute stays inside the kernel.
    f32, bf16 = jnp.float32, jnp.bfloat16
    xp = jnp.zeros((B, C, BLK), f32).at[:, :, PAD:PAD + L].set(x)
    xp = xp.transpose(1, 0, 2).reshape(C, W)                       # (C, B*128)
    wmf = jnp.transpose(wm, (1, 0, 2)).reshape(C, KMIX * C).astype(bf16)
    # Stacked 1x1-conv weights, row order [s2s2 (C rows); s2s1 (2 rows)] so
    # both row-slices of the fused matmul results stay sublane-aligned.
    wxc = jnp.concatenate([w2[:, :C], w1[:, :C]], axis=0).astype(bf16)
    whc = jnp.concatenate([w2[:, C:], w1[:, C:]], axis=0).astype(bf16)
    bc = jnp.concatenate([b2, b1], axis=0).astype(f32)             # (C+2, 1)

    vmem = pl.BlockSpec(memory_space=pltpu.MemorySpace.VMEM)
    out_flat = pl.pallas_call(
        gru_kernel,
        out_shape=jax.ShapeDtypeStruct((C, W), f32),               # lane-dense
        in_specs=[vmem] * 9,
        out_specs=vmem,
        scratch_shapes=[pltpu.VMEM((KMIX * C, W), bf16)],          # im2col RHS
    )(xp, wmf, bm, wxc, whc, bc, h0, gamma, beta)

    # Unpack the lane-dense slab back to (B, C, L_OUT).
    return out_flat.reshape(C, B, BLK).transpose(1, 0, 2)[:, :, PAD:PAD + L_OUT]


# --- pure-JAX reference (for correctness check) ------------------------------
def ref_forward(x, h0, wm, bm, w1, b1, w2, b2, gamma, beta,
                mm_dtype=jnp.float32):
    """Pure-JAX reference.  mm_dtype=float32 is the exact module semantics;
    mm_dtype=bfloat16 evaluates the same math under the kernel's MXU-operand
    precision policy (matmul/conv operands bf16, f32 accumulation, all
    elementwise math in f32)."""
    f32 = jnp.float32
    hp = jax.lax.Precision.HIGHEST
    cast = lambda a: a.astype(mm_dtype)
    dot = lambda w, a: jnp.einsum("oc,bcl->bol", w, a,
                                  preferred_element_type=f32, precision=hp)
    xc = cast(x)
    wm_oik = cast(jnp.transpose(wm, (1, 2, 0)))           # (O, I, K)
    w1x, w1h = cast(w1[:, :C]), cast(w1[:, C:])
    w2x, w2h = cast(w2[:, :C]), cast(w2[:, C:])
    h = jnp.broadcast_to(h0, x.shape).astype(f32)
    for t in range(STEPS):
        conv = jax.lax.conv_general_dilated(
            cast(h), wm_oik, window_strides=(1,), padding=[(PAD, PAD)],
            dimension_numbers=("NCH", "OIH", "NCH"),
            preferred_element_type=f32, precision=hp)
        h = jnp.maximum(conv + bm, 0.0)                    # mixer ReLU
        hc = cast(h)
        xt = xc[:, :, t:]
        g = jax.nn.sigmoid(dot(w1x, xt) + dot(w1h, hc) + b1)
        zt, rt = g[:, 0:1, :], g[:, 1:2, :]
        npre = dot(w2x, xt) + dot(w2h, hc) * rt + b2       # == w2 @ cat(x,h*rt)
        nt = npre * jax.nn.sigmoid(npre)                   # SiLU
        h = (1.0 - zt) * h + zt * nt
        h = h[:, :, :-1]
    mean = jnp.mean(h, axis=(0, 2), keepdims=True)
    var = jnp.mean((h - mean) ** 2, axis=(0, 2), keepdims=True)
    return (h - mean) / jnp.sqrt(var + EPS) * gamma + beta


if __name__ == "__main__":
    key = jax.random.PRNGKey(0)
    ks = jax.random.split(key, 10)

    # Deterministic synthetic parameters (shapes from the module __init__).
    x = jax.random.normal(ks[0], (B, C, L), jnp.float32)
    h0 = jax.random.normal(ks[1], (C, 1), jnp.float32)              # hinit.h
    wm = jax.random.normal(ks[2], (KMIX, C, C), jnp.float32) * 0.1  # mixer (K,O,I)
    bm = jax.random.normal(ks[3], (C, 1), jnp.float32) * 0.1
    w1 = jax.random.normal(ks[4], (2, 2 * C), jnp.float32) * 0.1    # s2s1 (O,Cin)
    b1 = jax.random.normal(ks[5], (2, 1), jnp.float32) * 0.1
    w2 = jax.random.normal(ks[6], (C, 2 * C), jnp.float32) * 0.1    # s2s2 (O,Cin)
    b2 = jax.random.normal(ks[7], (C, 1), jnp.float32) * 0.1
    gamma = jax.random.normal(ks[8], (C, 1), jnp.float32)           # BN weight
    beta = jax.random.normal(ks[9], (C, 1), jnp.float32)            # BN bias

    args = (x, h0, wm, bm, w1, b1, w2, b2, gamma, beta)
    out = jax.block_until_ready(parallel_gru_v7(*args))

    assert out.shape == (B, C, L_OUT), out.shape
    assert np.isfinite(np.asarray(out)).all()

    # Tight check: same math under the kernel's bf16 MXU-operand policy.
    ref_bf = jax.block_until_ready(ref_forward(*args, mm_dtype=jnp.bfloat16))
    np.testing.assert_allclose(np.asarray(out), np.asarray(ref_bf),
                               rtol=1e-2, atol=1e-2)

    # Sanity bound vs the exact f32 module semantics: bf16 MXU operands drift
    # over 3 recurrent conv steps + BN normalization, so this is a loose
    # drift bound only (the tight functional check is the one above).
    ref_f32 = jax.block_until_ready(ref_forward(*args, mm_dtype=jnp.float32))
    np.testing.assert_allclose(np.asarray(out), np.asarray(ref_f32),
                               rtol=5e-2, atol=3e-1)

    print("KERNEL_OK")
</pallas_src>

<mosaic_0001>
module attributes {stable_mosaic.version = 11 : i64} {
  func.func @gru_kernel(%arg0: memref<16x256xf32, #tpu.memory_space<vmem>>, %arg1: memref<16x400xbf16, #tpu.memory_space<vmem>>, %arg2: memref<16x1xf32, #tpu.memory_space<vmem>>, %arg3: memref<18x16xbf16, #tpu.memory_space<vmem>>, %arg4: memref<18x16xbf16, #tpu.memory_space<vmem>>, %arg5: memref<18x1xf32, #tpu.memory_space<vmem>>, %arg6: memref<16x1xf32, #tpu.memory_space<vmem>>, %arg7: memref<16x1xf32, #tpu.memory_space<vmem>>, %arg8: memref<16x1xf32, #tpu.memory_space<vmem>>, %arg9: memref<16x256xf32, #tpu.memory_space<vmem>>, %arg10: memref<400x256xbf16, #tpu.memory_space<vmem>>) attributes {dimension_semantics = [], scalar_prefetch = 0 : i64, scratch_operands = 1 : i64, tpu.core_type = #tpu.core_type<tc>} {
    %c0 = arith.constant 0 : index
    %c0_0 = arith.constant 0 : index
    %0 = vector.load %arg1[%c0, %c0_0] : memref<16x400xbf16, #tpu.memory_space<vmem>>, vector<16x400xbf16>
    %c0_1 = arith.constant 0 : index
    %c0_2 = arith.constant 0 : index
    %1 = vector.load %arg4[%c0_1, %c0_2] : memref<18x16xbf16, #tpu.memory_space<vmem>>, vector<18x16xbf16>
    %c0_3 = arith.constant 0 : index
    %c0_4 = arith.constant 0 : index
    %2 = vector.load %arg3[%c0_3, %c0_4] : memref<18x16xbf16, #tpu.memory_space<vmem>>, vector<18x16xbf16>
    %c0_5 = arith.constant 0 : index
    %c0_6 = arith.constant 0 : index
    %3 = vector.load %arg0[%c0_5, %c0_6] : memref<16x256xf32, #tpu.memory_space<vmem>>, vector<16x256xf32>
    %4 = arith.truncf %3 : vector<16x256xf32> to vector<16x256xbf16>
    %cst = arith.constant dense<0.000000e+00> : vector<18x256xf32>
    %5 = tpu.matmul %2, %4, %cst {dimension_numbers = #tpu.dot_dimension_numbers<[1], [0], [0], [1], [0, 0, 1, 1], [], []>} : vector<18x16xbf16>, vector<16x256xbf16>, vector<18x256xf32> -> vector<18x256xf32>
    %c0_7 = arith.constant 0 : index
    %c0_8 = arith.constant 0 : index
    %6 = vector.load %arg5[%c0_7, %c0_8] : memref<18x1xf32, #tpu.memory_space<vmem>>, vector<18x1xf32>
    %7 = vector.broadcast %6 : vector<18x1xf32> to vector<18x256xf32>
    %8 = arith.addf %5, %7 : vector<18x256xf32>
    %c255_i32 = arith.constant 255 : i32
    %9 = tpu.dynamic_rotate %8 by %c255_i32 dim 1 : vector<18x256xf32>, i32 -> vector<18x256xf32>
    %c254_i32 = arith.constant 254 : i32
    %10 = tpu.dynamic_rotate %8 by %c254_i32 dim 1 : vector<18x256xf32>, i32 -> vector<18x256xf32>
    %c0_9 = arith.constant 0 : index
    %c0_10 = arith.constant 0 : index
    %11 = vector.load %arg2[%c0_9, %c0_10] : memref<16x1xf32, #tpu.memory_space<vmem>>, vector<16x1xf32>
    %12 = vector.shape_cast %11 : vector<16x1xf32> to vector<16x1xf32>
    %13 = vector.broadcast %12 : vector<16x1xf32> to vector<16x256xf32>
    %c0_11 = arith.constant 0 : index
    %c0_12 = arith.constant 0 : index
    %14 = vector.load %arg6[%c0_11, %c0_12] : memref<16x1xf32, #tpu.memory_space<vmem>>, vector<16x1xf32>
    %15 = vector.shape_cast %14 : vector<16x1xf32> to vector<16x1xf32>
    %16 = vector.broadcast %15 : vector<16x1xf32> to vector<16x256xf32>
    %17 = tpu.iota {dimensions = array<i32: 1>} : vector<1x256xi32>
    %c128_i32 = arith.constant 128 : i32
    %c0_i32 = arith.constant 0 : i32
    %18 = arith.cmpi eq, %c128_i32, %c0_i32 : i32
    %c1_i32 = arith.constant 1 : i32
    %19 = arith.select %18, %c1_i32, %c128_i32 : i32
    %20 = vector.broadcast %19 : i32 to vector<1x256xi32>
    %21 = arith.remsi %17, %20 : vector<1x256xi32>
    %c0_i32_13 = arith.constant 0 : i32
    %22 = vector.broadcast %c0_i32_13 : i32 to vector<1x256xi32>
    %23 = arith.cmpi ne, %21, %22 : vector<1x256xi32>
    %c0_i32_14 = arith.constant 0 : i32
    %24 = vector.broadcast %c0_i32_14 : i32 to vector<1x256xi32>
    %25 = arith.cmpi slt, %21, %24 : vector<1x256xi32>
    %c0_i32_15 = arith.constant 0 : i32
    %26 = arith.cmpi slt, %19, %c0_i32_15 : i32
    %27 = vector.broadcast %26 : i1 to vector<1x256xi1>
    %28 = vector.broadcast %27 : vector<1x256xi1> to vector<1x256xi1>
    %29 = arith.xori %25, %28 : vector<1x256xi1>
    %30 = arith.andi %29, %23 : vector<1x256xi1>
    %31 = vector.broadcast %19 : i32 to vector<1x256xi32>
    %32 = arith.addi %21, %31 : vector<1x256xi32>
    %33 = arith.select %30, %32, %21 : vector<1x256xi1>, vector<1x256xi32>
    %c12_i32 = arith.constant 12 : i32
    %34 = vector.broadcast %c12_i32 : i32 to vector<1x256xi32>
    %35 = arith.subi %33, %34 : vector<1x256xi32>
    %c0_i32_16 = arith.constant 0 : i32
    %36 = vector.broadcast %c0_i32_16 : i32 to vector<1x256xi32>
    %37 = arith.cmpi sge, %35, %36 : vector<1x256xi32>
    %c64_i32 = arith.constant 64 : i32
    %38 = vector.broadcast %c64_i32 : i32 to vector<1x256xi32>
    %39 = arith.cmpi slt, %35, %38 : vector<1x256xi32>
    %40 = arith.andi %37, %39 : vector<1x256xi1>
    %c63_i32 = arith.constant 63 : i32
    %41 = vector.broadcast %c63_i32 : i32 to vector<1x256xi32>
    %42 = arith.cmpi slt, %35, %41 : vector<1x256xi32>
    %43 = arith.andi %37, %42 : vector<1x256xi1>
    %c62_i32 = arith.constant 62 : i32
    %44 = vector.broadcast %c62_i32 : i32 to vector<1x256xi32>
    %45 = arith.cmpi slt, %35, %44 : vector<1x256xi32>
    %46 = arith.andi %37, %45 : vector<1x256xi1>
    %c61_i32 = arith.constant 61 : i32
    %47 = vector.broadcast %c61_i32 : i32 to vector<1x256xi32>
    %48 = arith.cmpi slt, %35, %47 : vector<1x256xi32>
    %49 = arith.andi %37, %48 : vector<1x256xi1>
    %50 = arith.extui %49 : vector<1x256xi1> to vector<1x256xi32>
    %51 = arith.sitofp %50 : vector<1x256xi32> to vector<1x256xf32>
    %cst_17 = arith.constant 0.000000e+00 : f32
    %52 = vector.shape_cast %40 : vector<1x256xi1> to vector<1x256xi1>
    %53 = vector.broadcast %52 : vector<1x256xi1> to vector<16x256xi1>
    %54 = vector.broadcast %cst_17 : f32 to vector<16x256xf32>
    %55 = arith.select %53, %16, %54 : vector<16x256xi1>, vector<16x256xf32>
    %c12_i32_18 = arith.constant 12 : i32
    %56 = tpu.dynamic_rotate %55 by %c12_i32_18 dim 1 : vector<16x256xf32>, i32 -> vector<16x256xf32>
    %57 = arith.truncf %56 : vector<16x256xf32> to vector<16x256xbf16>
    %c0_19 = arith.constant 0 : index
    %c0_20 = arith.constant 0 : index
    %58 = vector.load %arg10[%c0_19, %c0_20] : memref<400x256xbf16, #tpu.memory_space<vmem>>, vector<16x256xbf16>
    tpu.vector_store %arg10[%c0_19, %c0_20], %57 {strides = array<i32>} : memref<400x256xbf16, #tpu.memory_space<vmem>>, vector<16x256xbf16>,
    %c11_i32 = arith.constant 11 : i32
    %59 = tpu.dynamic_rotate %55 by %c11_i32 dim 1 : vector<16x256xf32>, i32 -> vector<16x256xf32>
    %60 = arith.truncf %59 : vector<16x256xf32> to vector<16x256xbf16>
    %c16 = arith.constant 16 : index
    %c0_21 = arith.constant 0 : index
    %61 = vector.load %arg10[%c16, %c0_21] : memref<400x256xbf16, #tpu.memory_space<vmem>>, vector<16x256xbf16>
    tpu.vector_store %arg10[%c16, %c0_21], %60 {strides = array<i32>} : memref<400x256xbf16, #tpu.memory_space<vmem>>, vector<16x256xbf16>,
    %c10_i32 = arith.constant 10 : i32
    %62 = tpu.dynamic_rotate %55 by %c10_i32 dim 1 : vector<16x256xf32>, i32 -> vector<16x256xf32>
    %63 = arith.truncf %62 : vector<16x256xf32> to vector<16x256xbf16>
    %c32 = arith.constant 32 : index
    %c0_22 = arith.constant 0 : index
    %64 = vector.load %arg10[%c32, %c0_22] : memref<400x256xbf16, #tpu.memory_space<vmem>>, vector<16x256xbf16>
    tpu.vector_store %arg10[%c32, %c0_22], %63 {strides = array<i32>} : memref<400x256xbf16, #tpu.memory_space<vmem>>, vector<16x256xbf16>,
    %c9_i32 = arith.constant 9 : i32
    %65 = tpu.dynamic_rotate %55 by %c9_i32 dim 1 : vector<16x256xf32>, i32 -> vector<16x256xf32>
    %66 = arith.truncf %65 : vector<16x256xf32> to vector<16x256xbf16>
    %c48 = arith.constant 48 : index
    %c0_23 = arith.constant 0 : index
    %67 = vector.load %arg10[%c48, %c0_23] : memref<400x256xbf16, #tpu.memory_space<vmem>>, vector<16x256xbf16>
    tpu.vector_store %arg10[%c48, %c0_23], %66 {strides = array<i32>} : memref<400x256xbf16, #tpu.memory_space<vmem>>, vector<16x256xbf16>,
    %c8_i32 = arith.constant 8 : i32
    %68 = tpu.dynamic_rotate %55 by %c8_i32 dim 1 : vector<16x256xf32>, i32 -> vector<16x256xf32>
    %69 = arith.truncf %68 : vector<16x256xf32> to vector<16x256xbf16>
    %c64 = arith.constant 64 : index
    %c0_24 = arith.constant 0 : index
    %70 = vector.load %arg10[%c64, %c0_24] : memref<400x256xbf16, #tpu.memory_space<vmem>>, vector<16x256xbf16>
    tpu.vector_store %arg10[%c64, %c0_24], %69 {strides = array<i32>} : memref<400x256xbf16, #tpu.memory_space<vmem>>, vector<16x256xbf16>,
    %c7_i32 = arith.constant 7 : i32
    %71 = tpu.dynamic_rotate %55 by %c7_i32 dim 1 : vector<16x256xf32>, i32 -> vector<16x256xf32>
    %72 = arith.truncf %71 : vector<16x256xf32> to vector<16x256xbf16>
    %c80 = arith.constant 80 : index
    %c0_25 = arith.constant 0 : index
    %73 = vector.load %arg10[%c80, %c0_25] : memref<400x256xbf16, #tpu.memory_space<vmem>>, vector<16x256xbf16>
    tpu.vector_store %arg10[%c80, %c0_25], %72 {strides = array<i32>} : memref<400x256xbf16, #tpu.memory_space<vmem>>, vector<16x256xbf16>,
    %c6_i32 = arith.constant 6 : i32
    %74 = tpu.dynamic_rotate %55 by %c6_i32 dim 1 : vector<16x256xf32>, i32 -> vector<16x256xf32>
    %75 = arith.truncf %74 : vector<16x256xf32> to vector<16x256xbf16>
    %c96 = arith.constant 96 : index
    %c0_26 = arith.constant 0 : index
    %76 = vector.load %arg10[%c96, %c0_26] : memref<400x256xbf16, #tpu.memory_space<vmem>>, vector<16x256xbf16>
    tpu.vector_store %arg10[%c96, %c0_26], %75 {strides = array<i32>} : memref<400x256xbf16, #tpu.memory_space<vmem>>, vector<16x256xbf16>,
    %c5_i32 = arith.constant 5 : i32
    %77 = tpu.dynamic_rotate %55 by %c5_i32 dim 1 : vector<16x256xf32>, i32 -> vector<16x256xf32>
    %78 = arith.truncf %77 : vector<16x256xf32> to vector<16x256xbf16>
    %c112 = arith.constant 112 : index
    %c0_27 = arith.constant 0 : index
    %79 = vector.load %arg10[%c112, %c0_27] : memref<400x256xbf16, #tpu.memory_space<vmem>>, vector<16x256xbf16>
    tpu.vector_store %arg10[%c112, %c0_27], %78 {strides = array<i32>} : memref<400x256xbf16, #tpu.memory_space<vmem>>, vector<16x256xbf16>,
    %c4_i32 = arith.constant 4 : i32
    %80 = tpu.dynamic_rotate %55 by %c4_i32 dim 1 : vector<16x256xf32>, i32 -> vector<16x256xf32>
    %81 = arith.truncf %80 : vector<16x256xf32> to vector<16x256xbf16>
    %c128 = arith.constant 128 : index
    %c0_28 = arith.constant 0 : index
    %82 = vector.load %arg10[%c128, %c0_28] : memref<400x256xbf16, #tpu.memory_space<vmem>>, vector<16x256xbf16>
    tpu.vector_store %arg10[%c128, %c0_28], %81 {strides = array<i32>} : memref<400x256xbf16, #tpu.memory_space<vmem>>, vector<16x256xbf16>,
    %c3_i32 = arith.constant 3 : i32
    %83 = tpu.dynamic_rotate %55 by %c3_i32 dim 1 : vector<16x256xf32>, i32 -> vector<16x256xf32>
    %84 = arith.truncf %83 : vector<16x256xf32> to vector<16x256xbf16>
    %c144 = arith.constant 144 : index
    %c0_29 = arith.constant 0 : index
    %85 = vector.load %arg10[%c144, %c0_29] : memref<400x256xbf16, #tpu.memory_space<vmem>>, vector<16x256xbf16>
    tpu.vector_store %arg10[%c144, %c0_29], %84 {strides = array<i32>} : memref<400x256xbf16, #tpu.memory_space<vmem>>, vector<16x256xbf16>,
    %c2_i32 = arith.constant 2 : i32
    %86 = tpu.dynamic_rotate %55 by %c2_i32 dim 1 : vector<16x256xf32>, i32 -> vector<16x256xf32>
    %87 = arith.truncf %86 : vector<16x256xf32> to vector<16x256xbf16>
    %c160 = arith.constant 160 : index
    %c0_30 = arith.constant 0 : index
    %88 = vector.load %arg10[%c160, %c0_30] : memref<400x256xbf16, #tpu.memory_space<vmem>>, vector<16x256xbf16>
    tpu.vector_store %arg10[%c160, %c0_30], %87 {strides = array<i32>} : memref<400x256xbf16, #tpu.memory_space<vmem>>, vector<16x256xbf16>,
    %c1_i32_31 = arith.constant 1 : i32
    %89 = tpu.dynamic_rotate %55 by %c1_i32_31 dim 1 : vector<16x256xf32>, i32 -> vector<16x256xf32>
    %90 = arith.truncf %89 : vector<16x256xf32> to vector<16x256xbf16>
    %c176 = arith.constant 176 : index
    %c0_32 = arith.constant 0 : index
    %91 = vector.load %arg10[%c176, %c0_32] : memref<400x256xbf16, #tpu.memory_space<vmem>>, vector<16x256xbf16>
    tpu.vector_store %arg10[%c176, %c0_32], %90 {strides = array<i32>} : memref<400x256xbf16, #tpu.memory_space<vmem>>, vector<16x256xbf16>,
    %92 = arith.truncf %55 : vector<16x256xf32> to vector<16x256xbf16>
    %c192 = arith.constant 192 : index
    %c0_33 = arith.constant 0 : index
    %93 = vector.load %arg10[%c192, %c0_33] : memref<400x256xbf16, #tpu.memory_space<vmem>>, vector<16x256xbf16>
    tpu.vector_store %arg10[%c192, %c0_33], %92 {strides = array<i32>} : memref<400x256xbf16, #tpu.memory_space<vmem>>, vector<16x256xbf16>,
    %c255_i32_34 = arith.constant 255 : i32
    %94 = tpu.dynamic_rotate %55 by %c255_i32_34 dim 1 : vector<16x256xf32>, i32 -> vector<16x256xf32>
    %95 = arith.truncf %94 : vector<16x256xf32> to vector<16x256xbf16>
    %c208 = arith.constant 208 : index
    %c0_35 = arith.constant 0 : index
    %96 = vector.load %arg10[%c208, %c0_35] : memref<400x256xbf16, #tpu.memory_space<vmem>>, vector<16x256xbf16>
    tpu.vector_store %arg10[%c208, %c0_35], %95 {strides = array<i32>} : memref<400x256xbf16, #tpu.memory_space<vmem>>, vector<16x256xbf16>,
    %c254_i32_36 = arith.constant 254 : i32
    %97 = tpu.dynamic_rotate %55 by %c254_i32_36 dim 1 : vector<16x256xf32>, i32 -> vector<16x256xf32>
    %98 = arith.truncf %97 : vector<16x256xf32> to vector<16x256xbf16>
    %c224 = arith.constant 224 : index
    %c0_37 = arith.constant 0 : index
    %99 = vector.load %arg10[%c224, %c0_37] : memref<400x256xbf16, #tpu.memory_space<vmem>>, vector<16x256xbf16>
    tpu.vector_store %arg10[%c224, %c0_37], %98 {strides = array<i32>} : memref<400x256xbf16, #tpu.memory_space<vmem>>, vector<16x256xbf16>,
    %c253_i32 = arith.constant 253 : i32
    %100 = tpu.dynamic_rotate %55 by %c253_i32 dim 1 : vector<16x256xf32>, i32 -> vector<16x256xf32>
    %101 = arith.truncf %100 : vector<16x256xf32> to vector<16x256xbf16>
    %c240 = arith.constant 240 : index
    %c0_38 = arith.constant 0 : index
    %102 = vector.load %arg10[%c240, %c0_38] : memref<400x256xbf16, #tpu.memory_space<vmem>>, vector<16x256xbf16>
    tpu.vector_store %arg10[%c240, %c0_38], %101 {strides = array<i32>} : memref<400x256xbf16, #tpu.memory_space<vmem>>, vector<16x256xbf16>,
    %c252_i32 = arith.constant 252 : i32
    %103 = tpu.dynamic_rotate %55 by %c252_i32 dim 1 : vector<16x256xf32>, i32 -> vector<16x256xf32>
    %104 = arith.truncf %103 : vector<16x256xf32> to vector<16x256xbf16>
    %c256 = arith.constant 256 : index
    %c0_39 = arith.constant 0 : index
    %105 = vector.load %arg10[%c256, %c0_39] : memref<400x256xbf16, #tpu.memory_space<vmem>>, vector<16x256xbf16>
    tpu.vector_store %arg10[%c256, %c0_39], %104 {strides = array<i32>} : memref<400x256xbf16, #tpu.memory_space<vmem>>, vector<16x256xbf16>,
    %c251_i32 = arith.constant 251 : i32
    %106 = tpu.dynamic_rotate %55 by %c251_i32 dim 1 : vector<16x256xf32>, i32 -> vector<16x256xf32>
    %107 = arith.truncf %106 : vector<16x256xf32> to vector<16x256xbf16>
    %c272 = arith.constant 272 : index
    %c0_40 = arith.constant 0 : index
    %108 = vector.load %arg10[%c272, %c0_40] : memref<400x256xbf16, #tpu.memory_space<vmem>>, vector<16x256xbf16>
    tpu.vector_store %arg10[%c272, %c0_40], %107 {strides = array<i32>} : memref<400x256xbf16, #tpu.memory_space<vmem>>, vector<16x256xbf16>,
    %c250_i32 = arith.constant 250 : i32
    %109 = tpu.dynamic_rotate %55 by %c250_i32 dim 1 : vector<16x256xf32>, i32 -> vector<16x256xf32>
    %110 = arith.truncf %109 : vector<16x256xf32> to vector<16x256xbf16>
    %c288 = arith.constant 288 : index
    %c0_41 = arith.constant 0 : index
    %111 = vector.load %arg10[%c288, %c0_41] : memref<400x256xbf16, #tpu.memory_space<vmem>>, vector<16x256xbf16>
    tpu.vector_store %arg10[%c288, %c0_41], %110 {strides = array<i32>} : memref<400x256xbf16, #tpu.memory_space<vmem>>, vector<16x256xbf16>,
    %c249_i32 = arith.constant 249 : i32
    %112 = tpu.dynamic_rotate %55 by %c249_i32 dim 1 : vector<16x256xf32>, i32 -> vector<16x256xf32>
    %113 = arith.truncf %112 : vector<16x256xf32> to vector<16x256xbf16>
    %c304 = arith.constant 304 : index
    %c0_42 = arith.constant 0 : index
    %114 = vector.load %arg10[%c304, %c0_42] : memref<400x256xbf16, #tpu.memory_space<vmem>>, vector<16x256xbf16>
    tpu.vector_store %arg10[%c304, %c0_42], %113 {strides = array<i32>} : memref<400x256xbf16, #tpu.memory_space<vmem>>, vector<16x256xbf16>,
    %c248_i32 = arith.constant 248 : i32
    %115 = tpu.dynamic_rotate %55 by %c248_i32 dim 1 : vector<16x256xf32>, i32 -> vector<16x256xf32>
    %116 = arith.truncf %115 : vector<16x256xf32> to vector<16x256xbf16>
    %c320 = arith.constant 320 : index
    %c0_43 = arith.constant 0 : index
    %117 = vector.load %arg10[%c320, %c0_43] : memref<400x256xbf16, #tpu.memory_space<vmem>>, vector<16x256xbf16>
    tpu.vector_store %arg10[%c320, %c0_43], %116 {strides = array<i32>} : memref<400x256xbf16, #tpu.memory_space<vmem>>, vector<16x256xbf16>,
    %c247_i32 = arith.constant 247 : i32
    %118 = tpu.dynamic_rotate %55 by %c247_i32 dim 1 : vector<16x256xf32>, i32 -> vector<16x256xf32>
    %119 = arith.truncf %118 : vector<16x256xf32> to vector<16x256xbf16>
    %c336 = arith.constant 336 : index
    %c0_44 = arith.constant 0 : index
    %120 = vector.load %arg10[%c336, %c0_44] : memref<400x256xbf16, #tpu.memory_space<vmem>>, vector<16x256xbf16>
    tpu.vector_store %arg10[%c336, %c0_44], %119 {strides = array<i32>} : memref<400x256xbf16, #tpu.memory_space<vmem>>, vector<16x256xbf16>,
    %c246_i32 = arith.constant 246 : i32
    %121 = tpu.dynamic_rotate %55 by %c246_i32 dim 1 : vector<16x256xf32>, i32 -> vector<16x256xf32>
    %122 = arith.truncf %121 : vector<16x256xf32> to vector<16x256xbf16>
    %c352 = arith.constant 352 : index
    %c0_45 = arith.constant 0 : index
    %123 = vector.load %arg10[%c352, %c0_45] : memref<400x256xbf16, #tpu.memory_space<vmem>>, vector<16x256xbf16>
    tpu.vector_store %arg10[%c352, %c0_45], %122 {strides = array<i32>} : memref<400x256xbf16, #tpu.memory_space<vmem>>, vector<16x256xbf16>,
    %c245_i32 = arith.constant 245 : i32
    %124 = tpu.dynamic_rotate %55 by %c245_i32 dim 1 : vector<16x256xf32>, i32 -> vector<16x256xf32>
    %125 = arith.truncf %124 : vector<16x256xf32> to vector<16x256xbf16>
    %c368 = arith.constant 368 : index
    %c0_46 = arith.constant 0 : index
    %126 = vector.load %arg10[%c368, %c0_46] : memref<400x256xbf16, #tpu.memory_space<vmem>>, vector<16x256xbf16>
    tpu.vector_store %arg10[%c368, %c0_46], %125 {strides = array<i32>} : memref<400x256xbf16, #tpu.memory_space<vmem>>, vector<16x256xbf16>,
    %c244_i32 = arith.constant 244 : i32
    %127 = tpu.dynamic_rotate %55 by %c244_i32 dim 1 : vector<16x256xf32>, i32 -> vector<16x256xf32>
    %128 = arith.truncf %127 : vector<16x256xf32> to vector<16x256xbf16>
    %c384 = arith.constant 384 : index
    %c0_47 = arith.constant 0 : index
    %129 = vector.load %arg10[%c384, %c0_47] : memref<400x256xbf16, #tpu.memory_space<vmem>>, vector<16x256xbf16>
    tpu.vector_store %arg10[%c384, %c0_47], %128 {strides = array<i32>} : memref<400x256xbf16, #tpu.memory_space<vmem>>, vector<16x256xbf16>,
    %c0_48 = arith.constant 0 : index
    %c0_49 = arith.constant 0 : index
    %130 = vector.load %arg10[%c0_48, %c0_49] : memref<400x256xbf16, #tpu.memory_space<vmem>>, vector<400x256xbf16>
    %cst_50 = arith.constant dense<0.000000e+00> : vector<16x256xf32>
    %131 = tpu.matmul %0, %130, %cst_50 {dimension_numbers = #tpu.dot_dimension_numbers<[1], [0], [0], [1], [0, 0, 1, 1], [], []>} : vector<16x400xbf16>, vector<400x256xbf16>, vector<16x256xf32> -> vector<16x256xf32>
    %132 = arith.addf %131, %13 : vector<16x256xf32>
    %cst_51 = arith.constant 0.000000e+00 : f32
    %133 = vector.broadcast %cst_51 : f32 to vector<16x256xf32>
    %134 = arith.maximumf %132, %133 : vector<16x256xf32>
    %135 = arith.truncf %134 : vector<16x256xf32> to vector<16x256xbf16>
    %cst_52 = arith.constant dense<0.000000e+00> : vector<18x256xf32>
    %136 = tpu.matmul %1, %135, %cst_52 {dimension_numbers = #tpu.dot_dimension_numbers<[1], [0], [0], [1], [0, 0, 1, 1], [], []>} : vector<18x16xbf16>, vector<16x256xbf16>, vector<18x256xf32> -> vector<18x256xf32>
    %137 = vector.extract_strided_slice %8 {offsets = [16, 0], sizes = [2, 256], strides = [1, 1]} : vector<18x256xf32> to vector<2x256xf32>
    %138 = vector.extract_strided_slice %136 {offsets = [16, 0], sizes = [2, 256], strides = [1, 1]} : vector<18x256xf32> to vector<2x256xf32>
    %139 = arith.addf %137, %138 : vector<2x256xf32>
    %140 = arith.negf %139 : vector<2x256xf32>
    %141 = math.exp %140 : vector<2x256xf32>
    %cst_53 = arith.constant 1.000000e+00 : f32
    %142 = vector.broadcast %cst_53 : f32 to vector<2x256xf32>
    %143 = arith.addf %142, %141 : vector<2x256xf32>
    %144 = arith.divf %142, %143 : vector<2x256xf32>
    %145 = vector.extract_strided_slice %144 {offsets = [0, 0], sizes = [1, 256], strides = [1, 1]} : vector<2x256xf32> to vector<1x256xf32>
    %146 = vector.extract_strided_slice %144 {offsets = [1, 0], sizes = [1, 256], strides = [1, 1]} : vector<2x256xf32> to vector<1x256xf32>
    %147 = vector.extract_strided_slice %8 {offsets = [0, 0], sizes = [16, 256], strides = [1, 1]} : vector<18x256xf32> to vector<16x256xf32>
    %148 = vector.extract_strided_slice %136 {offsets = [0, 0], sizes = [16, 256], strides = [1, 1]} : vector<18x256xf32> to vector<16x256xf32>
    %149 = vector.broadcast %146 : vector<1x256xf32> to vector<16x256xf32>
    %150 = arith.mulf %148, %149 : vector<16x256xf32>
    %151 = arith.addf %147, %150 : vector<16x256xf32>
    %152 = arith.negf %151 : vector<16x256xf32>
    %153 = math.exp %152 : vector<16x256xf32>
    %cst_54 = arith.constant 1.000000e+00 : f32
    %154 = vector.broadcast %cst_54 : f32 to vector<16x256xf32>
    %155 = arith.addf %154, %153 : vector<16x256xf32>
    %156 = arith.divf %154, %155 : vector<16x256xf32>
    %157 = arith.mulf %151, %156 : vector<16x256xf32>
    %cst_55 = arith.constant 1.000000e+00 : f32
    %158 = vector.broadcast %cst_55 : f32 to vector<1x256xf32>
    %159 = arith.subf %158, %145 : vector<1x256xf32>
    %160 = vector.broadcast %159 : vector<1x256xf32> to vector<16x256xf32>
    %161 = arith.mulf %160, %134 : vector<16x256xf32>
    %162 = vector.broadcast %145 : vector<1x256xf32> to vector<16x256xf32>
    %163 = arith.mulf %162, %157 : vector<16x256xf32>
    %164 = arith.addf %161, %163 : vector<16x256xf32>
    %cst_56 = arith.constant 0.000000e+00 : f32
    %165 = vector.shape_cast %43 : vector<1x256xi1> to vector<1x256xi1>
    %166 = vector.broadcast %165 : vector<1x256xi1> to vector<16x256xi1>
    %167 = vector.broadcast %cst_56 : f32 to vector<16x256xf32>
    %168 = arith.select %166, %164, %167 : vector<16x256xi1>, vector<16x256xf32>
    %c12_i32_57 = arith.constant 12 : i32
    %169 = tpu.dynamic_rotate %168 by %c12_i32_57 dim 1 : vector<16x256xf32>, i32 -> vector<16x256xf32>
    %170 = arith.truncf %169 : vector<16x256xf32> to vector<16x256xbf16>
    %c0_58 = arith.constant 0 : index
    %c0_59 = arith.constant 0 : index
    %171 = vector.load %arg10[%c0_58, %c0_59] : memref<400x256xbf16, #tpu.memory_space<vmem>>, vector<16x256xbf16>
    tpu.vector_store %arg10[%c0_58, %c0_59], %170 {strides = array<i32>} : memref<400x256xbf16, #tpu.memory_space<vmem>>, vector<16x256xbf16>,
    %c11_i32_60 = arith.constant 11 : i32
    %172 = tpu.dynamic_rotate %168 by %c11_i32_60 dim 1 : vector<16x256xf32>, i32 -> vector<16x256xf32>
    %173 = arith.truncf %172 : vector<16x256xf32> to vector<16x256xbf16>
    %c16_61 = arith.constant 16 : index
    %c0_62 = arith.constant 0 : index
    %174 = vector.load %arg10[%c16_61, %c0_62] : memref<400x256xbf16, #tpu.memory_space<vmem>>, vector<16x256xbf16>
    tpu.vector_store %arg10[%c16_61, %c0_62], %173 {strides = array<i32>} : memref<400x256xbf16, #tpu.memory_space<vmem>>, vector<16x256xbf16>,
    %c10_i32_63 = arith.constant 10 : i32
    %175 = tpu.dynamic_rotate %168 by %c10_i32_63 dim 1 : vector<16x256xf32>, i32 -> vector<16x256xf32>
    %176 = arith.truncf %175 : vector<16x256xf32> to vector<16x256xbf16>
    %c32_64 = arith.constant 32 : index
    %c0_65 = arith.constant 0 : index
    %177 = vector.load %arg10[%c32_64, %c0_65] : memref<400x256xbf16, #tpu.memory_space<vmem>>, vector<16x256xbf16>
    tpu.vector_store %arg10[%c32_64, %c0_65], %176 {strides = array<i32>} : memref<400x256xbf16, #tpu.memory_space<vmem>>, vector<16x256xbf16>,
    %c9_i32_66 = arith.constant 9 : i32
    %178 = tpu.dynamic_rotate %168 by %c9_i32_66 dim 1 : vector<16x256xf32>, i32 -> vector<16x256xf32>
    %179 = arith.truncf %178 : vector<16x256xf32> to vector<16x256xbf16>
    %c48_67 = arith.constant 48 : index
    %c0_68 = arith.constant 0 : index
    %180 = vector.load %arg10[%c48_67, %c0_68] : memref<400x256xbf16, #tpu.memory_space<vmem>>, vector<16x256xbf16>
    tpu.vector_store %arg10[%c48_67, %c0_68], %179 {strides = array<i32>} : memref<400x256xbf16, #tpu.memory_space<vmem>>, vector<16x256xbf16>,
    %c8_i32_69 = arith.constant 8 : i32
    %181 = tpu.dynamic_rotate %168 by %c8_i32_69 dim 1 : vector<16x256xf32>, i32 -> vector<16x256xf32>
    %182 = arith.truncf %181 : vector<16x256xf32> to vector<16x256xbf16>
    %c64_70 = arith.constant 64 : index
    %c0_71 = arith.constant 0 : index
    %183 = vector.load %arg10[%c64_70, %c0_71] : memref<400x256xbf16, #tpu.memory_space<vmem>>, vector<16x256xbf16>
    tpu.vector_store %arg10[%c64_70, %c0_71], %182 {strides = array<i32>} : memref<400x256xbf16, #tpu.memory_space<vmem>>, vector<16x256xbf16>,
    %c7_i32_72 = arith.constant 7 : i32
    %184 = tpu.dynamic_rotate %168 by %c7_i32_72 dim 1 : vector<16x256xf32>, i32 -> vector<16x256xf32>
    %185 = arith.truncf %184 : vector<16x256xf32> to vector<16x256xbf16>
    %c80_73 = arith.constant 80 : index
    %c0_74 = arith.constant 0 : index
    %186 = vector.load %arg10[%c80_73, %c0_74] : memref<400x256xbf16, #tpu.memory_space<vmem>>, vector<16x256xbf16>
    tpu.vector_store %arg10[%c80_73, %c0_74], %185 {strides = array<i32>} : memref<400x256xbf16, #tpu.memory_space<vmem>>, vector<16x256xbf16>,
    %c6_i32_75 = arith.constant 6 : i32
    %187 = tpu.dynamic_rotate %168 by %c6_i32_75 dim 1 : vector<16x256xf32>, i32 -> vector<16x256xf32>
    %188 = arith.truncf %187 : vector<16x256xf32> to vector<16x256xbf16>
    %c96_76 = arith.constant 96 : index
    %c0_77 = arith.constant 0 : index
    %189 = vector.load %arg10[%c96_76, %c0_77] : memref<400x256xbf16, #tpu.memory_space<vmem>>, vector<16x256xbf16>
    tpu.vector_store %arg10[%c96_76, %c0_77], %188 {strides = array<i32>} : memref<400x256xbf16, #tpu.memory_space<vmem>>, vector<16x256xbf16>,
    %c5_i32_78 = arith.constant 5 : i32
    %190 = tpu.dynamic_rotate %168 by %c5_i32_78 dim 1 : vector<16x256xf32>, i32 -> vector<16x256xf32>
    %191 = arith.truncf %190 : vector<16x256xf32> to vector<16x256xbf16>
    %c112_79 = arith.constant 112 : index
    %c0_80 = arith.constant 0 : index
    %192 = vector.load %arg10[%c112_79, %c0_80] : memref<400x256xbf16, #tpu.memory_space<vmem>>, vector<16x256xbf16>
    tpu.vector_store %arg10[%c112_79, %c0_80], %191 {strides = array<i32>} : memref<400x256xbf16, #tpu.memory_space<vmem>>, vector<16x256xbf16>,
    %c4_i32_81 = arith.constant 4 : i32
    %193 = tpu.dynamic_rotate %168 by %c4_i32_81 dim 1 : vector<16x256xf32>, i32 -> vector<16x256xf32>
    %194 = arith.truncf %193 : vector<16x256xf32> to vector<16x256xbf16>
    %c128_82 = arith.constant 128 : index
    %c0_83 = arith.constant 0 : index
    %195 = vector.load %arg10[%c128_82, %c0_83] : memref<400x256xbf16, #tpu.memory_space<vmem>>, vector<16x256xbf16>
    tpu.vector_store %arg10[%c128_82, %c0_83], %194 {strides = array<i32>} : memref<400x256xbf16, #tpu.memory_space<vmem>>, vector<16x256xbf16>,
    %c3_i32_84 = arith.constant 3 : i32
    %196 = tpu.dynamic_rotate %168 by %c3_i32_84 dim 1 : vector<16x256xf32>, i32 -> vector<16x256xf32>
    %197 = arith.truncf %196 : vector<16x256xf32> to vector<16x256xbf16>
    %c144_85 = arith.constant 144 : index
    %c0_86 = arith.constant 0 : index
    %198 = vector.load %arg10[%c144_85, %c0_86] : memref<400x256xbf16, #tpu.memory_space<vmem>>, vector<16x256xbf16>
    tpu.vector_store %arg10[%c144_85, %c0_86], %197 {strides = array<i32>} : memref<400x256xbf16, #tpu.memory_space<vmem>>, vector<16x256xbf16>,
    %c2_i32_87 = arith.constant 2 : i32
    %199 = tpu.dynamic_rotate %168 by %c2_i32_87 dim 1 : vector<16x256xf32>, i32 -> vector<16x256xf32>
    %200 = arith.truncf %199 : vector<16x256xf32> to vector<16x256xbf16>
    %c160_88 = arith.constant 160 : index
    %c0_89 = arith.constant 0 : index
    %201 = vector.load %arg10[%c160_88, %c0_89] : memref<400x256xbf16, #tpu.memory_space<vmem>>, vector<16x256xbf16>
    tpu.vector_store %arg10[%c160_88, %c0_89], %200 {strides = array<i32>} : memref<400x256xbf16, #tpu.memory_space<vmem>>, vector<16x256xbf16>,
    %c1_i32_90 = arith.constant 1 : i32
    %202 = tpu.dynamic_rotate %168 by %c1_i32_90 dim 1 : vector<16x256xf32>, i32 -> vector<16x256xf32>
    %203 = arith.truncf %202 : vector<16x256xf32> to vector<16x256xbf16>
    %c176_91 = arith.constant 176 : index
    %c0_92 = arith.constant 0 : index
    %204 = vector.load %arg10[%c176_91, %c0_92] : memref<400x256xbf16, #tpu.memory_space<vmem>>, vector<16x256xbf16>
    tpu.vector_store %arg10[%c176_91, %c0_92], %203 {strides = array<i32>} : memref<400x256xbf16, #tpu.memory_space<vmem>>, vector<16x256xbf16>,
    %205 = arith.truncf %168 : vector<16x256xf32> to vector<16x256xbf16>
    %c192_93 = arith.constant 192 : index
    %c0_94 = arith.constant 0 : index
    %206 = vector.load %arg10[%c192_93, %c0_94] : memref<400x256xbf16, #tpu.memory_space<vmem>>, vector<16x256xbf16>
    tpu.vector_store %arg10[%c192_93, %c0_94], %205 {strides = array<i32>} : memref<400x256xbf16, #tpu.memory_space<vmem>>, vector<16x256xbf16>,
    %c255_i32_95 = arith.constant 255 : i32
    %207 = tpu.dynamic_rotate %168 by %c255_i32_95 dim 1 : vector<16x256xf32>, i32 -> vector<16x256xf32>
    %208 = arith.truncf %207 : vector<16x256xf32> to vector<16x256xbf16>
    %c208_96 = arith.constant 208 : index
    %c0_97 = arith.constant 0 : index
    %209 = vector.load %arg10[%c208_96, %c0_97] : memref<400x256xbf16, #tpu.memory_space<vmem>>, vector<16x256xbf16>
    tpu.vector_store %arg10[%c208_96, %c0_97], %208 {strides = array<i32>} : memref<400x256xbf16, #tpu.memory_space<vmem>>, vector<16x256xbf16>,
    %c254_i32_98 = arith.constant 254 : i32
    %210 = tpu.dynamic_rotate %168 by %c254_i32_98 dim 1 : vector<16x256xf32>, i32 -> vector<16x256xf32>
    %211 = arith.truncf %210 : vector<16x256xf32> to vector<16x256xbf16>
    %c224_99 = arith.constant 224 : index
    %c0_100 = arith.constant 0 : index
    %212 = vector.load %arg10[%c224_99, %c0_100] : memref<400x256xbf16, #tpu.memory_space<vmem>>, vector<16x256xbf16>
    tpu.vector_store %arg10[%c224_99, %c0_100], %211 {strides = array<i32>} : memref<400x256xbf16, #tpu.memory_space<vmem>>, vector<16x256xbf16>,
    %c253_i32_101 = arith.constant 253 : i32
    %213 = tpu.dynamic_rotate %168 by %c253_i32_101 dim 1 : vector<16x256xf32>, i32 -> vector<16x256xf32>
    %214 = arith.truncf %213 : vector<16x256xf32> to vector<16x256xbf16>
    %c240_102 = arith.constant 240 : index
    %c0_103 = arith.constant 0 : index
    %215 = vector.load %arg10[%c240_102, %c0_103] : memref<400x256xbf16, #tpu.memory_space<vmem>>, vector<16x256xbf16>
    tpu.vector_store %arg10[%c240_102, %c0_103], %214 {strides = array<i32>} : memref<400x256xbf16, #tpu.memory_space<vmem>>, vector<16x256xbf16>,
    %c252_i32_104 = arith.constant 252 : i32
    %216 = tpu.dynamic_rotate %168 by %c252_i32_104 dim 1 : vector<16x256xf32>, i32 -> vector<16x256xf32>
    %217 = arith.truncf %216 : vector<16x256xf32> to vector<16x256xbf16>
    %c256_105 = arith.constant 256 : index
    %c0_106 = arith.constant 0 : index
    %218 = vector.load %arg10[%c256_105, %c0_106] : memref<400x256xbf16, #tpu.memory_space<vmem>>, vector<16x256xbf16>
    tpu.vector_store %arg10[%c256_105, %c0_106], %217 {strides = array<i32>} : memref<400x256xbf16, #tpu.memory_space<vmem>>, vector<16x256xbf16>,
    %c251_i32_107 = arith.constant 251 : i32
    %219 = tpu.dynamic_rotate %168 by %c251_i32_107 dim 1 : vector<16x256xf32>, i32 -> vector<16x256xf32>
    %220 = arith.truncf %219 : vector<16x256xf32> to vector<16x256xbf16>
    %c272_108 = arith.constant 272 : index
    %c0_109 = arith.constant 0 : index
    %221 = vector.load %arg10[%c272_108, %c0_109] : memref<400x256xbf16, #tpu.memory_space<vmem>>, vector<16x256xbf16>
    tpu.vector_store %arg10[%c272_108, %c0_109], %220 {strides = array<i32>} : memref<400x256xbf16, #tpu.memory_space<vmem>>, vector<16x256xbf16>,
    %c250_i32_110 = arith.constant 250 : i32
    %222 = tpu.dynamic_rotate %168 by %c250_i32_110 dim 1 : vector<16x256xf32>, i32 -> vector<16x256xf32>
    %223 = arith.truncf %222 : vector<16x256xf32> to vector<16x256xbf16>
    %c288_111 = arith.constant 288 : index
    %c0_112 = arith.constant 0 : index
    %224 = vector.load %arg10[%c288_111, %c0_112] : memref<400x256xbf16, #tpu.memory_space<vmem>>, vector<16x256xbf16>
    tpu.vector_store %arg10[%c288_111, %c0_112], %223 {strides = array<i32>} : memref<400x256xbf16, #tpu.memory_space<vmem>>, vector<16x256xbf16>,
    %c249_i32_113 = arith.constant 249 : i32
    %225 = tpu.dynamic_rotate %168 by %c249_i32_113 dim 1 : vector<16x256xf32>, i32 -> vector<16x256xf32>
    %226 = arith.truncf %225 : vector<16x256xf32> to vector<16x256xbf16>
    %c304_114 = arith.constant 304 : index
    %c0_115 = arith.constant 0 : index
    %227 = vector.load %arg10[%c304_114, %c0_115] : memref<400x256xbf16, #tpu.memory_space<vmem>>, vector<16x256xbf16>
    tpu.vector_store %arg10[%c304_114, %c0_115], %226 {strides = array<i32>} : memref<400x256xbf16, #tpu.memory_space<vmem>>, vector<16x256xbf16>,
    %c248_i32_116 = arith.constant 248 : i32
    %228 = tpu.dynamic_rotate %168 by %c248_i32_116 dim 1 : vector<16x256xf32>, i32 -> vector<16x256xf32>
    %229 = arith.truncf %228 : vector<16x256xf32> to vector<16x256xbf16>
    %c320_117 = arith.constant 320 : index
    %c0_118 = arith.constant 0 : index
    %230 = vector.load %arg10[%c320_117, %c0_118] : memref<400x256xbf16, #tpu.memory_space<vmem>>, vector<16x256xbf16>
    tpu.vector_store %arg10[%c320_117, %c0_118], %229 {strides = array<i32>} : memref<400x256xbf16, #tpu.memory_space<vmem>>, vector<16x256xbf16>,
    %c247_i32_119 = arith.constant 247 : i32
    %231 = tpu.dynamic_rotate %168 by %c247_i32_119 dim 1 : vector<16x256xf32>, i32 -> vector<16x256xf32>
    %232 = arith.truncf %231 : vector<16x256xf32> to vector<16x256xbf16>
    %c336_120 = arith.constant 336 : index
    %c0_121 = arith.constant 0 : index
    %233 = vector.load %arg10[%c336_120, %c0_121] : memref<400x256xbf16, #tpu.memory_space<vmem>>, vector<16x256xbf16>
    tpu.vector_store %arg10[%c336_120, %c0_121], %232 {strides = array<i32>} : memref<400x256xbf16, #tpu.memory_space<vmem>>, vector<16x256xbf16>,
    %c246_i32_122 = arith.constant 246 : i32
    %234 = tpu.dynamic_rotate %168 by %c246_i32_122 dim 1 : vector<16x256xf32>, i32 -> vector<16x256xf32>
    %235 = arith.truncf %234 : vector<16x256xf32> to vector<16x256xbf16>
    %c352_123 = arith.constant 352 : index
    %c0_124 = arith.constant 0 : index
    %236 = vector.load %arg10[%c352_123, %c0_124] : memref<400x256xbf16, #tpu.memory_space<vmem>>, vector<16x256xbf16>
    tpu.vector_store %arg10[%c352_123, %c0_124], %235 {strides = array<i32>} : memref<400x256xbf16, #tpu.memory_space<vmem>>, vector<16x256xbf16>,
    %c245_i32_125 = arith.constant 245 : i32
    %237 = tpu.dynamic_rotate %168 by %c245_i32_125 dim 1 : vector<16x256xf32>, i32 -> vector<16x256xf32>
    %238 = arith.truncf %237 : vector<16x256xf32> to vector<16x256xbf16>
    %c368_126 = arith.constant 368 : index
    %c0_127 = arith.constant 0 : index
    %239 = vector.load %arg10[%c368_126, %c0_127] : memref<400x256xbf16, #tpu.memory_space<vmem>>, vector<16x256xbf16>
    tpu.vector_store %arg10[%c368_126, %c0_127], %238 {strides = array<i32>} : memref<400x256xbf16, #tpu.memory_space<vmem>>, vector<16x256xbf16>,
    %c244_i32_128 = arith.constant 244 : i32
    %240 = tpu.dynamic_rotate %168 by %c244_i32_128 dim 1 : vector<16x256xf32>, i32 -> vector<16x256xf32>
    %241 = arith.truncf %240 : vector<16x256xf32> to vector<16x256xbf16>
    %c384_129 = arith.constant 384 : index
    %c0_130 = arith.constant 0 : index
    %242 = vector.load %arg10[%c384_129, %c0_130] : memref<400x256xbf16, #tpu.memory_space<vmem>>, vector<16x256xbf16>
    tpu.vector_store %arg10[%c384_129, %c0_130], %241 {strides = array<i32>} : memref<400x256xbf16, #tpu.memory_space<vmem>>, vector<16x256xbf16>,
    %c0_131 = arith.constant 0 : index
    %c0_132 = arith.constant 0 : index
    %243 = vector.load %arg10[%c0_131, %c0_132] : memref<400x256xbf16, #tpu.memory_space<vmem>>, vector<400x256xbf16>
    %cst_133 = arith.constant dense<0.000000e+00> : vector<16x256xf32>
    %244 = tpu.matmul %0, %243, %cst_133 {dimension_numbers = #tpu.dot_dimension_numbers<[1], [0], [0], [1], [0, 0, 1, 1], [], []>} : vector<16x400xbf16>, vector<400x256xbf16>, vector<16x256xf32> -> vector<16x256xf32>
    %245 = arith.addf %244, %13 : vector<16x256xf32>
    %cst_134 = arith.constant 0.000000e+00 : f32
    %246 = vector.broadcast %cst_134 : f32 to vector<16x256xf32>
    %247 = arith.maximumf %245, %246 : vector<16x256xf32>
    %248 = arith.truncf %247 : vector<16x256xf32> to vector<16x256xbf16>
    %cst_135 = arith.constant dense<0.000000e+00> : vector<18x256xf32>
    %249 = tpu.matmul %1, %248, %cst_135 {dimension_numbers = #tpu.dot_dimension_numbers<[1], [0], [0], [1], [0, 0, 1, 1], [], []>} : vector<18x16xbf16>, vector<16x256xbf16>, vector<18x256xf32> -> vector<18x256xf32>
    %250 = vector.extract_strided_slice %9 {offsets = [16, 0], sizes = [2, 256], strides = [1, 1]} : vector<18x256xf32> to vector<2x256xf32>
    %251 = vector.extract_strided_slice %249 {offsets = [16, 0], sizes = [2, 256], strides = [1, 1]} : vector<18x256xf32> to vector<2x256xf32>
    %252 = arith.addf %250, %251 : vector<2x256xf32>
    %253 = arith.negf %252 : vector<2x256xf32>
    %254 = math.exp %253 : vector<2x256xf32>
    %cst_136 = arith.constant 1.000000e+00 : f32
    %255 = vector.broadcast %cst_136 : f32 to vector<2x256xf32>
    %256 = arith.addf %255, %254 : vector<2x256xf32>
    %257 = arith.divf %255, %256 : vector<2x256xf32>
    %258 = vector.extract_strided_slice %257 {offsets = [0, 0], sizes = [1, 256], strides = [1, 1]} : vector<2x256xf32> to vector<1x256xf32>
    %259 = vector.extract_strided_slice %257 {offsets = [1, 0], sizes = [1, 256], strides = [1, 1]} : vector<2x256xf32> to vector<1x256xf32>
    %260 = vector.extract_strided_slice %9 {offsets = [0, 0], sizes = [16, 256], strides = [1, 1]} : vector<18x256xf32> to vector<16x256xf32>
    %261 = vector.extract_strided_slice %249 {offsets = [0, 0], sizes = [16, 256], strides = [1, 1]} : vector<18x256xf32> to vector<16x256xf32>
    %262 = vector.broadcast %259 : vector<1x256xf32> to vector<16x256xf32>
    %263 = arith.mulf %261, %262 : vector<16x256xf32>
    %264 = arith.addf %260, %263 : vector<16x256xf32>
    %265 = arith.negf %264 : vector<16x256xf32>
    %266 = math.exp %265 : vector<16x256xf32>
    %cst_137 = arith.constant 1.000000e+00 : f32
    %267 = vector.broadcast %cst_137 : f32 to vector<16x256xf32>
    %268 = arith.addf %267, %266 : vector<16x256xf32>
    %269 = arith.divf %267, %268 : vector<16x256xf32>
    %270 = arith.mulf %264, %269 : vector<16x256xf32>
    %cst_138 = arith.constant 1.000000e+00 : f32
    %271 = vector.broadcast %cst_138 : f32 to vector<1x256xf32>
    %272 = arith.subf %271, %258 : vector<1x256xf32>
    %273 = vector.broadcast %272 : vector<1x256xf32> to vector<16x256xf32>
    %274 = arith.mulf %273, %247 : vector<16x256xf32>
    %275 = vector.broadcast %258 : vector<1x256xf32> to vector<16x256xf32>
    %276 = arith.mulf %275, %270 : vector<16x256xf32>
    %277 = arith.addf %274, %276 : vector<16x256xf32>
    %cst_139 = arith.constant 0.000000e+00 : f32
    %278 = vector.shape_cast %46 : vector<1x256xi1> to vector<1x256xi1>
    %279 = vector.broadcast %278 : vector<1x256xi1> to vector<16x256xi1>
    %280 = vector.broadcast %cst_139 : f32 to vector<16x256xf32>
    %281 = arith.select %279, %277, %280 : vector<16x256xi1>, vector<16x256xf32>
    %c12_i32_140 = arith.constant 12 : i32
    %282 = tpu.dynamic_rotate %281 by %c12_i32_140 dim 1 : vector<16x256xf32>, i32 -> vector<16x256xf32>
    %283 = arith.truncf %282 : vector<16x256xf32> to vector<16x256xbf16>
    %c0_141 = arith.constant 0 : index
    %c0_142 = arith.constant 0 : index
    %284 = vector.load %arg10[%c0_141, %c0_142] : memref<400x256xbf16, #tpu.memory_space<vmem>>, vector<16x256xbf16>
    tpu.vector_store %arg10[%c0_141, %c0_142], %283 {strides = array<i32>} : memref<400x256xbf16, #tpu.memory_space<vmem>>, vector<16x256xbf16>,
    %c11_i32_143 = arith.constant 11 : i32
    %285 = tpu.dynamic_rotate %281 by %c11_i32_143 dim 1 : vector<16x256xf32>, i32 -> vector<16x256xf32>
    %286 = arith.truncf %285 : vector<16x256xf32> to vector<16x256xbf16>
    %c16_144 = arith.constant 16 : index
    %c0_145 = arith.constant 0 : index
    %287 = vector.load %arg10[%c16_144, %c0_145] : memref<400x256xbf16, #tpu.memory_space<vmem>>, vector<16x256xbf16>
    tpu.vector_store %arg10[%c16_144, %c0_145], %286 {strides = array<i32>} : memref<400x256xbf16, #tpu.memory_space<vmem>>, vector<16x256xbf16>,
    %c10_i32_146 = arith.constant 10 : i32
    %288 = tpu.dynamic_rotate %281 by %c10_i32_146 dim 1 : vector<16x256xf32>, i32 -> vector<16x256xf32>
    %289 = arith.truncf %288 : vector<16x256xf32> to vector<16x256xbf16>
    %c32_147 = arith.constant 32 : index
    %c0_148 = arith.constant 0 : index
    %290 = vector.load %arg10[%c32_147, %c0_148] : memref<400x256xbf16, #tpu.memory_space<vmem>>, vector<16x256xbf16>
    tpu.vector_store %arg10[%c32_147, %c0_148], %289 {strides = array<i32>} : memref<400x256xbf16, #tpu.memory_space<vmem>>, vector<16x256xbf16>,
    %c9_i32_149 = arith.constant 9 : i32
    %291 = tpu.dynamic_rotate %281 by %c9_i32_149 dim 1 : vector<16x256xf32>, i32 -> vector<16x256xf32>
    %292 = arith.truncf %291 : vector<16x256xf32> to vector<16x256xbf16>
    %c48_150 = arith.constant 48 : index
    %c0_151 = arith.constant 0 : index
    %293 = vector.load %arg10[%c48_150, %c0_151] : memref<400x256xbf16, #tpu.memory_space<vmem>>, vector<16x256xbf16>
    tpu.vector_store %arg10[%c48_150, %c0_151], %292 {strides = array<i32>} : memref<400x256xbf16, #tpu.memory_space<vmem>>, vector<16x256xbf16>,
    %c8_i32_152 = arith.constant 8 : i32
    %294 = tpu.dynamic_rotate %281 by %c8_i32_152 dim 1 : vector<16x256xf32>, i32 -> vector<16x256xf32>
    %295 = arith.truncf %294 : vector<16x256xf32> to vector<16x256xbf16>
    %c64_153 = arith.constant 64 : index
    %c0_154 = arith.constant 0 : index
    %296 = vector.load %arg10[%c64_153, %c0_154] : memref<400x256xbf16, #tpu.memory_space<vmem>>, vector<16x256xbf16>
    tpu.vector_store %arg10[%c64_153, %c0_154], %295 {strides = array<i32>} : memref<400x256xbf16, #tpu.memory_space<vmem>>, vector<16x256xbf16>,
    %c7_i32_155 = arith.constant 7 : i32
    %297 = tpu.dynamic_rotate %281 by %c7_i32_155 dim 1 : vector<16x256xf32>, i32 -> vector<16x256xf32>
    %298 = arith.truncf %297 : vector<16x256xf32> to vector<16x256xbf16>
    %c80_156 = arith.constant 80 : index
    %c0_157 = arith.constant 0 : index
    %299 = vector.load %arg10[%c80_156, %c0_157] : memref<400x256xbf16, #tpu.memory_space<vmem>>, vector<16x256xbf16>
    tpu.vector_store %arg10[%c80_156, %c0_157], %298 {strides = array<i32>} : memref<400x256xbf16, #tpu.memory_space<vmem>>, vector<16x256xbf16>,
    %c6_i32_158 = arith.constant 6 : i32
    %300 = tpu.dynamic_rotate %281 by %c6_i32_158 dim 1 : vector<16x256xf32>, i32 -> vector<16x256xf32>
    %301 = arith.truncf %300 : vector<16x256xf32> to vector<16x256xbf16>
    %c96_159 = arith.constant 96 : index
    %c0_160 = arith.constant 0 : index
    %302 = vector.load %arg10[%c96_159, %c0_160] : memref<400x256xbf16, #tpu.memory_space<vmem>>, vector<16x256xbf16>
    tpu.vector_store %arg10[%c96_159, %c0_160], %301 {strides = array<i32>} : memref<400x256xbf16, #tpu.memory_space<vmem>>, vector<16x256xbf16>,
    %c5_i32_161 = arith.constant 5 : i32
    %303 = tpu.dynamic_rotate %281 by %c5_i32_161 dim 1 : vector<16x256xf32>, i32 -> vector<16x256xf32>
    %304 = arith.truncf %303 : vector<16x256xf32> to vector<16x256xbf16>
    %c112_162 = arith.constant 112 : index
    %c0_163 = arith.constant 0 : index
    %305 = vector.load %arg10[%c112_162, %c0_163] : memref<400x256xbf16, #tpu.memory_space<vmem>>, vector<16x256xbf16>
    tpu.vector_store %arg10[%c112_162, %c0_163], %304 {strides = array<i32>} : memref<400x256xbf16, #tpu.memory_space<vmem>>, vector<16x256xbf16>,
    %c4_i32_164 = arith.constant 4 : i32
    %306 = tpu.dynamic_rotate %281 by %c4_i32_164 dim 1 : vector<16x256xf32>, i32 -> vector<16x256xf32>
    %307 = arith.truncf %306 : vector<16x256xf32> to vector<16x256xbf16>
    %c128_165 = arith.constant 128 : index
    %c0_166 = arith.constant 0 : index
    %308 = vector.load %arg10[%c128_165, %c0_166] : memref<400x256xbf16, #tpu.memory_space<vmem>>, vector<16x256xbf16>
    tpu.vector_store %arg10[%c128_165, %c0_166], %307 {strides = array<i32>} : memref<400x256xbf16, #tpu.memory_space<vmem>>, vector<16x256xbf16>,
    %c3_i32_167 = arith.constant 3 : i32
    %309 = tpu.dynamic_rotate %281 by %c3_i32_167 dim 1 : vector<16x256xf32>, i32 -> vector<16x256xf32>
    %310 = arith.truncf %309 : vector<16x256xf32> to vector<16x256xbf16>
    %c144_168 = arith.constant 144 : index
    %c0_169 = arith.constant 0 : index
    %311 = vector.load %arg10[%c144_168, %c0_169] : memref<400x256xbf16, #tpu.memory_space<vmem>>, vector<16x256xbf16>
    tpu.vector_store %arg10[%c144_168, %c0_169], %310 {strides = array<i32>} : memref<400x256xbf16, #tpu.memory_space<vmem>>, vector<16x256xbf16>,
    %c2_i32_170 = arith.constant 2 : i32
    %312 = tpu.dynamic_rotate %281 by %c2_i32_170 dim 1 : vector<16x256xf32>, i32 -> vector<16x256xf32>
    %313 = arith.truncf %312 : vector<16x256xf32> to vector<16x256xbf16>
    %c160_171 = arith.constant 160 : index
    %c0_172 = arith.constant 0 : index
    %314 = vector.load %arg10[%c160_171, %c0_172] : memref<400x256xbf16, #tpu.memory_space<vmem>>, vector<16x256xbf16>
    tpu.vector_store %arg10[%c160_171, %c0_172], %313 {strides = array<i32>} : memref<400x256xbf16, #tpu.memory_space<vmem>>, vector<16x256xbf16>,
    %c1_i32_173 = arith.constant 1 : i32
    %315 = tpu.dynamic_rotate %281 by %c1_i32_173 dim 1 : vector<16x256xf32>, i32 -> vector<16x256xf32>
    %316 = arith.truncf %315 : vector<16x256xf32> to vector<16x256xbf16>
    %c176_174 = arith.constant 176 : index
    %c0_175 = arith.constant 0 : index
    %317 = vector.load %arg10[%c176_174, %c0_175] : memref<400x256xbf16, #tpu.memory_space<vmem>>, vector<16x256xbf16>
    tpu.vector_store %arg10[%c176_174, %c0_175], %316 {strides = array<i32>} : memref<400x256xbf16, #tpu.memory_space<vmem>>, vector<16x256xbf16>,
    %318 = arith.truncf %281 : vector<16x256xf32> to vector<16x256xbf16>
    %c192_176 = arith.constant 192 : index
    %c0_177 = arith.constant 0 : index
    %319 = vector.load %arg10[%c192_176, %c0_177] : memref<400x256xbf16, #tpu.memory_space<vmem>>, vector<16x256xbf16>
    tpu.vector_store %arg10[%c192_176, %c0_177], %318 {strides = array<i32>} : memref<400x256xbf16, #tpu.memory_space<vmem>>, vector<16x256xbf16>,
    %c255_i32_178 = arith.constant 255 : i32
    %320 = tpu.dynamic_rotate %281 by %c255_i32_178 dim 1 : vector<16x256xf32>, i32 -> vector<16x256xf32>
    %321 = arith.truncf %320 : vector<16x256xf32> to vector<16x256xbf16>
    %c208_179 = arith.constant 208 : index
    %c0_180 = arith.constant 0 : index
    %322 = vector.load %arg10[%c208_179, %c0_180] : memref<400x256xbf16, #tpu.memory_space<vmem>>, vector<16x256xbf16>
    tpu.vector_store %arg10[%c208_179, %c0_180], %321 {strides = array<i32>} : memref<400x256xbf16, #tpu.memory_space<vmem>>, vector<16x256xbf16>,
    %c254_i32_181 = arith.constant 254 : i32
    %323 = tpu.dynamic_rotate %281 by %c254_i32_181 dim 1 : vector<16x256xf32>, i32 -> vector<16x256xf32>
    %324 = arith.truncf %323 : vector<16x256xf32> to vector<16x256xbf16>
    %c224_182 = arith.constant 224 : index
    %c0_183 = arith.constant 0 : index
    %325 = vector.load %arg10[%c224_182, %c0_183] : memref<400x256xbf16, #tpu.memory_space<vmem>>, vector<16x256xbf16>
    tpu.vector_store %arg10[%c224_182, %c0_183], %324 {strides = array<i32>} : memref<400x256xbf16, #tpu.memory_space<vmem>>, vector<16x256xbf16>,
    %c253_i32_184 = arith.constant 253 : i32
    %326 = tpu.dynamic_rotate %281 by %c253_i32_184 dim 1 : vector<16x256xf32>, i32 -> vector<16x256xf32>
    %327 = arith.truncf %326 : vector<16x256xf32> to vector<16x256xbf16>
    %c240_185 = arith.constant 240 : index
    %c0_186 = arith.constant 0 : index
    %328 = vector.load %arg10[%c240_185, %c0_186] : memref<400x256xbf16, #tpu.memory_space<vmem>>, vector<16x256xbf16>
    tpu.vector_store %arg10[%c240_185, %c0_186], %327 {strides = array<i32>} : memref<400x256xbf16, #tpu.memory_space<vmem>>, vector<16x256xbf16>,
    %c252_i32_187 = arith.constant 252 : i32
    %329 = tpu.dynamic_rotate %281 by %c252_i32_187 dim 1 : vector<16x256xf32>, i32 -> vector<16x256xf32>
    %330 = arith.truncf %329 : vector<16x256xf32> to vector<16x256xbf16>
    %c256_188 = arith.constant 256 : index
    %c0_189 = arith.constant 0 : index
    %331 = vector.load %arg10[%c256_188, %c0_189] : memref<400x256xbf16, #tpu.memory_space<vmem>>, vector<16x256xbf16>
    tpu.vector_store %arg10[%c256_188, %c0_189], %330 {strides = array<i32>} : memref<400x256xbf16, #tpu.memory_space<vmem>>, vector<16x256xbf16>,
    %c251_i32_190 = arith.constant 251 : i32
    %332 = tpu.dynamic_rotate %281 by %c251_i32_190 dim 1 : vector<16x256xf32>, i32 -> vector<16x256xf32>
    %333 = arith.truncf %332 : vector<16x256xf32> to vector<16x256xbf16>
    %c272_191 = arith.constant 272 : index
    %c0_192 = arith.constant 0 : index
    %334 = vector.load %arg10[%c272_191, %c0_192] : memref<400x256xbf16, #tpu.memory_space<vmem>>, vector<16x256xbf16>
    tpu.vector_store %arg10[%c272_191, %c0_192], %333 {strides = array<i32>} : memref<400x256xbf16, #tpu.memory_space<vmem>>, vector<16x256xbf16>,
    %c250_i32_193 = arith.constant 250 : i32
    %335 = tpu.dynamic_rotate %281 by %c250_i32_193 dim 1 : vector<16x256xf32>, i32 -> vector<16x256xf32>
    %336 = arith.truncf %335 : vector<16x256xf32> to vector<16x256xbf16>
    %c288_194 = arith.constant 288 : index
    %c0_195 = arith.constant 0 : index
    %337 = vector.load %arg10[%c288_194, %c0_195] : memref<400x256xbf16, #tpu.memory_space<vmem>>, vector<16x256xbf16>
    tpu.vector_store %arg10[%c288_194, %c0_195], %336 {strides = array<i32>} : memref<400x256xbf16, #tpu.memory_space<vmem>>, vector<16x256xbf16>,
    %c249_i32_196 = arith.constant 249 : i32
    %338 = tpu.dynamic_rotate %281 by %c249_i32_196 dim 1 : vector<16x256xf32>, i32 -> vector<16x256xf32>
    %339 = arith.truncf %338 : vector<16x256xf32> to vector<16x256xbf16>
    %c304_197 = arith.constant 304 : index
    %c0_198 = arith.constant 0 : index
    %340 = vector.load %arg10[%c304_197, %c0_198] : memref<400x256xbf16, #tpu.memory_space<vmem>>, vector<16x256xbf16>
    tpu.vector_store %arg10[%c304_197, %c0_198], %339 {strides = array<i32>} : memref<400x256xbf16, #tpu.memory_space<vmem>>, vector<16x256xbf16>,
    %c248_i32_199 = arith.constant 248 : i32
    %341 = tpu.dynamic_rotate %281 by %c248_i32_199 dim 1 : vector<16x256xf32>, i32 -> vector<16x256xf32>
    %342 = arith.truncf %341 : vector<16x256xf32> to vector<16x256xbf16>
    %c320_200 = arith.constant 320 : index
    %c0_201 = arith.constant 0 : index
    %343 = vector.load %arg10[%c320_200, %c0_201] : memref<400x256xbf16, #tpu.memory_space<vmem>>, vector<16x256xbf16>
    tpu.vector_store %arg10[%c320_200, %c0_201], %342 {strides = array<i32>} : memref<400x256xbf16, #tpu.memory_space<vmem>>, vector<16x256xbf16>,
    %c247_i32_202 = arith.constant 247 : i32
    %344 = tpu.dynamic_rotate %281 by %c247_i32_202 dim 1 : vector<16x256xf32>, i32 -> vector<16x256xf32>
    %345 = arith.truncf %344 : vector<16x256xf32> to vector<16x256xbf16>
    %c336_203 = arith.constant 336 : index
    %c0_204 = arith.constant 0 : index
    %346 = vector.load %arg10[%c336_203, %c0_204] : memref<400x256xbf16, #tpu.memory_space<vmem>>, vector<16x256xbf16>
    tpu.vector_store %arg10[%c336_203, %c0_204], %345 {strides = array<i32>} : memref<400x256xbf16, #tpu.memory_space<vmem>>, vector<16x256xbf16>,
    %c246_i32_205 = arith.constant 246 : i32
    %347 = tpu.dynamic_rotate %281 by %c246_i32_205 dim 1 : vector<16x256xf32>, i32 -> vector<16x256xf32>
    %348 = arith.truncf %347 : vector<16x256xf32> to vector<16x256xbf16>
    %c352_206 = arith.constant 352 : index
    %c0_207 = arith.constant 0 : index
    %349 = vector.load %arg10[%c352_206, %c0_207] : memref<400x256xbf16, #tpu.memory_space<vmem>>, vector<16x256xbf16>
    tpu.vector_store %arg10[%c352_206, %c0_207], %348 {strides = array<i32>} : memref<400x256xbf16, #tpu.memory_space<vmem>>, vector<16x256xbf16>,
    %c245_i32_208 = arith.constant 245 : i32
    %350 = tpu.dynamic_rotate %281 by %c245_i32_208 dim 1 : vector<16x256xf32>, i32 -> vector<16x256xf32>
    %351 = arith.truncf %350 : vector<16x256xf32> to vector<16x256xbf16>
    %c368_209 = arith.constant 368 : index
    %c0_210 = arith.constant 0 : index
    %352 = vector.load %arg10[%c368_209, %c0_210] : memref<400x256xbf16, #tpu.memory_space<vmem>>, vector<16x256xbf16>
    tpu.vector_store %arg10[%c368_209, %c0_210], %351 {strides = array<i32>} : memref<400x256xbf16, #tpu.memory_space<vmem>>, vector<16x256xbf16>,
    %c244_i32_211 = arith.constant 244 : i32
    %353 = tpu.dynamic_rotate %281 by %c244_i32_211 dim 1 : vector<16x256xf32>, i32 -> vector<16x256xf32>
    %354 = arith.truncf %353 : vector<16x256xf32> to vector<16x256xbf16>
    %c384_212 = arith.constant 384 : index
    %c0_213 = arith.constant 0 : index
    %355 = vector.load %arg10[%c384_212, %c0_213] : memref<400x256xbf16, #tpu.memory_space<vmem>>, vector<16x256xbf16>
    tpu.vector_store %arg10[%c384_212, %c0_213], %354 {strides = array<i32>} : memref<400x256xbf16, #tpu.memory_space<vmem>>, vector<16x256xbf16>,
    %c0_214 = arith.constant 0 : index
    %c0_215 = arith.constant 0 : index
    %356 = vector.load %arg10[%c0_214, %c0_215] : memref<400x256xbf16, #tpu.memory_space<vmem>>, vector<400x256xbf16>
    %cst_216 = arith.constant dense<0.000000e+00> : vector<16x256xf32>
    %357 = tpu.matmul %0, %356, %cst_216 {dimension_numbers = #tpu.dot_dimension_numbers<[1], [0], [0], [1], [0, 0, 1, 1], [], []>} : vector<16x400xbf16>, vector<400x256xbf16>, vector<16x256xf32> -> vector<16x256xf32>
    %358 = arith.addf %357, %13 : vector<16x256xf32>
    %cst_217 = arith.constant 0.000000e+00 : f32
    %359 = vector.broadcast %cst_217 : f32 to vector<16x256xf32>
    %360 = arith.maximumf %358, %359 : vector<16x256xf32>
    %361 = arith.truncf %360 : vector<16x256xf32> to vector<16x256xbf16>
    %cst_218 = arith.constant dense<0.000000e+00> : vector<18x256xf32>
    %362 = tpu.matmul %1, %361, %cst_218 {dimension_numbers = #tpu.dot_dimension_numbers<[1], [0], [0], [1], [0, 0, 1, 1], [], []>} : vector<18x16xbf16>, vector<16x256xbf16>, vector<18x256xf32> -> vector<18x256xf32>
    %363 = vector.extract_strided_slice %10 {offsets = [16, 0], sizes = [2, 256], strides = [1, 1]} : vector<18x256xf32> to vector<2x256xf32>
    %364 = vector.extract_strided_slice %362 {offsets = [16, 0], sizes = [2, 256], strides = [1, 1]} : vector<18x256xf32> to vector<2x256xf32>
    %365 = arith.addf %363, %364 : vector<2x256xf32>
    %366 = arith.negf %365 : vector<2x256xf32>
    %367 = math.exp %366 : vector<2x256xf32>
    %cst_219 = arith.constant 1.000000e+00 : f32
    %368 = vector.broadcast %cst_219 : f32 to vector<2x256xf32>
    %369 = arith.addf %368, %367 : vector<2x256xf32>
    %370 = arith.divf %368, %369 : vector<2x256xf32>
    %371 = vector.extract_strided_slice %370 {offsets = [0, 0], sizes = [1, 256], strides = [1, 1]} : vector<2x256xf32> to vector<1x256xf32>
    %372 = vector.extract_strided_slice %370 {offsets = [1, 0], sizes = [1, 256], strides = [1, 1]} : vector<2x256xf32> to vector<1x256xf32>
    %373 = vector.extract_strided_slice %10 {offsets = [0, 0], sizes = [16, 256], strides = [1, 1]} : vector<18x256xf32> to vector<16x256xf32>
    %374 = vector.extract_strided_slice %362 {offsets = [0, 0], sizes = [16, 256], strides = [1, 1]} : vector<18x256xf32> to vector<16x256xf32>
    %375 = vector.broadcast %372 : vector<1x256xf32> to vector<16x256xf32>
    %376 = arith.mulf %374, %375 : vector<16x256xf32>
    %377 = arith.addf %373, %376 : vector<16x256xf32>
    %378 = arith.negf %377 : vector<16x256xf32>
    %379 = math.exp %378 : vector<16x256xf32>
    %cst_220 = arith.constant 1.000000e+00 : f32
    %380 = vector.broadcast %cst_220 : f32 to vector<16x256xf32>
    %381 = arith.addf %380, %379 : vector<16x256xf32>
    %382 = arith.divf %380, %381 : vector<16x256xf32>
    %383 = arith.mulf %377, %382 : vector<16x256xf32>
    %cst_221 = arith.constant 1.000000e+00 : f32
    %384 = vector.broadcast %cst_221 : f32 to vector<1x256xf32>
    %385 = arith.subf %384, %371 : vector<1x256xf32>
    %386 = vector.broadcast %385 : vector<1x256xf32> to vector<16x256xf32>
    %387 = arith.mulf %386, %360 : vector<16x256xf32>
    %388 = vector.broadcast %371 : vector<1x256xf32> to vector<16x256xf32>
    %389 = arith.mulf %388, %383 : vector<16x256xf32>
    %390 = arith.addf %387, %389 : vector<16x256xf32>
    %391 = vector.broadcast %51 : vector<1x256xf32> to vector<16x256xf32>
    %392 = arith.mulf %390, %391 : vector<16x256xf32>
    %cst_222 = arith.constant dense<0.000000e+00> : vector<16xf32>
    %393 = vector.multi_reduction <add>, %392, %cst_222 [1] : vector<16x256xf32> to vector<16xf32>
    %394 = vector.shape_cast %393 : vector<16xf32> to vector<16x1xf32>
    %cst_223 = arith.constant 1.220000e+02 : f32
    %395 = vector.broadcast %cst_223 : f32 to vector<16x1xf32>
    %396 = arith.divf %394, %395 : vector<16x1xf32>
    %397 = arith.mulf %392, %392 : vector<16x256xf32>
    %cst_224 = arith.constant dense<0.000000e+00> : vector<16xf32>
    %398 = vector.multi_reduction <add>, %397, %cst_224 [1] : vector<16x256xf32> to vector<16xf32>
    %399 = vector.shape_cast %398 : vector<16xf32> to vector<16x1xf32>
    %cst_225 = arith.constant 1.220000e+02 : f32
    %400 = vector.broadcast %cst_225 : f32 to vector<16x1xf32>
    %401 = arith.divf %399, %400 : vector<16x1xf32>
    %402 = arith.mulf %396, %396 : vector<16x1xf32>
    %403 = arith.subf %401, %402 : vector<16x1xf32>
    %c0_226 = arith.constant 0 : index
    %c0_227 = arith.constant 0 : index
    %404 = vector.load %arg7[%c0_226, %c0_227] : memref<16x1xf32, #tpu.memory_space<vmem>>, vector<16x1xf32>
    %cst_228 = arith.constant 9.99999974E-6 : f32
    %405 = vector.broadcast %cst_228 : f32 to vector<16x1xf32>
    %406 = arith.addf %403, %405 : vector<16x1xf32>
    %407 = math.rsqrt %406 : vector<16x1xf32>
    %408 = arith.mulf %404, %407 : vector<16x1xf32>
    %c0_229 = arith.constant 0 : index
    %c0_230 = arith.constant 0 : index
    %409 = vector.load %arg8[%c0_229, %c0_230] : memref<16x1xf32, #tpu.memory_space<vmem>>, vector<16x1xf32>
    %410 = arith.mulf %396, %408 : vector<16x1xf32>
    %411 = arith.subf %409, %410 : vector<16x1xf32>
    %412 = vector.broadcast %408 : vector<16x1xf32> to vector<16x256xf32>
    %413 = arith.mulf %390, %412 : vector<16x256xf32>
    %414 = vector.broadcast %411 : vector<16x1xf32> to vector<16x256xf32>
    %415 = arith.addf %413, %414 : vector<16x256xf32>
    %c0_231 = arith.constant 0 : index
    %c0_232 = arith.constant 0 : index
    %416 = vector.load %arg9[%c0_231, %c0_232] : memref<16x256xf32, #tpu.memory_space<vmem>>, vector<16x256xf32>
    tpu.vector_store %arg9[%c0_231, %c0_232], %415 {strides = array<i32>} : memref<16x256xf32, #tpu.memory_space<vmem>>, vector<16x256xf32>,
    return
  }
}

</mosaic_0001>

<bundles_post_ra>
// kernel: tpu_custom_call.1
= control target key start
LH: loop header
LB: loop body
LE: loop exit
PB: predicated region body
PF: predicated region fallthrough
CT: control target
= control target key end

     0   :  { %v5460_v2 = vmov 0   ;;  %s6820_s0 = inlined_call_operand.vmem [shape: f32[16,256], index: 0, kind: input, shape index: {}]   ;;  %s6821_s1 = inlined_call_operand.vmem [shape: bf16[16,400], index: 1, kind: input, shape index: {}]   ;;  %s6822_s2 = inlined_call_operand.vmem [shape: f32[16,1], index: 2, kind: input, shape index: {}]   ;;  %s6823_s3 = inlined_call_operand.vmem [shape: bf16[18,16], index: 3, kind: input, shape index: {}]   ;;  %s6824_s4 = inlined_call_operand.vmem [shape: bf16[18,16], index: 4, kind: input, shape index: {}]   ;;  %s6825_s5 = inlined_call_operand.vmem [shape: f32[18,1], index: 5, kind: input, shape index: {}]   ;;  %s6826_s6 = inlined_call_operand.vmem [shape: f32[16,1], index: 6, kind: input, shape index: {}]   ;;  %s6827_s7 = inlined_call_operand.vmem [shape: f32[16,1], index: 7, kind: input, shape index: {}]   ;;  %s6828_s8 = inlined_call_operand.vmem [shape: f32[16,1], index: 8, kind: input, shape index: {}]   ;;  %s6829_s9 = inlined_call_operand.hbm [shape: f32[16,256], index: 9, kind: output, shape index: {}]  }
   0x1   :  { %v186_v0 = vld [vmem:[%s6826_s6] sm:$0xff]  ;;  %v187_v1 = vld [vmem:[%s6826_s6 + $0x8] sm:$0xff]  ;;  %4615 = vset.pattern.permute.xlu0 %v5460_v2  ;;  %115 = vmatprep.mubr.bf16.mxu0 %v5460_v2 }
   0x2   :  { %v4616_v3 = vpack.i.bf16 %v187_v1, %v186_v0  ;;  %4861 = vset.pattern.permute.xlu1 %v5460_v2 }
   0x4   :  { %4617 = vperm.xlu0 %4615, %v4616_v3  }
   0x5   :  { %14 = vsyncpa [#allocation4], 0  ;;  %v45_v4 = vld [vmem:[%s6820_s0 + $0x8] sm:$0xff]  ;;  %v47_v5 = vld [vmem:[%s6820_s0 + $0x18] sm:$0xff]  ;;  %vm6861_vm0 = vcmask 130048   ;;  %v146_v11 = vlaneseq  ;;  %s5462_s22 = smov 6  }
   0x6   :  { %v44_v6 = vld [vmem:[%s6820_s0] sm:$0xff]  ;;  %v49_v7 = vpack.c.bf16 %v47_v5, %v45_v4  ;;  %v46_v8 = vld [vmem:[%s6820_s0 + $0x10] sm:$0xff]  ;;  %s5461_s0 = smov 5   ;;  %s5463_s23 = smov 7   ;;  %v5705_v31 = vld [vmem:[%s6821_s1 + $0xc] ss:$16 sps:$4 sm:$0xff]  }
   0x7   :  { %v48_v9 = vpack.c.bf16 %v46_v8, %v44_v6  ;;  %v5342_v10 = vld [vmem:[%s6823_s3] sm:$0xff]   ;;  %v5566_v12 = vand.u32 127, %v146_v11  ;;  %s5464_s24 = smov 8   ;;  %s5465_s25 = smov 9   ;;  %v175_v32 = vld [vmem:[%s6822_s2 + $0x8] sm:$0xff] }
   0x8   :  { %97 = vmatprep.subr.bf16.mxu0 %v49_v7  ;;  %s5466_s26 = smov 10   ;;  %s5467_s27 = smov 11   ;;  %v5343_v29 = vld [vmem:[%s6823_s3 + $0x8] ss:$0 sps:$4 sm:$0x11]   ;;  %v174_v33 = vld [vmem:[%s6822_s2] sm:$0xff] }
   0x9   :  { %98 = vmatpush1.bf16.msra.mxu0 %v48_v9  ;;  %v198_v13 = vadd.s32 128, %v5566_v12  ;;  %v5570_v15 = vadd.s32 4294967284, %v5566_v12  ;;  %s5468_s28 = smov 12   ;;  %s5469_s29 = smov 117   ;;  %v5695_v30 = vld [vmem:[%s6821_s1 + $0x4] ss:$16 sps:$4 sm:$0xff]  }
   0xa   :  { %s5470_s30 = smov 125   ;;  %s6873_s10 = smov 118   ;;  %1269 = vmatprep.mubr.bf16.mxu1 %v5695_v30  ;;  %v50_v34 = vld [vmem:[%s6825_s5] sm:$0xff]  ;;  %v52_v35 = vld [vmem:[%s6825_s5 + $0x10] sm:$0x3]  ;;  %v51_v36 = vld [vmem:[%s6825_s5 + $0x8] sm:$0xff] }
   0xb   :  { %v210_v14 = vand.u32 127, %v198_v13  ;;  %vm225_vm1 = vcmp.ge.s32.totalorder %v5570_v15, 0  ;;  %vm227_vm2 = vcmp.lt.s32.totalorder %v5570_v15, 64  ;;  %s6871_s11 = smov 126   ;;  %s6869_s12 = smov 119   ;;  %vm452_vm7 = vcmp.lt.s32.totalorder %v5566_v12, 5 }
   0xc   :  { %3929 = vmatmul.mubr.msk.bf16.vlgmr.msra.gmra.mxu0 %vm6861_vm0, %v5342_v10  ;;  %vm5580_vm5 = vmand %vm225_vm1, %vm227_vm2  ;;  %s6867_s13 = smov 127   ;;  %s6848_s14 = smov 120   ;;  %vm425_vm8 = vcmp.lt.s32.totalorder %v5566_v12, 6  ;;  %vm398_vm9 = vcmp.lt.s32.totalorder %v5566_v12, 7  ;;  %vm371_vm10 = vcmp.lt.s32.totalorder %v5566_v12, 8  ;;  %vm344_vm11 = vcmp.lt.s32.totalorder %v5566_v12, 9 }
   0xd   :  { %125 = vmatprep.mubr.bf16.mxu0 %v5460_v2  ;;  %v5572_v16 = vadd.s32 4294967284, %v210_v14  ;;  %s6844_s15 = smov 121   ;;  %s6840_s16 = smov 1   ;;  %vm6865_vm12 = vcmp.lt.s32.totalorder %v5566_v12, 10  ;;  %vm6864_vm13 = vcmp.lt.s32.totalorder %v5566_v12, 11  ;;  %vm6866_vm14 = vcmp.lt.s32.totalorder %v5566_v12, 12 }
   0xe   :  { %s6832_s17 = smov 122   ;;  %s6830_s6 = smov 2   ;;  %vm6854_vm15 = vcmp.lt.s32.totalorder %v5566_v12, 117  ;;  %vm6850_vm2 = vcmp.lt.s32.totalorder %v5566_v12, 125 }
   0xf   :  { %vm226_vm3 = vcmp.ge.s32.totalorder %v5572_v16, 0  ;;  %vm228_vm4 = vcmp.lt.s32.totalorder %v5572_v16, 64  ;;  %s6838_s20 = smov 123   ;;  %s6836_s21 = smov 3  }
  0x10   :  { %vm5586_vm6 = vmand %vm226_vm3, %vm228_vm4  ;;  %s6834_s3 = smov 124   ;;  %vm6851_vm4 = vcmp.lt.s32.totalorder %v5566_v12, 118  ;;  %s6885_s18 = smov 1  }
  0x11   :  { %s6886_s19 = smov 122   ;;  %s6887_s2 = smov 2  }
  0x12   :  { %s6888_s5 = smov 123  }
  0x14   :  { %3930 = vmatmul.mubr.msk.bf16.gmra.mxu0 %vm6861_vm0, %v5343_v29 }
  0x15   :  { %4039 = vmatprep.mubr.msk.bf16.mxu0 %vm6861_vm0, %v5705_v31 }
  0x7f   :  { %v4618_v19 = vpop.permute.xlu0 %4617 }
  0x80   :  { %v4620_v20 = vunpack.i.h.bf16 %v4618_v19  ;;  %v4619_v21 = vunpack.i.l.bf16 %v4618_v19 }
  0x82   :  { %v253_v22 = vsel %vm5580_vm5, %v4620_v20, 0.0  ;;  %v254_v23 = vsel %vm5586_vm6, %v4620_v20, 0.0  ;;  %v251_v24 = vsel %vm5580_vm5, %v4619_v21, 0.0  ;;  %v252_v25 = vsel %vm5586_vm6, %v4619_v21, 0.0 }
  0x83   :  { %v5598_v26 = vpack.i.bf16 %v254_v23, %v252_v25  ;;  %v5600_v27 = vpack.i.bf16 %v253_v22, %v251_v24  ;;  %v5614_v28 = vpack.c.bf16 %v4620_v20, %v4619_v21 }
  0x85   :  { %4627 = vrot.lane.b32.xlu1 %v5598_v26, %s5461_s0  ;;  %4622 = vrot.lane.b32.xlu0 %v5600_v27, %s5461_s0 }
  0x89   :  { %4632 = vrot.lane.b32.xlu1 %v5600_v27, %s5462_s22  ;;  %4637 = vrot.lane.b32.xlu0 %v5598_v26, %s5462_s22 }
  0x8d   :  { %4642 = vrot.lane.b32.xlu1 %v5600_v27, %s5463_s23  ;;  %4647 = vrot.lane.b32.xlu0 %v5598_v26, %s5463_s23 }
  0x91   :  { %4652 = vrot.lane.b32.xlu1 %v5600_v27, %s5464_s24  ;;  %4657 = vrot.lane.b32.xlu0 %v5598_v26, %s5464_s24 }
  0x95   :  { %4662 = vrot.lane.b32.xlu1 %v5600_v27, %s5465_s25  ;;  %4667 = vrot.lane.b32.xlu0 %v5598_v26, %s5465_s25 }
  0x99   :  { %4672 = vrot.lane.b32.xlu1 %v5600_v27, %s5466_s26  ;;  %4677 = vrot.lane.b32.xlu0 %v5598_v26, %s5466_s26 }
  0x9d   :  { %4682 = vrot.lane.b32.xlu1 %v5600_v27, %s5467_s27  ;;  %4687 = vrot.lane.b32.xlu0 %v5598_v26, %s5467_s27 }
  0xa1   :  { %4692 = vrot.lane.b32.xlu1 %v5600_v27, %s5468_s28  ;;  %4697 = vrot.lane.b32.xlu0 %v5598_v26, %s5468_s28 }
  0xa5   :  { %4702 = vrot.lane.b32.xlu1 %v5600_v27, %s5469_s29  ;;  %4707 = vrot.lane.b32.xlu0 %v5598_v26, %s5469_s29 }
  0xa9   :  { %4712 = vrot.lane.b32.xlu1 %v5600_v27, %s5470_s30  ;;  %4717 = vrot.lane.b32.xlu0 %v5598_v26, %s5470_s30 }
  0xad   :  { %4722 = vrot.lane.b32.xlu1 %v5600_v27, %s6873_s10  ;;  %4727 = vrot.lane.b32.xlu0 %v5598_v26, %s6873_s10 }
  0xb1   :  { %4732 = vrot.lane.b32.xlu1 %v5600_v27, %s6871_s11  ;;  %4737 = vrot.lane.b32.xlu0 %v5598_v26, %s6871_s11 }
  0xb5   :  { %4742 = vrot.lane.b32.xlu1 %v5600_v27, %s6869_s12  ;;  %4747 = vrot.lane.b32.xlu0 %v5598_v26, %s6869_s12 }
  0xb9   :  { %4752 = vrot.lane.b32.xlu1 %v5600_v27, %s6867_s13  ;;  %4757 = vrot.lane.b32.xlu0 %v5598_v26, %s6867_s13 }
  0xbd   :  { %4762 = vrot.lane.b32.xlu1 %v5600_v27, %s6848_s14  ;;  %4767 = vrot.lane.b32.xlu0 %v5598_v26, %s6848_s14  ;;  %s6889_s14 = smov 3  }
  0xc1   :  { %4772 = vrot.lane.b32.xlu1 %v5600_v27, %s6844_s15  ;;  %4777 = vrot.lane.b32.xlu0 %v5598_v26, %s6844_s15  ;;  %s6890_s15 = smov 124  }
  0xc5   :  { %4782 = vrot.lane.b32.xlu1 %v5600_v27, %s6840_s16  ;;  %4787 = vrot.lane.b32.xlu0 %v5598_v26, %s6840_s16  ;;  %s6891_s16 = smov 4  }
  0xc9   :  { %4792 = vrot.lane.b32.xlu1 %v5600_v27, %s6832_s17  ;;  %4797 = vrot.lane.b32.xlu0 %v5598_v26, %s6832_s17  ;;  %s6842_s17 = smov 4  }
  0xcd   :  { %4802 = vrot.lane.b32.xlu1 %v5600_v27, %s6830_s6  ;;  %4807 = vrot.lane.b32.xlu0 %v5598_v26, %s6830_s6  ;;  %s6846_s6 = smov 116  }
  0xd1   :  { %4812 = vrot.lane.b32.xlu1 %v5600_v27, %s6838_s20  ;;  %4817 = vrot.lane.b32.xlu0 %v5598_v26, %s6838_s20  ;;  %s6892_s20 = smov 116  }
  0xd5   :  { %4822 = vrot.lane.b32.xlu1 %v5600_v27, %s6836_s21  ;;  %4827 = vrot.lane.b32.xlu0 %v5598_v26, %s6836_s21 }
  0xd9   :  { %4832 = vrot.lane.b32.xlu1 %v5600_v27, %s6834_s3  ;;  %4837 = vrot.lane.b32.xlu0 %v5598_v26, %s6834_s3 }
  0xdd   :  { %4842 = vrot.lane.b32.xlu1 %v5600_v27, %s6842_s17  ;;  %4847 = vrot.lane.b32.xlu0 %v5598_v26, %s6842_s17  ;;  %s6883_s17 = smov 120  }
  0xe1   :  { %4852 = vrot.lane.b32.xlu1 %v5600_v27, %s6846_s6  ;;  %4857 = vrot.lane.b32.xlu0 %v5598_v26, %s6846_s6  ;;  %s6884_s6 = smov 121  }
  0xe5   :  { %183 = vperm.xlu0 %4615, %v175_v32   ;;  %178 = vperm.xlu1 %4861, %v174_v33  }
  0xe9   :  { %55 = vperm.xlu0 %4615, %v50_v34   ;;  %65 = vperm.xlu1 %4861, %v52_v35  }
  0xed   :  { %60 = vperm.xlu1 %4861, %v51_v36  }
  0xf7   :  { %v4628_v37 = vpop.permute.xlu1 %4627  ;;  %v4623_v38 = vpop.permute.xlu0 %4622 }
  0xf8   :  { %v4630_v39 = vunpack.i.h.bf16 %v4628_v37  ;;  %v4629_v40 = vunpack.i.l.bf16 %v4628_v37  ;;  %v4625_v41 = vunpack.i.h.bf16 %v4623_v38  ;;  %v4624_v42 = vunpack.i.l.bf16 %v4623_v38 }
  0xfa   :  { %v453_v43 = vsel %vm452_vm7, %v4624_v42, %v4629_v40  ;;  %v454_v44 = vsel %vm452_vm7, %v4625_v41, %v4630_v39  ;;  %v455_v45 = vsel %vm452_vm7, %v4629_v40, %v4624_v42  ;;  %v456_v46 = vsel %vm452_vm7, %v4630_v39, %v4625_v41 }
  0xfb   :  { %v4633_v47 = vpop.permute.xlu1 %4632  ;;  %v4638_v48 = vpop.permute.xlu0 %4637  ;;  %v4433_v49 = vpack.c.bf16 %v454_v44, %v453_v43  ;;  %v4432_v50 = vpack.c.bf16 %v456_v46, %v455_v45 }
  0xfc   :  { %v4635_v51 = vunpack.i.h.bf16 %v4633_v47  ;;  %v4634_v52 = vunpack.i.l.bf16 %v4633_v47  ;;  %v4640_v53 = vunpack.i.h.bf16 %v4638_v48  ;;  %v4639_v54 = vunpack.i.l.bf16 %v4638_v48 }
  0xfd   :  { %1237 = vmatprep.subr.bf16.mxu1 %v4433_v49 }
  0xfe   :  { %1238 = vmatpush1.bf16.msra.mxu1 %v4432_v50  ;;  %v426_v55 = vsel %vm425_vm8, %v4634_v52, %v4639_v54  ;;  %v427_v56 = vsel %vm425_vm8, %v4635_v51, %v4640_v53  ;;  %v428_v57 = vsel %vm425_vm8, %v4639_v54, %v4634_v52  ;;  %v429_v58 = vsel %vm425_vm8, %v4640_v53, %v4635_v51 }
  0xff   :  { %v4643_v59 = vpop.permute.xlu1 %4642  ;;  %v4648_v60 = vpop.permute.xlu0 %4647  ;;  %v4431_v61 = vpack.c.bf16 %v427_v56, %v426_v55  ;;  %v4430_v62 = vpack.c.bf16 %v429_v58, %v428_v57 }
 0x100   :  { %v4645_v63 = vunpack.i.h.bf16 %v4643_v59  ;;  %v4644_v0 = vunpack.i.l.bf16 %v4643_v59  ;;  %v4650_v1 = vunpack.i.h.bf16 %v4648_v60  ;;  %v4649_v3 = vunpack.i.l.bf16 %v4648_v60 }
 0x101   :  { %1239 = vmatprep.subr.bf16.mxu1 %v4431_v61 }
 0x102   :  { %1240 = vmatpush1.bf16.msra.mxu1 %v4430_v62  ;;  %v399_v4 = vsel %vm398_vm9, %v4644_v0, %v4649_v3  ;;  %v400_v5 = vsel %vm398_vm9, %v4645_v63, %v4650_v1  ;;  %v401_v6 = vsel %vm398_vm9, %v4649_v3, %v4644_v0  ;;  %v402_v7 = vsel %vm398_vm9, %v4650_v1, %v4645_v63 }
 0x103   :  { %v4653_v8 = vpop.permute.xlu1 %4652  ;;  %v4658_v9 = vpop.permute.xlu0 %4657  ;;  %v4429_v10 = vpack.c.bf16 %v400_v5, %v399_v4  ;;  %v4428_v13 = vpack.c.bf16 %v402_v7, %v401_v6 }
 0x104   :  { %v4655_v14 = vunpack.i.h.bf16 %v4653_v8  ;;  %v4654_v19 = vunpack.i.l.bf16 %v4653_v8  ;;  %v4660_v20 = vunpack.i.h.bf16 %v4658_v9  ;;  %v4659_v21 = vunpack.i.l.bf16 %v4658_v9 }
 0x105   :  { %1241 = vmatprep.subr.bf16.mxu1 %v4429_v10 }
 0x106   :  { %1242 = vmatpush1.bf16.msra.mxu1 %v4428_v13  ;;  %v372_v22 = vsel %vm371_vm10, %v4654_v19, %v4659_v21  ;;  %v373_v23 = vsel %vm371_vm10, %v4655_v14, %v4660_v20  ;;  %v374_v24 = vsel %vm371_vm10, %v4659_v21, %v4654_v19  ;;  %v375_v25 = vsel %vm371_vm10, %v4660_v20, %v4655_v14 }
 0x107   :  { %v4663_v26 = vpop.permute.xlu1 %4662  ;;  %v4668_v27 = vpop.permute.xlu0 %4667  ;;  %v4427_v29 = vpack.c.bf16 %v373_v23, %v372_v22  ;;  %v4426_v32 = vpack.c.bf16 %v375_v25, %v374_v24 }
 0x108   :  { %v4665_v33 = vunpack.i.h.bf16 %v4663_v26  ;;  %v4664_v34 = vunpack.i.l.bf16 %v4663_v26  ;;  %v4670_v35 = vunpack.i.h.bf16 %v4668_v27  ;;  %v4669_v36 = vunpack.i.l.bf16 %v4668_v27 }
 0x109   :  { %1243 = vmatprep.subr.bf16.mxu1 %v4427_v29 }
 0x10a   :  { %1244 = vmatpush1.bf16.msra.mxu1 %v4426_v32  ;;  %v345_v37 = vsel %vm344_vm11, %v4664_v34, %v4669_v36  ;;  %v346_v38 = vsel %vm344_vm11, %v4665_v33, %v4670_v35  ;;  %v347_v39 = vsel %vm344_vm11, %v4669_v36, %v4664_v34  ;;  %v348_v40 = vsel %vm344_vm11, %v4670_v35, %v4665_v33 }
 0x10b   :  { %v4673_v41 = vpop.permute.xlu1 %4672  ;;  %v4678_v42 = vpop.permute.xlu0 %4677  ;;  %v4425_v43 = vpack.c.bf16 %v346_v38, %v345_v37  ;;  %v4424_v44 = vpack.c.bf16 %v348_v40, %v347_v39 }
 0x10c   :  { %v4675_v45 = vunpack.i.h.bf16 %v4673_v41  ;;  %v4674_v46 = vunpack.i.l.bf16 %v4673_v41  ;;  %v4680_v47 = vunpack.i.h.bf16 %v4678_v42  ;;  %v4679_v48 = vunpack.i.l.bf16 %v4678_v42 }
 0x10d   :  { %1245 = vmatprep.subr.bf16.mxu1 %v4425_v43 }
 0x10e   :  { %1246 = vmatpush1.bf16.msra.mxu1 %v4424_v44  ;;  %v318_v49 = vsel %vm6865_vm12, %v4674_v46, %v4679_v48  ;;  %v319_v50 = vsel %vm6865_vm12, %v4675_v45, %v4680_v47  ;;  %v320_v51 = vsel %vm6865_vm12, %v4679_v48, %v4674_v46  ;;  %v321_v52 = vsel %vm6865_vm12, %v4680_v47, %v4675_v45 }
 0x10f   :  { %v4683_v53 = vpop.permute.xlu1 %4682  ;;  %v4688_v54 = vpop.permute.xlu0 %4687  ;;  %v4423_v55 = vpack.c.bf16 %v319_v50, %v318_v49  ;;  %v4422_v56 = vpack.c.bf16 %v321_v52, %v320_v51 }
 0x110   :  { %v4685_v57 = vunpack.i.h.bf16 %v4683_v53  ;;  %v4684_v58 = vunpack.i.l.bf16 %v4683_v53  ;;  %v4690_v59 = vunpack.i.h.bf16 %v4688_v54  ;;  %v4689_v60 = vunpack.i.l.bf16 %v4688_v54 }
 0x111   :  { %1247 = vmatprep.subr.bf16.mxu1 %v4423_v55 }
 0x112   :  { %1248 = vmatpush1.bf16.msra.mxu1 %v4422_v56  ;;  %v291_v61 = vsel %vm6864_vm13, %v4684_v58, %v4689_v60  ;;  %v292_v62 = vsel %vm6864_vm13, %v4685_v57, %v4690_v59  ;;  %v293_v63 = vsel %vm6864_vm13, %v4689_v60, %v4684_v58  ;;  %v294_v0 = vsel %vm6864_vm13, %v4690_v59, %v4685_v57 }
 0x113   :  { %v4693_v1 = vpop.permute.xlu1 %4692  ;;  %v4698_v3 = vpop.permute.xlu0 %4697  ;;  %v4421_v4 = vpack.c.bf16 %v292_v62, %v291_v61  ;;  %v4420_v5 = vpack.c.bf16 %v294_v0, %v293_v63 }
 0x114   :  { %v4695_v6 = vunpack.i.h.bf16 %v4693_v1  ;;  %v4694_v7 = vunpack.i.l.bf16 %v4693_v1  ;;  %v4700_v8 = vunpack.i.h.bf16 %v4698_v3  ;;  %v4699_v9 = vunpack.i.l.bf16 %v4698_v3 }
 0x115   :  { %1249 = vmatprep.subr.bf16.mxu1 %v4421_v4 }
 0x116   :  { %1250 = vmatpush1.bf16.msra.mxu1 %v4420_v5  ;;  %v264_v10 = vsel %vm6866_vm14, %v4694_v7, %v4699_v9  ;;  %v265_v13 = vsel %vm6866_vm14, %v4695_v6, %v4700_v8  ;;  %v266_v14 = vsel %vm6866_vm14, %v4699_v9, %v4694_v7  ;;  %v267_v19 = vsel %vm6866_vm14, %v4700_v8, %v4695_v6 }
 0x117   :  { %v4703_v20 = vpop.permute.xlu1 %4702  ;;  %v4708_v21 = vpop.permute.xlu0 %4707  ;;  %v4419_v22 = vpack.c.bf16 %v265_v13, %v264_v10  ;;  %v4418_v23 = vpack.c.bf16 %v267_v19, %v266_v14 }
 0x118   :  { %v4705_v24 = vunpack.i.h.bf16 %v4703_v20  ;;  %v4704_v25 = vunpack.i.l.bf16 %v4703_v20  ;;  %v4710_v26 = vunpack.i.h.bf16 %v4708_v21  ;;  %v4709_v27 = vunpack.i.l.bf16 %v4708_v21 }
 0x119   :  { %1251 = vmatprep.subr.bf16.mxu1 %v4419_v22 }
 0x11a   :  { %v871_v29 = vsel %vm6854_vm15, %v4705_v24, %v4710_v26  ;;  %v870_v32 = vsel %vm6854_vm15, %v4704_v25, %v4709_v27  ;;  %1252 = vmatpush1.bf16.msra.mxu1 %v4418_v23  ;;  %v872_v33 = vsel %vm6854_vm15, %v4709_v27, %v4704_v25  ;;  %v873_v34 = vsel %vm6854_vm15, %v4710_v26, %v4705_v24  ;;  %vm4468_vm15 = vmpackc.low %vm5586_vm6, %vm5586_vm6 }
 0x11b   :  { %v4713_v35 = vpop.permute.xlu1 %4712  ;;  %v4718_v36 = vpop.permute.xlu0 %4717  ;;  %v4465_v37 = vpack.c.bf16 %v873_v34, %v872_v33  ;;  %v4464_v38 = vpack.c.bf16 %v871_v29, %v870_v32  ;;  %vm4471_vm6 = vmpackc.low %vm5580_vm5, %vm5580_vm5  ;;  %vm560_vm5 = vcmp.lt.s32.totalorder %v5566_v12, 1 }
 0x11c   :  { %v4715_v39 = vunpack.i.h.bf16 %v4713_v35  ;;  %v4714_v40 = vunpack.i.l.bf16 %v4713_v35  ;;  %v4720_v41 = vunpack.i.h.bf16 %v4718_v36  ;;  %v4719_v42 = vunpack.i.l.bf16 %v4718_v36 }
 0x11d   :  { %1280 = vmatprep.subr.bf16.mxu0 %v4465_v37 }
 0x11e   :  { %1281 = vmatpush1.bf16.msra.mxu0 %v4464_v38  ;;  %v656_v43 = vsel %vm6850_vm2, %v4719_v42, %v4714_v40  ;;  %v657_v44 = vsel %vm6850_vm2, %v4720_v41, %v4715_v39  ;;  %v654_v45 = vsel %vm6850_vm2, %v4714_v40, %v4719_v42  ;;  %v655_v46 = vsel %vm6850_vm2, %v4715_v39, %v4720_v41 }
 0x11f   :  { %v4723_v47 = vpop.permute.xlu1 %4722  ;;  %v4728_v48 = vpop.permute.xlu0 %4727  ;;  %v4449_v49 = vpack.c.bf16 %v657_v44, %v656_v43  ;;  %v4448_v50 = vpack.c.bf16 %v655_v46, %v654_v45  ;;  %vm6852_vm2 = vcmp.lt.s32.totalorder %v5566_v12, 126 }
 0x120   :  { %v4725_v51 = vunpack.i.h.bf16 %v4723_v47  ;;  %v4724_v52 = vunpack.i.l.bf16 %v4723_v47  ;;  %v4730_v53 = vunpack.i.h.bf16 %v4728_v48  ;;  %v4729_v54 = vunpack.i.l.bf16 %v4728_v48 }
 0x121   :  { %1253 = vmatprep.subr.bf16.mxu1 %v4449_v49 }
 0x122   :  { %v844_v55 = vsel %vm6851_vm4, %v4725_v51, %v4730_v53  ;;  %v843_v56 = vsel %vm6851_vm4, %v4724_v52, %v4729_v54  ;;  %1254 = vmatpush2.bf16.msra.mxu1 %v4448_v50  ;;  %v845_v57 = vsel %vm6851_vm4, %v4729_v54, %v4724_v52  ;;  %v846_v58 = vsel %vm6851_vm4, %v4730_v53, %v4725_v51 }
 0x123   :  { %v4733_v59 = vpop.permute.xlu1 %4732  ;;  %v4738_v60 = vpop.permute.xlu0 %4737  ;;  %v4463_v61 = vpack.c.bf16 %v846_v58, %v845_v57  ;;  %v4462_v62 = vpack.c.bf16 %v844_v55, %v843_v56  ;;  %vm6853_vm4 = vcmp.lt.s32.totalorder %v5566_v12, 119 }
 0x124   :  { %v4735_v63 = vunpack.i.h.bf16 %v4733_v59  ;;  %v4734_v0 = vunpack.i.l.bf16 %v4733_v59  ;;  %v4740_v1 = vunpack.i.h.bf16 %v4738_v60  ;;  %v4739_v3 = vunpack.i.l.bf16 %v4738_v60 }
 0x125   :  { %1282 = vmatprep.subr.bf16.mxu0 %v4463_v61 }
 0x126   :  { %1283 = vmatpush1.bf16.msra.mxu0 %v4462_v62  ;;  %v629_v4 = vsel %vm6852_vm2, %v4739_v3, %v4734_v0  ;;  %v630_v5 = vsel %vm6852_vm2, %v4740_v1, %v4735_v63  ;;  %v627_v6 = vsel %vm6852_vm2, %v4734_v0, %v4739_v3  ;;  %v628_v7 = vsel %vm6852_vm2, %v4735_v63, %v4740_v1 }
 0x127   :  { %v4743_v8 = vpop.permute.xlu1 %4742  ;;  %v4748_v9 = vpop.permute.xlu0 %4747  ;;  %v4447_v10 = vpack.c.bf16 %v630_v5, %v629_v4  ;;  %v4446_v13 = vpack.c.bf16 %v628_v7, %v627_v6  ;;  %vm6855_vm2 = vcmp.lt.s32.totalorder %v5566_v12, 127 }
 0x128   :  { %v4745_v14 = vunpack.i.h.bf16 %v4743_v8  ;;  %v4744_v19 = vunpack.i.l.bf16 %v4743_v8  ;;  %v4750_v20 = vunpack.i.h.bf16 %v4748_v9  ;;  %v4749_v21 = vunpack.i.l.bf16 %v4748_v9 }
 0x129   :  { %1255 = vmatprep.subr.bf16.mxu1 %v4447_v10 }
 0x12a   :  { %v817_v22 = vsel %vm6853_vm4, %v4745_v14, %v4750_v20  ;;  %v816_v23 = vsel %vm6853_vm4, %v4744_v19, %v4749_v21  ;;  %1256 = vmatpush2.bf16.msra.mxu1 %v4446_v13  ;;  %v818_v24 = vsel %vm6853_vm4, %v4749_v21, %v4744_v19  ;;  %v819_v25 = vsel %vm6853_vm4, %v4750_v20, %v4745_v14 }
 0x12b   :  { %v4753_v26 = vpop.permute.xlu1 %4752  ;;  %v4758_v27 = vpop.permute.xlu0 %4757  ;;  %v4461_v29 = vpack.c.bf16 %v819_v25, %v818_v24  ;;  %v4460_v32 = vpack.c.bf16 %v817_v22, %v816_v23  ;;  %vm788_vm4 = vcmp.lt.s32.totalorder %v5566_v12, 120 }
 0x12c   :  { %v4755_v33 = vunpack.i.h.bf16 %v4753_v26  ;;  %v4754_v34 = vunpack.i.l.bf16 %v4753_v26  ;;  %v4760_v35 = vunpack.i.h.bf16 %v4758_v27  ;;  %v4759_v36 = vunpack.i.l.bf16 %v4758_v27 }
 0x12d   :  { %1284 = vmatprep.subr.bf16.mxu0 %v4461_v29 }
 0x12e   :  { %1285 = vmatpush1.bf16.msra.mxu0 %v4460_v32  ;;  %v603_v37 = vsel %vm6855_vm2, %v4759_v36, %v4754_v34  ;;  %v604_v38 = vsel %vm6855_vm2, %v4760_v35, %v4755_v33  ;;  %v601_v39 = vsel %vm6855_vm2, %v4754_v34, %v4759_v36  ;;  %v602_v40 = vsel %vm6855_vm2, %v4755_v33, %v4760_v35 }
 0x12f   :  { %v4763_v41 = vpop.permute.xlu1 %4762  ;;  %v4768_v42 = vpop.permute.xlu0 %4767  ;;  %v4445_v43 = vpack.c.bf16 %v604_v38, %v603_v37  ;;  %v4444_v44 = vpack.c.bf16 %v602_v40, %v601_v39  ;;  %vm761_vm2 = vcmp.lt.s32.totalorder %v5566_v12, 121 }
 0x130   :  { %v4765_v45 = vunpack.i.h.bf16 %v4763_v41  ;;  %v4764_v46 = vunpack.i.l.bf16 %v4763_v41  ;;  %v4770_v47 = vunpack.i.h.bf16 %v4768_v42  ;;  %v4769_v48 = vunpack.i.l.bf16 %v4768_v42 }
 0x131   :  { %1257 = vmatprep.subr.bf16.mxu1 %v4445_v43 }
 0x132   :  { %v790_v49 = vsel %vm788_vm4, %v4765_v45, %v4770_v47  ;;  %v789_v50 = vsel %vm788_vm4, %v4764_v46, %v4769_v48  ;;  %1258 = vmatpush2.bf16.msra.mxu1 %v4444_v44  ;;  %v791_v51 = vsel %vm788_vm4, %v4769_v48, %v4764_v46  ;;  %v792_v52 = vsel %vm788_vm4, %v4770_v47, %v4765_v45 }
 0x133   :  { %v4773_v53 = vpop.permute.xlu1 %4772  ;;  %v4778_v18 = vpop.permute.xlu0 %4777  ;;  %4470 = vmatprep.subr.msk.bf16.mxu1 %vm4468_vm15, %v5614_v28  ;;  %v4459_v54 = vpack.c.bf16 %v792_v52, %v791_v51  ;;  %v4458_v55 = vpack.c.bf16 %v790_v49, %v789_v50  ;;  %vm6856_vm15 = vcmp.lt.s32.totalorder %v5566_v12, 122 }
 0x134   :  { %v4775_v56 = vunpack.i.h.bf16 %v4773_v53  ;;  %v4774_v57 = vunpack.i.l.bf16 %v4773_v53  ;;  %v4780_v58 = vunpack.i.h.bf16 %v4778_v18  ;;  %v4779_v59 = vunpack.i.l.bf16 %v4778_v18 }
 0x135   :  { %1286 = vmatprep.subr.bf16.mxu0 %v4459_v54 }
 0x136   :  { %v763_v60 = vsel %vm761_vm2, %v4775_v56, %v4780_v58  ;;  %v762_v61 = vsel %vm761_vm2, %v4774_v57, %v4779_v59  ;;  %4473 = vmatpush2.bf16.msk.msra.mxu1 %vm4471_vm6, %v5614_v28  ;;  %1287 = vmatpush1.bf16.msra.mxu0 %v4458_v55  ;;  %v764_v17 = vsel %vm761_vm2, %v4779_v59, %v4774_v57  ;;  %vm6857_vm6 = vcmp.lt.s32.totalorder %v5566_v12, 2 }
 0x137   :  { %v4783_v62 = vpop.permute.xlu1 %4782  ;;  %v4788_v63 = vpop.permute.xlu0 %4787  ;;  %v765_v0 = vsel %vm761_vm2, %v4780_v58, %v4775_v56  ;;  %v4456_v1 = vpack.c.bf16 %v763_v60, %v762_v61 }
 0x138   :  { %v4785_v3 = vunpack.i.h.bf16 %v4783_v62  ;;  %v4784_v4 = vunpack.i.l.bf16 %v4783_v62  ;;  %v4790_v5 = vunpack.i.h.bf16 %v4788_v63  ;;  %v4789_v6 = vunpack.i.l.bf16 %v4788_v63 }
 0x139   :  { %v4457_v7 = vpack.c.bf16 %v765_v0, %v764_v17 }
 0x13a   :  { %v561_v28 = vsel %vm560_vm5, %v4784_v4, %v4789_v6  ;;  %v562_v8 = vsel %vm560_vm5, %v4785_v3, %v4790_v5  ;;  %v563_v9 = vsel %vm560_vm5, %v4789_v6, %v4784_v4  ;;  %v564_v10 = vsel %vm560_vm5, %v4790_v5, %v4785_v3 }
 0x13b   :  { %1288 = vmatprep.subr.bf16.mxu0 %v4457_v7  ;;  %v4793_v13 = vpop.permute.xlu1 %4792  ;;  %v4798_v14 = vpop.permute.xlu0 %4797  ;;  %v4441_v19 = vpack.c.bf16 %v562_v8, %v561_v28  ;;  %v4440_v20 = vpack.c.bf16 %v564_v10, %v563_v9 }
 0x13c   :  { %1289 = vmatpush1.bf16.msra.mxu0 %v4456_v1  ;;  %v4795_v21 = vunpack.i.h.bf16 %v4793_v13  ;;  %v4794_v22 = vunpack.i.l.bf16 %v4793_v13  ;;  %v4800_v23 = vunpack.i.h.bf16 %v4798_v14  ;;  %v4799_v24 = vunpack.i.l.bf16 %v4798_v14 }
 0x13d   :  { %1261 = vmatprep.subr.bf16.mxu1 %v4441_v19 }
 0x13e   :  { %v736_v25 = vsel %vm6856_vm15, %v4795_v21, %v4800_v23  ;;  %v735_v26 = vsel %vm6856_vm15, %v4794_v22, %v4799_v24  ;;  %1262 = vmatpush2.bf16.msra.mxu1 %v4440_v20  ;;  %v737_v27 = vsel %vm6856_vm15, %v4799_v24, %v4794_v22  ;;  %v738_v29 = vsel %vm6856_vm15, %v4800_v23, %v4795_v21 }
 0x13f   :  { %v4803_v32 = vpop.permute.xlu1 %4802  ;;  %v4808_v33 = vpop.permute.xlu0 %4807  ;;  %v4455_v34 = vpack.c.bf16 %v738_v29, %v737_v27  ;;  %v4454_v35 = vpack.c.bf16 %v736_v25, %v735_v26  ;;  %vm6858_vm15 = vcmp.lt.s32.totalorder %v5566_v12, 123 }
 0x140   :  { %v4805_v36 = vunpack.i.h.bf16 %v4803_v32  ;;  %v4804_v37 = vunpack.i.l.bf16 %v4803_v32  ;;  %v4810_v38 = vunpack.i.h.bf16 %v4808_v33  ;;  %v4809_v39 = vunpack.i.l.bf16 %v4808_v33 }
 0x141   :  { %1290 = vmatprep.subr.bf16.mxu0 %v4455_v34 }
 0x142   :  { %1291 = vmatpush1.bf16.msra.mxu0 %v4454_v35  ;;  %v534_v40 = vsel %vm6857_vm6, %v4804_v37, %v4809_v39  ;;  %v535_v41 = vsel %vm6857_vm6, %v4805_v36, %v4810_v38  ;;  %v536_v42 = vsel %vm6857_vm6, %v4809_v39, %v4804_v37  ;;  %v537_v43 = vsel %vm6857_vm6, %v4810_v38, %v4805_v36 }
 0x143   :  { %v4813_v44 = vpop.permute.xlu1 %4812  ;;  %v4818_v45 = vpop.permute.xlu0 %4817  ;;  %v4439_v46 = vpack.c.bf16 %v535_v41, %v534_v40  ;;  %v4438_v47 = vpack.c.bf16 %v537_v43, %v536_v42  ;;  %vm6859_vm6 = vcmp.lt.s32.totalorder %v5566_v12, 3  ;;  %v5346_v43 = vld [vmem:[%s6821_s1] ss:$16 sps:$4 sm:$0xff]  }
 0x144   :  { %v4815_v48 = vunpack.i.h.bf16 %v4813_v44  ;;  %v4814_v49 = vunpack.i.l.bf16 %v4813_v44  ;;  %v4820_v50 = vunpack.i.h.bf16 %v4818_v45  ;;  %v4819_v51 = vunpack.i.l.bf16 %v4818_v45 }
 0x145   :  { %1263 = vmatprep.subr.bf16.mxu1 %v4439_v46 }
 0x146   :  { %v709_v52 = vsel %vm6858_vm15, %v4815_v48, %v4820_v50  ;;  %v708_v53 = vsel %vm6858_vm15, %v4814_v49, %v4819_v51  ;;  %1264 = vmatpush2.bf16.msra.mxu1 %v4438_v47  ;;  %v710_v18 = vsel %vm6858_vm15, %v4819_v51, %v4814_v49  ;;  %v711_v54 = vsel %vm6858_vm15, %v4820_v50, %v4815_v48  ;;  %v5347_v50 = vld [vmem:[%s6821_s1 + $0x8] ss:$16 sps:$4 sm:$0xff]   ;;  %v5965_v51 = vpop.f32.mrf.mxu0 }
 0x147   :  { %v4823_v55 = vpop.permute.xlu1 %4822  ;;  %v4828_v56 = vpop.permute.xlu0 %4827  ;;  %v4453_v57 = vpack.c.bf16 %v711_v54, %v710_v18  ;;  %v4452_v58 = vpack.c.bf16 %v709_v52, %v708_v53  ;;  %vm6860_vm15 = vcmp.lt.s32.totalorder %v5566_v12, 124 }
 0x148   :  { %v4825_v59 = vunpack.i.h.bf16 %v4823_v55  ;;  %v4824_v60 = vunpack.i.l.bf16 %v4823_v55  ;;  %v4830_v61 = vunpack.i.h.bf16 %v4828_v56  ;;  %v4829_v17 = vunpack.i.l.bf16 %v4828_v56  ;;  %v5967_v52 = vpop.f32.mrf.mxu0 }
 0x149   :  { %1292 = vmatprep.subr.bf16.mxu0 %v4453_v57 }
 0x14a   :  { %1293 = vmatpush1.bf16.msra.mxu0 %v4452_v58  ;;  %v507_v62 = vsel %vm6859_vm6, %v4824_v60, %v4829_v17  ;;  %v508_v63 = vsel %vm6859_vm6, %v4825_v59, %v4830_v61  ;;  %v509_v0 = vsel %vm6859_vm6, %v4829_v17, %v4824_v60  ;;  %v510_v1 = vsel %vm6859_vm6, %v4830_v61, %v4825_v59  ;;  %v5969_v53 = vpop.f32.mrf.mxu0 }
 0x14b   :  { %v4833_v3 = vpop.permute.xlu1 %4832  ;;  %v4838_v4 = vpop.permute.xlu0 %4837  ;;  %v4437_v5 = vpack.c.bf16 %v508_v63, %v507_v62  ;;  %v4436_v6 = vpack.c.bf16 %v510_v1, %v509_v0  ;;  %vm6863_vm6 = vcmp.lt.s32.totalorder %v5566_v12, 4 }
 0x14c   :  { %v4835_v7 = vunpack.i.h.bf16 %v4833_v3  ;;  %v4834_v28 = vunpack.i.l.bf16 %v4833_v3  ;;  %v4840_v8 = vunpack.i.h.bf16 %v4838_v4  ;;  %v4839_v9 = vunpack.i.l.bf16 %v4838_v4  ;;  %v5971_v18 = vpop.f32.mrf.mxu0 }
 0x14d   :  { %1265 = vmatprep.subr.bf16.mxu1 %v4437_v5 }
 0x14e   :  { %v682_v10 = vsel %vm6860_vm15, %v4835_v7, %v4840_v8  ;;  %v681_v13 = vsel %vm6860_vm15, %v4834_v28, %v4839_v9  ;;  %1266 = vmatpush2.bf16.msra.mxu1 %v4436_v6  ;;  %v683_v14 = vsel %vm6860_vm15, %v4839_v9, %v4834_v28  ;;  %v684_v19 = vsel %vm6860_vm15, %v4840_v8, %v4835_v7  ;;  %v127_v54 = vpop.f32.mrf.mxu0 }
 0x14f   :  { %v4843_v20 = vpop.permute.xlu1 %4842  ;;  %v4848_v21 = vpop.permute.xlu0 %4847  ;;  %v4451_v22 = vpack.c.bf16 %v684_v19, %v683_v14  ;;  %v4450_v23 = vpack.c.bf16 %v682_v10, %v681_v13  ;;  %vm6862_vm15 = vcmp.lt.s32.totalorder %v5566_v12, 116 }
 0x150   :  { %v4845_v24 = vunpack.i.h.bf16 %v4843_v20  ;;  %v4844_v25 = vunpack.i.l.bf16 %v4843_v20  ;;  %v4850_v26 = vunpack.i.h.bf16 %v4848_v21  ;;  %v4849_v27 = vunpack.i.l.bf16 %v4848_v21  ;;  %v129_v55 = vpop.f32.mrf.mxu0 }
 0x151   :  { %1294 = vmatprep.subr.bf16.mxu0 %v4451_v22  ;;  %v5350_v22 = vld [vmem:[%s6824_s4] sm:$0xff]  }
 0x152   :  { %1295 = vmatpush1.bf16.msra.mxu0 %v4450_v23  ;;  %v480_v29 = vsel %vm6863_vm6, %v4844_v25, %v4849_v27  ;;  %v481_v32 = vsel %vm6863_vm6, %v4845_v24, %v4850_v26  ;;  %v482_v33 = vsel %vm6863_vm6, %v4849_v27, %v4844_v25  ;;  %v483_v34 = vsel %vm6863_vm6, %v4850_v26, %v4845_v24  ;;  %v131_v56 = vpop.f32.mrf.mxu0  ;;  %v5351_v23 = vld [vmem:[%s6824_s4 + $0x8] ss:$0 sps:$4 sm:$0x11]  }
 0x153   :  { %v4853_v35 = vpop.permute.xlu1 %4852  ;;  %v4858_v36 = vpop.permute.xlu0 %4857  ;;  %v4435_v37 = vpack.c.bf16 %v481_v32, %v480_v29  ;;  %v4434_v38 = vpack.c.bf16 %v483_v34, %v482_v33 }
 0x154   :  { %v4855_v39 = vunpack.i.h.bf16 %v4853_v35  ;;  %v4854_v40 = vunpack.i.l.bf16 %v4853_v35  ;;  %v4860_v41 = vunpack.i.h.bf16 %v4858_v36  ;;  %v4859_v42 = vunpack.i.l.bf16 %v4858_v36  ;;  %v132_v57 = vpop.f32.mrf.mxu0 }
 0x155   :  { %1267 = vmatprep.subr.bf16.mxu1 %v4435_v37 }
 0x156   :  { %v898_v44 = vsel %vm6862_vm15, %v4855_v39, %v4860_v41  ;;  %v897_v45 = vsel %vm6862_vm15, %v4854_v40, %v4859_v42  ;;  %1268 = vmatpush2.bf16.msra.mxu1 %v4434_v38  ;;  %v899_v46 = vsel %vm6862_vm15, %v4859_v42, %v4854_v40  ;;  %v900_v47 = vsel %vm6862_vm15, %v4860_v41, %v4855_v39 }
 0x157   :  { %v4467_v48 = vpack.c.bf16 %v900_v47, %v899_v46  ;;  %v4466_v49 = vpack.c.bf16 %v898_v44, %v897_v45  ;;  %v1409_v45 = vshrl.u32 %v146_v11, 7  ;;  %vm232_vm15 = vcmp.lt.s32.totalorder %v5572_v16, 63 }
 0x159   :  { %1270 = vmatmul.mubr.bf16.vlgmr.msra.gmra.mxu1 %v5346_v43  ;;  %1310 = vmatprep.subr.bf16.mxu0 %v4467_v48  ;;  %v6018_v46 = vsub.s32 1, %v1409_v45 }
 0x15a   :  { %1311 = vmatpush2.bf16.msra.mxu0 %v4466_v49  ;;  %4150 = vmatprep.mubr.msk.bf16.mxu1 %vm6861_vm0, %v5705_v31 }
 0x15d   :  { %1313 = vmatmul.mubr.bf16.vlgmr.msra.gmra.mxu0 %v5347_v50 }
 0x15e   :  { %1375 = vmatprep.mubr.bf16.mxu0 %v5460_v2 }
 0x160   :  { %v5973_v31 = vpop.permute.xlu0 %183  ;;  %v5975_v17 = vpop.permute.xlu1 %178 }
 0x164   :  { %v66_v27 = vpop.permute.xlu1 %65  ;;  %v56_v47 = vpop.permute.xlu0 %55 }
 0x165   :  { %v6011_v32 = vadd.f32 %v127_v54, %v66_v27  ;;  %v6013_v34 = vadd.f32 %v129_v55, %v66_v27  ;;  %v6022_v55 = vadd.f32 %v5965_v51, %v56_v47 }
 0x168   :  { %v61_v49 = vpop.permute.xlu1 %60 }
 0x169   :  { %v6025_v56 = vadd.f32 %v5969_v53, %v61_v49 }
 0x219   :  { %v1271_v58 = vpop.f32.mrf.mxu1 }
 0x21a   :  { %v1272_v62 = vadd.f32 %v1271_v58, %v5975_v17 }
 0x21b   :  { %v1273_v59 = vpop.f32.mrf.mxu1 }
 0x21c   :  { %v1274_v1 = vadd.f32 %v1273_v59, %v5975_v17 }
 0x21d   :  { %v1275_v60 = vpop.f32.mrf.mxu1  ;;  %v1314_v61 = vpop.f32.mrf.mxu0 }
 0x21e   :  { %v1276_v3 = vadd.f32 %v1275_v60, %v5973_v31  ;;  %v5985_v28 = vadd.f32 %v1314_v61, %v1272_v62  ;;  %v6031_v61 = vadd.f32 %v5967_v52, %v56_v47  ;;  %v6034_v62 = vadd.f32 %v5971_v18, %v61_v49 }
 0x21f   :  { %v1277_v63 = vpop.f32.mrf.mxu1  ;;  %v1316_v0 = vpop.f32.mrf.mxu0 }
 0x220   :  { %v1278_v5 = vadd.f32 %v1277_v63, %v5973_v31  ;;  %v5981_v6 = vadd.f32 %v1316_v0, %v1274_v1  ;;  %v1323_v19 = vmax.f32 %v5985_v28, 0.0 }
 0x221   :  { %v1318_v4 = vpop.f32.mrf.mxu0 }
 0x222   :  { %v5983_v7 = vadd.f32 %v1318_v4, %v1276_v3  ;;  %v1324_v13 = vmax.f32 %v5981_v6, 0.0 }
 0x223   :  { %v1320_v8 = vpop.f32.mrf.mxu0 }
 0x224   :  { %v5987_v9 = vadd.f32 %v1320_v8, %v1278_v5  ;;  %v1325_v10 = vmax.f32 %v5983_v7, 0.0 }
 0x226   :  { %v1326_v14 = vmax.f32 %v5987_v9, 0.0  ;;  %v1327_v21 = vpack.c.bf16 %v1325_v10, %v1323_v19 }
 0x228   :  { %v1328_v20 = vpack.c.bf16 %v1326_v14, %v1324_v13 }
 0x22a   :  { %1357 = vmatprep.subr.bf16.mxu0 %v1328_v20 }
 0x22b   :  { %1358 = vmatpush1.bf16.msra.mxu0 %v1327_v21 }
 0x22e   :  { %4042 = vmatmul.mubr.msk.bf16.vlgmr.msra.gmra.mxu0 %vm6861_vm0, %v5350_v22 }
 0x22f   :  { %1385 = vmatprep.mubr.bf16.mxu0 %v5460_v2 }
 0x236   :  { %4043 = vmatmul.mubr.msk.bf16.gmra.mxu0 %vm6861_vm0, %v5351_v23  ;;  %vm231_vm0 = vcmp.lt.s32.totalorder %v5570_v15, 63 }
 0x237   :  { %2460 = vmatprep.mubr.bf16.mxu0 %v5695_v30  ;;  %vm6049_vm6 = vmand %vm225_vm1, %vm231_vm0 }
 0x238   :  { %vm6064_vm0 = vmand %vm226_vm3, %vm232_vm15  ;;  %vm6893_vm15 = vcmp.lt.s32.totalorder %v5566_v12, 117 }
 0x2ee   :  { %v1377_v24 = vpop.f32.mrf.mxu0 }
 0x2f0   :  { %v1379_v25 = vpop.f32.mrf.mxu0 }
 0x2f2   :  { %v1381_v26 = vpop.f32.mrf.mxu0 }
 0x2f4   :  { %v1383_v29 = vpop.f32.mrf.mxu0 }
 0x2f6   :  { %v1387_v33 = vpop.f32.mrf.mxu0 }
 0x2f7   :  { %v1394_v35 = vadd.f32 %v1387_v33, %v6011_v32 }
 0x2f8   :  { %v1389_v36 = vpop.f32.mrf.mxu0 }
 0x2f9   :  { %v4044_v37 = vmul.f32 -1.442695, %v1394_v35  ;;  %v1395_v38 = vadd.f32 %v1389_v36, %v6013_v34 }
 0x2fa   :  { %v1391_v39 = vpop.f32.mrf.mxu0 }
 0x2fb   :  { %5352 = vpow2.f32 %v4044_v37  ;;  %v4045_v40 = vmul.f32 -1.442695, %v1395_v38 }
 0x2fc   :  { %v1392_v30 = vpop.f32.mrf.mxu0 }
 0x2fd   :  { %5354 = vpow2.f32 %v4045_v40 }
 0x308   :  { %v5353_v41 = vpop.eup %5352 }
 0x309   :  { %v1402_v42 = vadd.f32 1.0, %v5353_v41 }
 0x30a   :  { %v5355_v43 = vpop.eup %5354 }
 0x30b   :  { %5356 = vrcp.f32 %v1402_v42  ;;  %v1403_v44 = vadd.f32 1.0, %v5355_v43 }
 0x30d   :  { %5358 = vrcp.f32 %v1403_v44 }
 0x318   :  { %v5357_v48 = vpop.eup %5356 }
 0x319   :  { %v1411_v50 = vrot.slane %v5357_v48, %v6018_v46 }
 0x31a   :  { %v5359_v54 = vpop.eup %5358 }
 0x31b   :  { %v1416_v57 = vmul.f32 %v1411_v50, %v1377_v24  ;;  %v1418_v58 = vmul.f32 %v1411_v50, %v1381_v26  ;;  %v1415_v59 = vrot.slane %v5359_v54, %v6018_v46  ;;  %v6038_v26 = vsub.s32 0, %v1409_v45 }
 0x31c   :  { %v1453_v27 = vsub.f32 1.0, %v5359_v54 }
 0x31d   :  { %v1420_v11 = vadd.f32 %v1416_v57, %v6022_v55  ;;  %v1422_v60 = vadd.f32 %v1418_v58, %v6025_v56  ;;  %v1417_v63 = vmul.f32 %v1415_v59, %v1379_v25  ;;  %v1419_v51 = vmul.f32 %v1415_v59, %v1383_v29 }
 0x31e   :  { %v1452_v25 = vsub.f32 1.0, %v5357_v48  ;;  %v1469_v37 = vrot.slane %v5357_v48, %v6038_v26  ;;  %v1461_v39 = vrot.slane %v1453_v27, %v6038_v26  ;;  %v1473_v48 = vrot.slane %v5359_v54, %v6038_v26 }
 0x31f   :  { %v4046_v0 = vmul.f32 -1.442695, %v1420_v11  ;;  %v4048_v1 = vmul.f32 -1.442695, %v1422_v60  ;;  %v1421_v53 = vadd.f32 %v1417_v63, %v6031_v61  ;;  %v1423_v3 = vadd.f32 %v1419_v51, %v6034_v62 }
 0x320   :  { %v1457_v29 = vrot.slane %v1452_v25, %v6038_v26 }
 0x321   :  { %5360 = vpow2.f32 %v4046_v0  ;;  %v4047_v4 = vmul.f32 -1.442695, %v1421_v53  ;;  %v4049_v5 = vmul.f32 -1.442695, %v1423_v3 }
 0x322   :  { %5362 = vpow2.f32 %v4048_v1  ;;  %v1462_v30 = vmul.f32 %v1457_v29, %v1323_v19  ;;  %v1464_v44 = vmul.f32 %v1457_v29, %v1325_v10  ;;  %v1463_v19 = vmul.f32 %v1461_v39, %v1324_v13 }
 0x323   :  { %5364 = vpow2.f32 %v4047_v4  ;;  %v1465_v10 = vmul.f32 %v1461_v39, %v1326_v14 }
 0x324   :  { %5366 = vpow2.f32 %v4049_v5 }
 0x32e   :  { %v5361_v8 = vpop.eup %5360 }
 0x32f   :  { %v5363_v52 = vpop.eup %5362  ;;  %v1436_v20 = vadd.f32 1.0, %v5361_v8 }
 0x330   :  { %v1438_v21 = vadd.f32 1.0, %v5363_v52  ;;  %v5365_v18 = vpop.eup %5364 }
 0x331   :  { %5368 = vrcp.f32 %v1436_v20  ;;  %v5367_v22 = vpop.eup %5366  ;;  %v1437_v23 = vadd.f32 1.0, %v5365_v18 }
 0x332   :  { %5370 = vrcp.f32 %v1438_v21  ;;  %v1439_v24 = vadd.f32 1.0, %v5367_v22 }
 0x333   :  { %5372 = vrcp.f32 %v1437_v23 }
 0x334   :  { %5374 = vrcp.f32 %v1439_v24 }
 0x33e   :  { %v5369_v33 = vpop.eup %5368 }
 0x33f   :  { %v5371_v35 = vpop.eup %5370  ;;  %v1448_v36 = vmul.f32 %v5369_v33, %v1420_v11 }
 0x340   :  { %v1450_v38 = vmul.f32 %v5371_v35, %v1422_v60  ;;  %v5373_v40 = vpop.eup %5372 }
 0x341   :  { %v1474_v41 = vmul.f32 %v1469_v37, %v1448_v36  ;;  %v5375_v42 = vpop.eup %5374  ;;  %v1449_v47 = vmul.f32 %v5373_v40, %v1421_v53 }
 0x342   :  { %v1476_v45 = vmul.f32 %v1469_v37, %v1450_v38  ;;  %v1451_v50 = vmul.f32 %v5375_v42, %v1423_v3 }
 0x343   :  { %v6056_v49 = vadd.f32 %v1474_v41, %v1462_v30  ;;  %v1475_v57 = vmul.f32 %v1473_v48, %v1449_v47 }
 0x344   :  { %v6058_v28 = vadd.f32 %v1476_v45, %v1464_v44  ;;  %v1477_v54 = vmul.f32 %v1473_v48, %v1451_v50 }
 0x345   :  { %v1486_v7 = vsel %vm6049_vm6, %v6056_v49, 0.0  ;;  %v6076_v13 = vadd.f32 %v1475_v57, %v1463_v19 }
 0x346   :  { %v1488_v6 = vsel %vm6049_vm6, %v6058_v28, 0.0  ;;  %v4528_v59 = vpack.c.bf16 %v6058_v28, %v6056_v49  ;;  %v6080_v11 = vadd.f32 %v1477_v54, %v1465_v10 }
 0x347   :  { %v4862_v60 = vpack.i.bf16 %v1488_v6, %v1486_v7  ;;  %v1487_v63 = vsel %vm6064_vm0, %v6076_v13, 0.0 }
 0x348   :  { %v1489_v9 = vsel %vm6064_vm0, %v6080_v11, 0.0  ;;  %v4525_v51 = vpack.c.bf16 %v6080_v11, %v6076_v13 }
 0x349   :  { %4863 = vrot.lane.b32.xlu0 %v4862_v60, %s5461_s0  ;;  %v4982_v14 = vpack.i.bf16 %v1489_v9, %v1487_v63 }
 0x34b   :  { %4983 = vrot.lane.b32.xlu1 %v4982_v14, %s5461_s0 }
 0x34d   :  { %4868 = vrot.lane.b32.xlu0 %v4862_v60, %s5462_s22 }
 0x34f   :  { %4988 = vrot.lane.b32.xlu1 %v4982_v14, %s5462_s22 }
 0x351   :  { %4873 = vrot.lane.b32.xlu0 %v4862_v60, %s5463_s23 }
 0x353   :  { %4993 = vrot.lane.b32.xlu1 %v4982_v14, %s5463_s23 }
 0x355   :  { %4878 = vrot.lane.b32.xlu0 %v4862_v60, %s5464_s24 }
 0x357   :  { %4998 = vrot.lane.b32.xlu1 %v4982_v14, %s5464_s24 }
 0x359   :  { %4883 = vrot.lane.b32.xlu0 %v4862_v60, %s5465_s25 }
 0x35b   :  { %5003 = vrot.lane.b32.xlu1 %v4982_v14, %s5465_s25 }
 0x35d   :  { %4888 = vrot.lane.b32.xlu0 %v4862_v60, %s5466_s26 }
 0x35f   :  { %5008 = vrot.lane.b32.xlu1 %v4982_v14, %s5466_s26 }
 0x361   :  { %4893 = vrot.lane.b32.xlu0 %v4862_v60, %s5467_s27 }
 0x363   :  { %5013 = vrot.lane.b32.xlu1 %v4982_v14, %s5467_s27 }
 0x365   :  { %4898 = vrot.lane.b32.xlu0 %v4862_v60, %s5468_s28 }
 0x367   :  { %5018 = vrot.lane.b32.xlu1 %v4982_v14, %s5468_s28 }
 0x369   :  { %4903 = vrot.lane.b32.xlu0 %v4862_v60, %s5469_s29 }
 0x36b   :  { %5023 = vrot.lane.b32.xlu1 %v4982_v14, %s5469_s29 }
 0x36d   :  { %4908 = vrot.lane.b32.xlu0 %v4862_v60, %s5470_s30 }
 0x36f   :  { %5028 = vrot.lane.b32.xlu1 %v4982_v14, %s5470_s30 }
 0x371   :  { %4913 = vrot.lane.b32.xlu0 %v4862_v60, %s6873_s10 }
 0x373   :  { %5033 = vrot.lane.b32.xlu1 %v4982_v14, %s6873_s10 }
 0x375   :  { %4918 = vrot.lane.b32.xlu0 %v4862_v60, %s6871_s11 }
 0x377   :  { %5038 = vrot.lane.b32.xlu1 %v4982_v14, %s6871_s11 }
 0x379   :  { %4923 = vrot.lane.b32.xlu0 %v4862_v60, %s6869_s12 }
 0x37b   :  { %5043 = vrot.lane.b32.xlu1 %v4982_v14, %s6869_s12 }
 0x37d   :  { %4928 = vrot.lane.b32.xlu0 %v4862_v60, %s6867_s13 }
 0x37f   :  { %5048 = vrot.lane.b32.xlu1 %v4982_v14, %s6867_s13 }
 0x381   :  { %4933 = vrot.lane.b32.xlu0 %v4862_v60, %s6883_s17 }
 0x383   :  { %5053 = vrot.lane.b32.xlu1 %v4982_v14, %s6883_s17 }
 0x385   :  { %4938 = vrot.lane.b32.xlu0 %v4862_v60, %s6884_s6 }
 0x387   :  { %5058 = vrot.lane.b32.xlu1 %v4982_v14, %s6884_s6 }
 0x389   :  { %4943 = vrot.lane.b32.xlu0 %v4862_v60, %s6885_s18 }
 0x38b   :  { %5063 = vrot.lane.b32.xlu1 %v4982_v14, %s6885_s18 }
 0x38d   :  { %4948 = vrot.lane.b32.xlu0 %v4862_v60, %s6886_s19 }
 0x38f   :  { %5068 = vrot.lane.b32.xlu1 %v4982_v14, %s6886_s19 }
 0x391   :  { %4953 = vrot.lane.b32.xlu0 %v4862_v60, %s6887_s2 }
 0x393   :  { %5073 = vrot.lane.b32.xlu1 %v4982_v14, %s6887_s2 }
 0x395   :  { %4958 = vrot.lane.b32.xlu0 %v4862_v60, %s6888_s5 }
 0x397   :  { %5078 = vrot.lane.b32.xlu1 %v4982_v14, %s6888_s5 }
 0x399   :  { %4963 = vrot.lane.b32.xlu0 %v4862_v60, %s6889_s14 }
 0x39b   :  { %5083 = vrot.lane.b32.xlu1 %v4982_v14, %s6889_s14 }
 0x39d   :  { %4968 = vrot.lane.b32.xlu0 %v4862_v60, %s6890_s15 }
 0x39f   :  { %5088 = vrot.lane.b32.xlu1 %v4982_v14, %s6890_s15 }
 0x3a1   :  { %4973 = vrot.lane.b32.xlu0 %v4862_v60, %s6891_s16 }
 0x3a3   :  { %5093 = vrot.lane.b32.xlu1 %v4982_v14, %s6891_s16 }
 0x3a5   :  { %4978 = vrot.lane.b32.xlu0 %v4862_v60, %s6892_s20 }
 0x3a7   :  { %5098 = vrot.lane.b32.xlu1 %v4982_v14, %s6892_s20 }
 0x3a9   :  { %138 = vrot.lane.b32.xlu0 %v6011_v32, %s6867_s13 }
 0x3ab   :  { %144 = vrot.lane.b32.xlu1 %v6013_v34, %s6867_s13 }
 0x3ad   :  { %134 = vrot.lane.b32.xlu0 %v6022_v55, %s6867_s13 }
 0x3af   :  { %136 = vrot.lane.b32.xlu1 %v6025_v56, %s6867_s13 }
 0x3b1   :  { %140 = vrot.lane.b32.xlu0 %v6031_v61, %s6867_s13 }
 0x3b3   :  { %142 = vrot.lane.b32.xlu1 %v6034_v62, %s6867_s13 }
 0x3bb   :  { %v4864_v0 = vpop.permute.xlu0 %4863 }
 0x3bc   :  { %v4866_v53 = vunpack.i.h.bf16 %v4864_v0  ;;  %v4865_v3 = vunpack.i.l.bf16 %v4864_v0 }
 0x3bd   :  { %v4984_v1 = vpop.permute.xlu1 %4983 }
 0x3be   :  { %v4986_v4 = vunpack.i.h.bf16 %v4984_v1  ;;  %v4985_v5 = vunpack.i.l.bf16 %v4984_v1 }
 0x3bf   :  { %v4869_v8 = vpop.permute.xlu0 %4868 }
 0x3c0   :  { %v1683_v52 = vsel %vm452_vm7, %v4986_v4, %v4866_v53  ;;  %v1682_v20 = vsel %vm452_vm7, %v4985_v5, %v4865_v3  ;;  %v1680_v21 = vsel %vm452_vm7, %v4865_v3, %v4985_v5  ;;  %v1681_v18 = vsel %vm452_vm7, %v4866_v53, %v4986_v4 }
 0x3c1   :  { %v4989_v22 = vpop.permute.xlu1 %4988  ;;  %v4489_v23 = vpack.c.bf16 %v1681_v18, %v1680_v21  ;;  %v4488_v24 = vpack.c.bf16 %v1683_v52, %v1682_v20  ;;  %v4871_v25 = vunpack.i.h.bf16 %v4869_v8  ;;  %v4870_v27 = vunpack.i.l.bf16 %v4869_v8 }
 0x3c2   :  { %v4991_v29 = vunpack.i.h.bf16 %v4989_v22  ;;  %v4990_v33 = vunpack.i.l.bf16 %v4989_v22 }
 0x3c3   :  { %v4874_v35 = vpop.permute.xlu0 %4873  ;;  %2428 = vmatprep.subr.bf16.mxu0 %v4489_v23 }
 0x3c4   :  { %v1657_v36 = vsel %vm425_vm8, %v4991_v29, %v4871_v25  ;;  %v1656_v37 = vsel %vm425_vm8, %v4990_v33, %v4870_v27  ;;  %2429 = vmatpush1.bf16.msra.mxu0 %v4488_v24  ;;  %v1654_v38 = vsel %vm425_vm8, %v4870_v27, %v4990_v33  ;;  %v1655_v39 = vsel %vm425_vm8, %v4871_v25, %v4991_v29 }
 0x3c5   :  { %v4994_v40 = vpop.permute.xlu1 %4993  ;;  %v4487_v30 = vpack.c.bf16 %v1655_v39, %v1654_v38  ;;  %v4486_v41 = vpack.c.bf16 %v1657_v36, %v1656_v37  ;;  %v4876_v42 = vunpack.i.h.bf16 %v4874_v35  ;;  %v4875_v44 = vunpack.i.l.bf16 %v4874_v35 }
 0x3c6   :  { %v4996_v45 = vunpack.i.h.bf16 %v4994_v40  ;;  %v4995_v47 = vunpack.i.l.bf16 %v4994_v40 }
 0x3c7   :  { %v4879_v48 = vpop.permute.xlu0 %4878  ;;  %2430 = vmatprep.subr.bf16.mxu0 %v4487_v30 }
 0x3c8   :  { %v1631_v50 = vsel %vm398_vm9, %v4996_v45, %v4876_v42  ;;  %v1630_v19 = vsel %vm398_vm9, %v4995_v47, %v4875_v44  ;;  %2431 = vmatpush1.bf16.msra.mxu0 %v4486_v41  ;;  %v1628_v57 = vsel %vm398_vm9, %v4875_v44, %v4995_v47  ;;  %v1629_v7 = vsel %vm398_vm9, %v4876_v42, %v4996_v45 }
 0x3c9   :  { %v4999_v10 = vpop.permute.xlu1 %4998  ;;  %v4485_v54 = vpack.c.bf16 %v1629_v7, %v1628_v57  ;;  %v4484_v6 = vpack.c.bf16 %v1631_v50, %v1630_v19  ;;  %v4881_v60 = vunpack.i.h.bf16 %v4879_v48  ;;  %v4880_v63 = vunpack.i.l.bf16 %v4879_v48 }
 0x3ca   :  { %v5001_v9 = vunpack.i.h.bf16 %v4999_v10  ;;  %v5000_v14 = vunpack.i.l.bf16 %v4999_v10 }
 0x3cb   :  { %v4884_v0 = vpop.permute.xlu0 %4883  ;;  %2432 = vmatprep.subr.bf16.mxu0 %v4485_v54 }
 0x3cc   :  { %v1605_v1 = vsel %vm371_vm10, %v5001_v9, %v4881_v60  ;;  %v1604_v53 = vsel %vm371_vm10, %v5000_v14, %v4880_v63  ;;  %2433 = vmatpush1.bf16.msra.mxu0 %v4484_v6  ;;  %v1602_v3 = vsel %vm371_vm10, %v4880_v63, %v5000_v14  ;;  %v1603_v4 = vsel %vm371_vm10, %v4881_v60, %v5001_v9 }
 0x3cd   :  { %v5004_v5 = vpop.permute.xlu1 %5003  ;;  %v4483_v8 = vpack.c.bf16 %v1603_v4, %v1602_v3  ;;  %v4482_v52 = vpack.c.bf16 %v1605_v1, %v1604_v53  ;;  %v4886_v20 = vunpack.i.h.bf16 %v4884_v0  ;;  %v4885_v21 = vunpack.i.l.bf16 %v4884_v0 }
 0x3ce   :  { %v5006_v18 = vunpack.i.h.bf16 %v5004_v5  ;;  %v5005_v22 = vunpack.i.l.bf16 %v5004_v5 }
 0x3cf   :  { %v4889_v23 = vpop.permute.xlu0 %4888  ;;  %2434 = vmatprep.subr.bf16.mxu0 %v4483_v8 }
 0x3d0   :  { %v1579_v24 = vsel %vm344_vm11, %v5006_v18, %v4886_v20  ;;  %v1578_v25 = vsel %vm344_vm11, %v5005_v22, %v4885_v21  ;;  %2435 = vmatpush1.bf16.msra.mxu0 %v4482_v52  ;;  %v1576_v27 = vsel %vm344_vm11, %v4885_v21, %v5005_v22  ;;  %v1577_v29 = vsel %vm344_vm11, %v4886_v20, %v5006_v18 }
 0x3d1   :  { %v5009_v33 = vpop.permute.xlu1 %5008  ;;  %v4481_v35 = vpack.c.bf16 %v1577_v29, %v1576_v27  ;;  %v4480_v36 = vpack.c.bf16 %v1579_v24, %v1578_v25  ;;  %v4891_v37 = vunpack.i.h.bf16 %v4889_v23  ;;  %v4890_v38 = vunpack.i.l.bf16 %v4889_v23 }
 0x3d2   :  { %v5011_v39 = vunpack.i.h.bf16 %v5009_v33  ;;  %v5010_v40 = vunpack.i.l.bf16 %v5009_v33 }
 0x3d3   :  { %v4894_v30 = vpop.permute.xlu0 %4893  ;;  %2436 = vmatprep.subr.bf16.mxu0 %v4481_v35 }
 0x3d4   :  { %v1553_v41 = vsel %vm6865_vm12, %v5011_v39, %v4891_v37  ;;  %v1552_v42 = vsel %vm6865_vm12, %v5010_v40, %v4890_v38  ;;  %2437 = vmatpush1.bf16.msra.mxu0 %v4480_v36  ;;  %v1550_v44 = vsel %vm6865_vm12, %v4890_v38, %v5010_v40  ;;  %v1551_v45 = vsel %vm6865_vm12, %v4891_v37, %v5011_v39 }
 0x3d5   :  { %v5014_v47 = vpop.permute.xlu1 %5013  ;;  %v4479_v48 = vpack.c.bf16 %v1551_v45, %v1550_v44  ;;  %v4478_v50 = vpack.c.bf16 %v1553_v41, %v1552_v42  ;;  %v4896_v19 = vunpack.i.h.bf16 %v4894_v30  ;;  %v4895_v57 = vunpack.i.l.bf16 %v4894_v30 }
 0x3d6   :  { %v5016_v7 = vunpack.i.h.bf16 %v5014_v47  ;;  %v5015_v10 = vunpack.i.l.bf16 %v5014_v47 }
 0x3d7   :  { %v4899_v54 = vpop.permute.xlu0 %4898  ;;  %2438 = vmatprep.subr.bf16.mxu0 %v4479_v48 }
 0x3d8   :  { %v1527_v6 = vsel %vm6864_vm13, %v5016_v7, %v4896_v19  ;;  %v1526_v60 = vsel %vm6864_vm13, %v5015_v10, %v4895_v57  ;;  %2439 = vmatpush1.bf16.msra.mxu0 %v4478_v50  ;;  %v1524_v63 = vsel %vm6864_vm13, %v4895_v57, %v5015_v10  ;;  %v1525_v9 = vsel %vm6864_vm13, %v4896_v19, %v5016_v7  ;;  %vm6894_vm13 = vmmov %vm6893_vm15 }
 0x3d9   :  { %v5019_v14 = vpop.permute.xlu1 %5018  ;;  %v4477_v0 = vpack.c.bf16 %v1525_v9, %v1524_v63  ;;  %v4476_v1 = vpack.c.bf16 %v1527_v6, %v1526_v60  ;;  %v4901_v53 = vunpack.i.h.bf16 %v4899_v54  ;;  %v4900_v3 = vunpack.i.l.bf16 %v4899_v54  ;;  %vm6895_vm12 = vmmov %vm6894_vm13 }
 0x3da   :  { %v5021_v4 = vunpack.i.h.bf16 %v5019_v14  ;;  %v5020_v5 = vunpack.i.l.bf16 %v5019_v14 }
 0x3db   :  { %v4904_v8 = vpop.permute.xlu0 %4903  ;;  %2440 = vmatprep.subr.bf16.mxu0 %v4477_v0 }
 0x3dc   :  { %v1501_v52 = vsel %vm6866_vm14, %v5021_v4, %v4901_v53  ;;  %v1500_v20 = vsel %vm6866_vm14, %v5020_v5, %v4900_v3  ;;  %2441 = vmatpush1.bf16.msra.mxu0 %v4476_v1  ;;  %v1498_v21 = vsel %vm6866_vm14, %v4900_v3, %v5020_v5  ;;  %v1499_v18 = vsel %vm6866_vm14, %v4901_v53, %v5021_v4  ;;  %vm6896_vm14 = vmmov %vm6895_vm12 }
 0x3dd   :  { %v5024_v22 = vpop.permute.xlu1 %5023  ;;  %v4475_v23 = vpack.c.bf16 %v1499_v18, %v1498_v21  ;;  %v4474_v24 = vpack.c.bf16 %v1501_v52, %v1500_v20  ;;  %v4906_v25 = vunpack.i.h.bf16 %v4904_v8  ;;  %v4905_v27 = vunpack.i.l.bf16 %v4904_v8 }
 0x3de   :  { %v5026_v29 = vunpack.i.h.bf16 %v5024_v22  ;;  %v5025_v33 = vunpack.i.l.bf16 %v5024_v22 }
 0x3df   :  { %v4909_v35 = vpop.permute.xlu0 %4908  ;;  %2442 = vmatprep.subr.bf16.mxu0 %v4475_v23 }
 0x3e0   :  { %v2085_v36 = vsel %vm6893_vm15, %v4906_v25, %v5026_v29  ;;  %v2084_v37 = vsel %vm6894_vm13, %v4905_v27, %v5025_v33  ;;  %2443 = vmatpush1.bf16.msra.mxu0 %v4474_v24  ;;  %v2086_v38 = vsel %vm6895_vm12, %v5025_v33, %v4905_v27  ;;  %v2087_v39 = vsel %vm6896_vm14, %v5026_v29, %v4906_v25 }
 0x3e1   :  { %v5029_v40 = vpop.permute.xlu1 %5028  ;;  %v4521_v30 = vpack.c.bf16 %v2087_v39, %v2086_v38  ;;  %v4520_v41 = vpack.c.bf16 %v2085_v36, %v2084_v37  ;;  %v4911_v42 = vunpack.i.h.bf16 %v4909_v35  ;;  %v4910_v44 = vunpack.i.l.bf16 %v4909_v35 }
 0x3e2   :  { %v5031_v45 = vunpack.i.h.bf16 %v5029_v40  ;;  %v5030_v47 = vunpack.i.l.bf16 %v5029_v40  ;;  %vm6897_vm15 = vcmp.lt.s32.totalorder %v5566_v12, 125 }
 0x3e3   :  { %v4914_v48 = vpop.permute.xlu0 %4913  ;;  %2471 = vmatprep.subr.bf16.mxu1 %v4521_v30  ;;  %vm6898_vm13 = vmmov %vm6897_vm15 }
 0x3e4   :  { %v1877_v50 = vsel %vm6897_vm15, %v4911_v42, %v5031_v45  ;;  %v1876_v19 = vsel %vm6898_vm13, %v4910_v44, %v5030_v47  ;;  %2472 = vmatpush1.bf16.msra.mxu1 %v4520_v41  ;;  %vm6899_vm12 = vmmov %vm6898_vm13  ;;  %v4916_v60 = vunpack.i.h.bf16 %v4914_v48  ;;  %v4915_v63 = vunpack.i.l.bf16 %v4914_v48 }
 0x3e5   :  { %v1878_v57 = vsel %vm6899_vm12, %v5030_v47, %v4910_v44  ;;  %vm6900_vm14 = vmmov %vm6899_vm12  ;;  %v4504_v10 = vpack.c.bf16 %v1877_v50, %v1876_v19  ;;  %v5034_v54 = vpop.permute.xlu1 %5033  ;;  %vm6901_vm15 = vcmp.lt.s32.totalorder %v5566_v12, 118 }
 0x3e6   :  { %v1879_v7 = vsel %vm6900_vm14, %v5031_v45, %v4911_v42  ;;  %v5036_v9 = vunpack.i.h.bf16 %v5034_v54  ;;  %v5035_v14 = vunpack.i.l.bf16 %v5034_v54  ;;  %vm6902_vm13 = vmmov %vm6901_vm15 }
 0x3e7   :  { %v4505_v6 = vpack.c.bf16 %v1879_v7, %v1878_v57  ;;  %v4919_v0 = vpop.permute.xlu0 %4918  ;;  %vm6903_vm12 = vmmov %vm6902_vm13 }
 0x3e8   :  { %v2059_v1 = vsel %vm6901_vm15, %v4916_v60, %v5036_v9  ;;  %v2058_v53 = vsel %vm6902_vm13, %v4915_v63, %v5035_v14  ;;  %v2060_v3 = vsel %vm6903_vm12, %v5035_v14, %v4915_v63  ;;  %vm6904_vm14 = vmmov %vm6903_vm12  ;;  %v4921_v20 = vunpack.i.h.bf16 %v4919_v0 }
 0x3e9   :  { %2444 = vmatprep.subr.bf16.mxu0 %v4505_v6  ;;  %v2061_v4 = vsel %vm6904_vm14, %v5036_v9, %v4916_v60  ;;  %v4518_v5 = vpack.c.bf16 %v2059_v1, %v2058_v53  ;;  %v5039_v8 = vpop.permute.xlu1 %5038  ;;  %v4920_v21 = vunpack.i.l.bf16 %v4919_v0  ;;  %vm6905_vm15 = vcmp.lt.s32.totalorder %v5566_v12, 126 }
 0x3ea   :  { %2445 = vmatpush2.bf16.msra.mxu0 %v4504_v10  ;;  %v4519_v52 = vpack.c.bf16 %v2061_v4, %v2060_v3  ;;  %v5041_v18 = vunpack.i.h.bf16 %v5039_v8  ;;  %v5040_v22 = vunpack.i.l.bf16 %v5039_v8  ;;  %vm6906_vm13 = vmmov %vm6905_vm15 }
 0x3eb   :  { %v4924_v23 = vpop.permute.xlu0 %4923  ;;  %vm6907_vm12 = vmmov %vm6906_vm13 }
 0x3ec   :  { %2473 = vmatprep.subr.bf16.mxu1 %v4519_v52  ;;  %v1851_v24 = vsel %vm6905_vm15, %v4921_v20, %v5041_v18  ;;  %v1850_v25 = vsel %vm6906_vm13, %v4920_v21, %v5040_v22  ;;  %v1852_v27 = vsel %vm6907_vm12, %v5040_v22, %v4920_v21  ;;  %vm6908_vm14 = vmmov %vm6907_vm12  ;;  %v4926_v37 = vunpack.i.h.bf16 %v4924_v23 }
 0x3ed   :  { %2474 = vmatpush1.bf16.msra.mxu1 %v4518_v5  ;;  %v1853_v29 = vsel %vm6908_vm14, %v5041_v18, %v4921_v20  ;;  %v4502_v33 = vpack.c.bf16 %v1851_v24, %v1850_v25  ;;  %v5044_v35 = vpop.permute.xlu1 %5043  ;;  %v4925_v38 = vunpack.i.l.bf16 %v4924_v23  ;;  %vm6909_vm15 = vcmp.lt.s32.totalorder %v5566_v12, 119 }
 0x3ee   :  { %v4503_v36 = vpack.c.bf16 %v1853_v29, %v1852_v27  ;;  %v5046_v39 = vunpack.i.h.bf16 %v5044_v35  ;;  %v5045_v40 = vunpack.i.l.bf16 %v5044_v35  ;;  %vm6910_vm13 = vmmov %vm6909_vm15 }
 0x3ef   :  { %v4929_v30 = vpop.permute.xlu0 %4928  ;;  %vm6911_vm12 = vmmov %vm6910_vm13 }
 0x3f0   :  { %2446 = vmatprep.subr.bf16.mxu0 %v4503_v36  ;;  %v2033_v41 = vsel %vm6909_vm15, %v4926_v37, %v5046_v39  ;;  %v2032_v42 = vsel %vm6910_vm13, %v4925_v38, %v5045_v40  ;;  %v2034_v44 = vsel %vm6911_vm12, %v5045_v40, %v4925_v38  ;;  %vm6912_vm14 = vmmov %vm6911_vm12  ;;  %v4931_v19 = vunpack.i.h.bf16 %v4929_v30 }
 0x3f1   :  { %2447 = vmatpush2.bf16.msra.mxu0 %v4502_v33  ;;  %v2035_v45 = vsel %vm6912_vm14, %v5046_v39, %v4926_v37  ;;  %v4516_v47 = vpack.c.bf16 %v2033_v41, %v2032_v42  ;;  %v5049_v48 = vpop.permute.xlu1 %5048  ;;  %v4930_v57 = vunpack.i.l.bf16 %v4929_v30  ;;  %vm6913_vm15 = vcmp.lt.s32.totalorder %v5566_v12, 127 }
 0x3f2   :  { %v4517_v50 = vpack.c.bf16 %v2035_v45, %v2034_v44  ;;  %v5051_v7 = vunpack.i.h.bf16 %v5049_v48  ;;  %v5050_v10 = vunpack.i.l.bf16 %v5049_v48  ;;  %vm6914_vm13 = vmmov %vm6913_vm15 }
 0x3f3   :  { %v4934_v54 = vpop.permute.xlu0 %4933  ;;  %vm6915_vm12 = vmmov %vm6914_vm13 }
 0x3f4   :  { %2475 = vmatprep.subr.bf16.mxu1 %v4517_v50  ;;  %v1825_v6 = vsel %vm6913_vm15, %v4931_v19, %v5051_v7  ;;  %v1824_v60 = vsel %vm6914_vm13, %v4930_v57, %v5050_v10  ;;  %v1826_v63 = vsel %vm6915_vm12, %v5050_v10, %v4930_v57  ;;  %vm6916_vm14 = vmmov %vm6915_vm12  ;;  %v4936_v53 = vunpack.i.h.bf16 %v4934_v54 }
 0x3f5   :  { %2476 = vmatpush1.bf16.msra.mxu1 %v4516_v47  ;;  %v1827_v9 = vsel %vm6916_vm14, %v5051_v7, %v4931_v19  ;;  %v4500_v14 = vpack.c.bf16 %v1825_v6, %v1824_v60  ;;  %v5054_v0 = vpop.permute.xlu1 %5053  ;;  %v4935_v3 = vunpack.i.l.bf16 %v4934_v54  ;;  %vm4524_vm15 = vmpackc.low %vm6064_vm0, %vm6064_vm0 }
 0x3f6   :  { %v4501_v1 = vpack.c.bf16 %v1827_v9, %v1826_v63  ;;  %v5056_v4 = vunpack.i.h.bf16 %v5054_v0  ;;  %v5055_v5 = vunpack.i.l.bf16 %v5054_v0  ;;  %vm4527_vm0 = vmpackc.low %vm6049_vm6, %vm6049_vm6  ;;  %vm6917_vm6 = vcmp.lt.s32.totalorder %v5566_v12, 122 }
 0x3f7   :  { %v4939_v8 = vpop.permute.xlu0 %4938  ;;  %vm6918_vm13 = vmmov %vm6917_vm6 }
 0x3f8   :  { %2448 = vmatprep.subr.bf16.mxu0 %v4501_v1  ;;  %v2007_v52 = vsel %vm788_vm4, %v4936_v53, %v5056_v4  ;;  %v2006_v20 = vsel %vm788_vm4, %v4935_v3, %v5055_v5  ;;  %v2008_v21 = vsel %vm788_vm4, %v5055_v5, %v4935_v3  ;;  %v2009_v18 = vsel %vm788_vm4, %v5056_v4, %v4936_v53  ;;  %vm6919_vm12 = vmmov %vm6917_vm6 }
 0x3f9   :  { %2449 = vmatpush2.bf16.msra.mxu0 %v4500_v14  ;;  %v4514_v22 = vpack.c.bf16 %v2007_v52, %v2006_v20  ;;  %v5059_v23 = vpop.permute.xlu1 %5058  ;;  %v4515_v58 = vpack.c.bf16 %v2009_v18, %v2008_v21  ;;  %v4941_v24 = vunpack.i.h.bf16 %v4939_v8  ;;  %v4940_v25 = vunpack.i.l.bf16 %v4939_v8  ;;  %vm6920_vm14 = vmmov %vm6917_vm6 }
 0x3fa   :  { %4526 = vmatprep.subr.msk.bf16.mxu0 %vm4524_vm15, %v4525_v51  ;;  %v5061_v27 = vunpack.i.h.bf16 %v5059_v23  ;;  %v5060_v29 = vunpack.i.l.bf16 %v5059_v23  ;;  %vm6921_vm15 = vcmp.lt.s32.totalorder %v5566_v12, 2 }
 0x3fb   :  { %v4944_v33 = vpop.permute.xlu0 %4943  ;;  %2477 = vmatprep.subr.bf16.mxu1 %v4515_v58 }
 0x3fc   :  { %v1981_v35 = vsel %vm761_vm2, %v4941_v24, %v5061_v27  ;;  %v1980_v36 = vsel %vm761_vm2, %v4940_v25, %v5060_v29  ;;  %2478 = vmatpush1.bf16.msra.mxu1 %v4514_v22  ;;  %v1982_v43 = vsel %vm761_vm2, %v5060_v29, %v4940_v25  ;;  %v4946_v11 = vunpack.i.h.bf16 %v4944_v33 }
 0x3fd   :  { %4529 = vmatpush2.bf16.msk.msra.mxu0 %vm4527_vm0, %v4528_v59  ;;  %v4512_v13 = vpack.c.bf16 %v1981_v35, %v1980_v36  ;;  %v5064_v51 = vpop.permute.xlu1 %5063  ;;  %v1983_v37 = vsel %vm761_vm2, %v5061_v27, %v4941_v24  ;;  %v4945_v38 = vunpack.i.l.bf16 %v4944_v33  ;;  %vm6922_vm0 = vmmov %vm6921_vm15 }
 0x3fe   :  { %v5066_v39 = vunpack.i.h.bf16 %v5064_v51  ;;  %v5065_v40 = vunpack.i.l.bf16 %v5064_v51  ;;  %v4513_v41 = vpack.c.bf16 %v1983_v37, %v1982_v43 }
 0x3ff   :  { %v4949_v30 = vpop.permute.xlu0 %4948 }
 0x400   :  { %v1787_v42 = vsel %vm560_vm5, %v5066_v39, %v4946_v11  ;;  %v1786_v49 = vsel %vm560_vm5, %v5065_v40, %v4945_v38  ;;  %2479 = vmatprep.subr.bf16.mxu1 %v4513_v41  ;;  %v1784_v28 = vsel %vm560_vm5, %v4945_v38, %v5065_v40  ;;  %v1785_v59 = vsel %vm560_vm5, %v4946_v11, %v5066_v39 }
 0x401   :  { %v4496_v44 = vpack.c.bf16 %v1787_v42, %v1786_v49  ;;  %2480 = vmatpush1.bf16.msra.mxu1 %v4512_v13  ;;  %v5069_v45 = vpop.permute.xlu1 %5068  ;;  %v4497_v47 = vpack.c.bf16 %v1785_v59, %v1784_v28  ;;  %v4951_v48 = vunpack.i.h.bf16 %v4949_v30  ;;  %v4950_v50 = vunpack.i.l.bf16 %v4949_v30 }
 0x402   :  { %v5071_v19 = vunpack.i.h.bf16 %v5069_v45  ;;  %v5070_v57 = vunpack.i.l.bf16 %v5069_v45 }
 0x403   :  { %v4954_v7 = vpop.permute.xlu0 %4953  ;;  %2452 = vmatprep.subr.bf16.mxu0 %v4497_v47 }
 0x404   :  { %v1955_v10 = vsel %vm6917_vm6, %v4951_v48, %v5071_v19  ;;  %v1954_v54 = vsel %vm6918_vm13, %v4950_v50, %v5070_v57  ;;  %2453 = vmatpush2.bf16.msra.mxu0 %v4496_v44  ;;  %v1956_v6 = vsel %vm6919_vm12, %v5070_v57, %v4950_v50  ;;  %v1957_v60 = vsel %vm6920_vm14, %v5071_v19, %v4951_v48  ;;  %vm6923_vm6 = vmmov %vm6922_vm0 }
 0x405   :  { %v4510_v63 = vpack.c.bf16 %v1955_v10, %v1954_v54  ;;  %v5074_v9 = vpop.permute.xlu1 %5073  ;;  %v4511_v14 = vpack.c.bf16 %v1957_v60, %v1956_v6  ;;  %v4956_v0 = vunpack.i.h.bf16 %v4954_v7  ;;  %v4955_v1 = vunpack.i.l.bf16 %v4954_v7  ;;  %vm6924_vm13 = vmmov %vm6922_vm0 }
 0x406   :  { %v5076_v53 = vunpack.i.h.bf16 %v5074_v9  ;;  %v5075_v3 = vunpack.i.l.bf16 %v5074_v9  ;;  %vm6925_vm12 = vcmp.lt.s32.totalorder %v5566_v12, 123 }
 0x407   :  { %v4959_v4 = vpop.permute.xlu0 %4958  ;;  %2481 = vmatprep.subr.bf16.mxu1 %v4511_v14  ;;  %vm6926_vm14 = vmmov %vm6925_vm12 }
 0x408   :  { %v1761_v5 = vsel %vm6921_vm15, %v5076_v53, %v4956_v0  ;;  %v1760_v8 = vsel %vm6922_vm0, %v5075_v3, %v4955_v1  ;;  %2482 = vmatpush1.bf16.msra.mxu1 %v4510_v63  ;;  %v1758_v52 = vsel %vm6923_vm6, %v4955_v1, %v5075_v3  ;;  %v1759_v20 = vsel %vm6924_vm13, %v4956_v0, %v5076_v53  ;;  %vm6927_vm15 = vmmov %vm6925_vm12 }
 0x409   :  { %v4494_v21 = vpack.c.bf16 %v1761_v5, %v1760_v8  ;;  %v5079_v18 = vpop.permute.xlu1 %5078  ;;  %v4495_v22 = vpack.c.bf16 %v1759_v20, %v1758_v52  ;;  %v4961_v23 = vunpack.i.h.bf16 %v4959_v4  ;;  %v4960_v58 = vunpack.i.l.bf16 %v4959_v4  ;;  %vm6928_vm0 = vmmov %vm6925_vm12 }
 0x40a   :  { %v5081_v24 = vunpack.i.h.bf16 %v5079_v18  ;;  %v5080_v25 = vunpack.i.l.bf16 %v5079_v18  ;;  %vm6929_vm6 = vcmp.lt.s32.totalorder %v5566_v12, 3 }
 0x40b   :  { %v4964_v27 = vpop.permute.xlu0 %4963  ;;  %2454 = vmatprep.subr.bf16.mxu0 %v4495_v22  ;;  %vm6930_vm13 = vmmov %vm6929_vm6 }
 0x40c   :  { %v1929_v29 = vsel %vm6925_vm12, %v4961_v23, %v5081_v24  ;;  %v1928_v33 = vsel %vm6926_vm14, %v4960_v58, %v5080_v25  ;;  %2455 = vmatpush2.bf16.msra.mxu0 %v4494_v21  ;;  %v1930_v35 = vsel %vm6927_vm15, %v5080_v25, %v4960_v58  ;;  %v1931_v36 = vsel %vm6928_vm0, %v5081_v24, %v4961_v23  ;;  %vm6931_vm12 = vmmov %vm6929_vm6 }
 0x40d   :  { %v4508_v43 = vpack.c.bf16 %v1929_v29, %v1928_v33  ;;  %v5084_v13 = vpop.permute.xlu1 %5083  ;;  %v4509_v11 = vpack.c.bf16 %v1931_v36, %v1930_v35  ;;  %v4966_v51 = vunpack.i.h.bf16 %v4964_v27  ;;  %v4965_v37 = vunpack.i.l.bf16 %v4964_v27  ;;  %vm6932_vm14 = vmmov %vm6929_vm6  ;;  %v5428_v36 = vld [vmem:[%s6821_s1] ss:$16 sps:$4 sm:$0xff]  }
 0x40e   :  { %v5086_v38 = vunpack.i.h.bf16 %v5084_v13  ;;  %v5085_v39 = vunpack.i.l.bf16 %v5084_v13  ;;  %vm6933_vm15 = vcmp.lt.s32.totalorder %v5566_v12, 124  ;;  %v5430_v13 = vld [vmem:[%s6821_s1 + $0x8] ss:$16 sps:$4 sm:$0xff]  }
 0x40f   :  { %v4969_v40 = vpop.permute.xlu0 %4968  ;;  %2483 = vmatprep.subr.bf16.mxu1 %v4509_v11  ;;  %vm6934_vm0 = vmmov %vm6933_vm15 }
 0x410   :  { %v1735_v30 = vsel %vm6929_vm6, %v5086_v38, %v4966_v51  ;;  %v1734_v41 = vsel %vm6930_vm13, %v5085_v39, %v4965_v37  ;;  %2484 = vmatpush1.bf16.msra.mxu1 %v4508_v43  ;;  %v1732_v42 = vsel %vm6931_vm12, %v4965_v37, %v5085_v39  ;;  %v1733_v49 = vsel %vm6932_vm14, %v4966_v51, %v5086_v38  ;;  %vm6935_vm6 = vmmov %vm6934_vm0  ;;  %v5429_v43 = vld [vmem:[%s6821_s1 + $0xc] ss:$16 sps:$4 sm:$0xff]  }
 0x411   :  { %v4492_v28 = vpack.c.bf16 %v1735_v30, %v1734_v41  ;;  %v5089_v59 = vpop.permute.xlu1 %5088  ;;  %v4493_v44 = vpack.c.bf16 %v1733_v49, %v1732_v42  ;;  %v4971_v45 = vunpack.i.h.bf16 %v4969_v40  ;;  %v4970_v47 = vunpack.i.l.bf16 %v4969_v40  ;;  %vm6936_vm13 = vmmov %vm6934_vm0 }
 0x412   :  { %v5091_v48 = vunpack.i.h.bf16 %v5089_v59  ;;  %v5090_v50 = vunpack.i.l.bf16 %v5089_v59  ;;  %vm6937_vm12 = vcmp.lt.s32.totalorder %v5566_v12, 4 }
 0x413   :  { %v4974_v19 = vpop.permute.xlu0 %4973  ;;  %2456 = vmatprep.subr.bf16.mxu0 %v4493_v44  ;;  %vm6938_vm14 = vmmov %vm6937_vm12 }
 0x414   :  { %v1903_v57 = vsel %vm6933_vm15, %v4971_v45, %v5091_v48  ;;  %v1902_v7 = vsel %vm6934_vm0, %v4970_v47, %v5090_v50  ;;  %2457 = vmatpush2.bf16.msra.mxu0 %v4492_v28  ;;  %v1904_v10 = vsel %vm6935_vm6, %v5090_v50, %v4970_v47  ;;  %v1905_v54 = vsel %vm6936_vm13, %v5091_v48, %v4971_v45  ;;  %vm6939_vm15 = vmmov %vm6937_vm12 }
 0x415   :  { %v4506_v6 = vpack.c.bf16 %v1903_v57, %v1902_v7  ;;  %v5094_v60 = vpop.permute.xlu1 %5093  ;;  %v4507_v63 = vpack.c.bf16 %v1905_v54, %v1904_v10  ;;  %v4976_v9 = vunpack.i.h.bf16 %v4974_v19  ;;  %v4975_v14 = vunpack.i.l.bf16 %v4974_v19  ;;  %vm6940_vm0 = vmmov %vm6937_vm12 }
 0x416   :  { %v5096_v0 = vunpack.i.h.bf16 %v5094_v60  ;;  %v5095_v1 = vunpack.i.l.bf16 %v5094_v60  ;;  %vm6941_vm6 = vcmp.lt.s32.totalorder %v5566_v12, 116  ;;  %v5432_v60 = vld [vmem:[%s6824_s4 + $0x8] ss:$0 sps:$4 sm:$0x11]  }
 0x417   :  { %v4979_v53 = vpop.permute.xlu0 %4978  ;;  %2485 = vmatprep.subr.bf16.mxu1 %v4507_v63  ;;  %vm6942_vm13 = vmmov %vm6941_vm6  ;;  %v5433_v63 = vld [vmem:[%s6821_s1 + $0x4] ss:$16 sps:$4 sm:$0xff]  }
 0x418   :  { %v1709_v3 = vsel %vm6937_vm12, %v5096_v0, %v4976_v9  ;;  %v1708_v4 = vsel %vm6938_vm14, %v5095_v1, %v4975_v14  ;;  %2486 = vmatpush1.bf16.msra.mxu1 %v4506_v6  ;;  %v1706_v5 = vsel %vm6939_vm15, %v4975_v14, %v5095_v1  ;;  %v1707_v8 = vsel %vm6940_vm0, %v4976_v9, %v5096_v0  ;;  %vm6943_vm12 = vmmov %vm6941_vm6  ;;  %v5431_v6 = vld [vmem:[%s6824_s4] sm:$0xff]  }
 0x419   :  { %v4490_v52 = vpack.c.bf16 %v1709_v3, %v1708_v4  ;;  %v5099_v20 = vpop.permute.xlu1 %5098  ;;  %v4491_v21 = vpack.c.bf16 %v1707_v8, %v1706_v5  ;;  %v4981_v18 = vunpack.i.h.bf16 %v4979_v53  ;;  %v4980_v22 = vunpack.i.l.bf16 %v4979_v53  ;;  %vm6944_vm14 = vmmov %vm6941_vm6 }
 0x41a   :  { %v5101_v23 = vunpack.i.h.bf16 %v5099_v20  ;;  %v5100_v58 = vunpack.i.l.bf16 %v5099_v20  ;;  %vm6945_vm15 = vcmask 130048  }
 0x41b   :  { %2458 = vmatprep.subr.bf16.mxu0 %v4491_v21  ;;  %vm6946_vm0 = vmmov %vm6945_vm15  ;;  %v139_v3 = vpop.permute.xlu0 %138 }
 0x41c   :  { %v2111_v24 = vsel %vm6941_vm6, %v4981_v18, %v5101_v23  ;;  %v2110_v25 = vsel %vm6942_vm13, %v4980_v22, %v5100_v58  ;;  %2459 = vmatpush2.bf16.msra.mxu0 %v4490_v52  ;;  %v2112_v27 = vsel %vm6943_vm12, %v5100_v58, %v4980_v22  ;;  %v2113_v29 = vsel %vm6944_vm14, %v5101_v23, %v4981_v18  ;;  %vm6947_vm6 = vmmov %vm6946_vm0 }
 0x41d   :  { %v4522_v33 = vpack.c.bf16 %v2111_v24, %v2110_v25  ;;  %v4523_v35 = vpack.c.bf16 %v2113_v29, %v2112_v27  ;;  %v145_v1 = vpop.permute.xlu1 %144  ;;  %vm6948_vm13 = vcmp.lt.s32.totalorder %v5566_v12, 127 }
 0x41e   :  { %v151_v4 = vsel %vm6948_vm13, %v139_v3, %v145_v1  ;;  %vm6949_vm12 = vmmov %vm6948_vm13  ;;  %vm235_vm13 = vcmp.lt.s32.totalorder %v5570_v15, 62 }
 0x41f   :  { %2461 = vmatmul.mubr.bf16.vlgmr.msra.gmra.mxu0 %v5428_v36  ;;  %2501 = vmatprep.subr.bf16.mxu1 %v4523_v35  ;;  %v154_v52 = vsel %vm6949_vm12, %v145_v1, %v139_v3  ;;  %vm6950_vm14 = vmmov %vm6949_vm12 }
 0x420   :  { %2502 = vmatpush2.bf16.msra.mxu1 %v4522_v33  ;;  %4259 = vmatprep.mubr.msk.bf16.mxu0 %vm6945_vm15, %v5429_v43  ;;  %v135_v33 = vpop.permute.xlu0 %134  ;;  %vm6951_vm15 = vmmov %vm6949_vm12 }
 0x421   :  { %v137_v35 = vpop.permute.xlu1 %136 }
 0x423   :  { %2504 = vmatmul.mubr.bf16.vlgmr.msra.gmra.mxu1 %v5430_v13 }
 0x424   :  { %2552 = vmatprep.mubr.bf16.mxu1 %v5460_v2  ;;  %v141_v43 = vpop.permute.xlu0 %140 }
 0x425   :  { %v143_v13 = vpop.permute.xlu1 %142 }
 0x4df   :  { %v2462_v11 = vpop.f32.mrf.mxu0 }
 0x4e0   :  { %v2463_v42 = vadd.f32 %v2462_v11, %v5975_v17 }
 0x4e1   :  { %v2464_v51 = vpop.f32.mrf.mxu0 }
 0x4e2   :  { %v2465_v30 = vadd.f32 %v2464_v51, %v5975_v17 }
 0x4e3   :  { %v2466_v37 = vpop.f32.mrf.mxu0  ;;  %v2505_v38 = vpop.f32.mrf.mxu1 }
 0x4e4   :  { %v2467_v41 = vadd.f32 %v2466_v37, %v5973_v31  ;;  %v6373_v45 = vadd.f32 %v2505_v38, %v2463_v42 }
 0x4e5   :  { %v2468_v39 = vpop.f32.mrf.mxu0  ;;  %v2507_v40 = vpop.f32.mrf.mxu1 }
 0x4e6   :  { %v2469_v28 = vadd.f32 %v2468_v39, %v5973_v31  ;;  %v6369_v59 = vadd.f32 %v2507_v40, %v2465_v30  ;;  %v2514_v7 = vmax.f32 %v6373_v45, 0.0  ;;  %v149_v40 = vsel %vm6950_vm14, %v135_v33, %v141_v43  ;;  %vm6424_vm14 = vmand %vm225_vm1, %vm235_vm13 }
 0x4e7   :  { %v2509_v49 = vpop.f32.mrf.mxu1  ;;  %v150_v30 = vsel %vm6951_vm15, %v137_v35, %v143_v13 }
 0x4e8   :  { %v6371_v44 = vadd.f32 %v2509_v49, %v2467_v41  ;;  %v2515_v19 = vmax.f32 %v6369_v59, 0.0 }
 0x4e9   :  { %v2511_v47 = vpop.f32.mrf.mxu1 }
 0x4ea   :  { %v6375_v48 = vadd.f32 %v2511_v47, %v2469_v28  ;;  %v2516_v50 = vmax.f32 %v6371_v44, 0.0 }
 0x4ec   :  { %v2517_v57 = vmax.f32 %v6375_v48, 0.0  ;;  %v2518_v54 = vpack.c.bf16 %v2516_v50, %v2514_v7 }
 0x4ee   :  { %v2519_v10 = vpack.c.bf16 %v2517_v57, %v2515_v19 }
 0x4f0   :  { %2534 = vmatprep.subr.bf16.mxu1 %v2519_v10 }
 0x4f1   :  { %2535 = vmatpush1.bf16.msra.mxu1 %v2518_v54 }
 0x4f4   :  { %4151 = vmatmul.mubr.msk.bf16.vlgmr.msra.gmra.mxu1 %vm6946_vm0, %v5431_v6  ;;  %vm6952_vm0 = vmmov %vm6949_vm12  ;;  %vm236_vm12 = vcmp.lt.s32.totalorder %v5572_v16, 62 }
 0x4f5   :  { %2562 = vmatprep.mubr.bf16.mxu1 %v5460_v2  ;;  %v152_v47 = vsel %vm6952_vm0, %v141_v43, %v135_v33  ;;  %vm6439_vm15 = vmand %vm226_vm3, %vm236_vm12  ;;  %vm6970_vm12 = vcmp.lt.s32.totalorder %v5566_v12, 12 }
 0x4fc   :  { %4152 = vmatmul.mubr.msk.bf16.gmra.mxu1 %vm6947_vm6, %v5432_v60  ;;  %vm6953_vm6 = vmmov %vm6952_vm0 }
 0x4fd   :  { %3637 = vmatprep.mubr.bf16.mxu1 %v5433_v63  ;;  %v153_v10 = vsel %vm6953_vm6, %v143_v13, %v137_v35 }
 0x5b4   :  { %v2554_v9 = vpop.f32.mrf.mxu1 }
 0x5b6   :  { %v2556_v14 = vpop.f32.mrf.mxu1 }
 0x5b8   :  { %v2558_v0 = vpop.f32.mrf.mxu1 }
 0x5ba   :  { %v2560_v53 = vpop.f32.mrf.mxu1 }
 0x5bc   :  { %v2564_v5 = vpop.f32.mrf.mxu1 }
 0x5bd   :  { %v2571_v8 = vadd.f32 %v2564_v5, %v151_v4 }
 0x5be   :  { %v2566_v20 = vpop.f32.mrf.mxu1 }
 0x5bf   :  { %v4153_v21 = vmul.f32 -1.442695, %v2571_v8  ;;  %v2572_v18 = vadd.f32 %v2566_v20, %v154_v52 }
 0x5c0   :  { %v2568_v22 = vpop.f32.mrf.mxu1 }
 0x5c1   :  { %5376 = vpow2.f32 %v4153_v21  ;;  %v4154_v23 = vmul.f32 -1.442695, %v2572_v18 }
 0x5c2   :  { %v2569_v58 = vpop.f32.mrf.mxu1 }
 0x5c3   :  { %5378 = vpow2.f32 %v4154_v23 }
 0x5ce   :  { %v5377_v24 = vpop.eup %5376 }
 0x5cf   :  { %v2579_v25 = vadd.f32 1.0, %v5377_v24 }
 0x5d0   :  { %v5379_v27 = vpop.eup %5378 }
 0x5d1   :  { %5380 = vrcp.f32 %v2579_v25  ;;  %v2580_v29 = vadd.f32 1.0, %v5379_v27 }
 0x5d3   :  { %5382 = vrcp.f32 %v2580_v29 }
 0x5de   :  { %v5381_v36 = vpop.eup %5380 }
 0x5df   :  { %v2588_v11 = vrot.slane %v5381_v36, %v6018_v46  ;;  %v2629_v20 = vsub.f32 1.0, %v5381_v36  ;;  %v2646_v24 = vrot.slane %v5381_v36, %v6038_v26 }
 0x5e0   :  { %v5383_v51 = vpop.eup %5382 }
 0x5e1   :  { %v2593_v37 = vmul.f32 %v2588_v11, %v2554_v9  ;;  %v2595_v38 = vmul.f32 %v2588_v11, %v2558_v0  ;;  %v2592_v39 = vrot.slane %v5383_v51, %v6018_v46  ;;  %v2630_v21 = vsub.f32 1.0, %v5383_v51 }
 0x5e2   :  { %v2634_v18 = vrot.slane %v2629_v20, %v6038_v26 }
 0x5e3   :  { %v2597_v41 = vadd.f32 %v2593_v37, %v149_v40  ;;  %v2599_v42 = vadd.f32 %v2595_v38, %v150_v30  ;;  %v2594_v49 = vmul.f32 %v2592_v39, %v2556_v14  ;;  %v2596_v28 = vmul.f32 %v2592_v39, %v2560_v53 }
 0x5e4   :  { %v2638_v27 = vrot.slane %v2630_v21, %v6038_v26  ;;  %v2639_v33 = vmul.f32 %v2634_v18, %v2514_v7  ;;  %v2641_v36 = vmul.f32 %v2634_v18, %v2516_v50  ;;  %v2650_v38 = vrot.slane %v5383_v51, %v6038_v26 }
 0x5e5   :  { %v4155_v54 = vmul.f32 -1.442695, %v2597_v41  ;;  %v4157_v6 = vmul.f32 -1.442695, %v2599_v42  ;;  %v2598_v60 = vadd.f32 %v2594_v49, %v152_v47  ;;  %v2600_v63 = vadd.f32 %v2596_v28, %v153_v10 }
 0x5e6   :  { %v2640_v7 = vmul.f32 %v2638_v27, %v2515_v19  ;;  %v2642_v50 = vmul.f32 %v2638_v27, %v2517_v57 }
 0x5e7   :  { %5384 = vpow2.f32 %v4155_v54  ;;  %v4156_v9 = vmul.f32 -1.442695, %v2598_v60  ;;  %v4158_v0 = vmul.f32 -1.442695, %v2600_v63 }
 0x5e8   :  { %5386 = vpow2.f32 %v4157_v6 }
 0x5e9   :  { %5388 = vpow2.f32 %v4156_v9 }
 0x5ea   :  { %5390 = vpow2.f32 %v4158_v0 }
 0x5f4   :  { %v5385_v1 = vpop.eup %5384 }
 0x5f5   :  { %v5387_v3 = vpop.eup %5386  ;;  %v2613_v14 = vadd.f32 1.0, %v5385_v1 }
 0x5f6   :  { %v2615_v53 = vadd.f32 1.0, %v5387_v3  ;;  %v5389_v4 = vpop.eup %5388 }
 0x5f7   :  { %5392 = vrcp.f32 %v2613_v14  ;;  %v5391_v5 = vpop.eup %5390  ;;  %v2614_v8 = vadd.f32 1.0, %v5389_v4 }
 0x5f8   :  { %5394 = vrcp.f32 %v2615_v53  ;;  %v2616_v52 = vadd.f32 1.0, %v5391_v5 }
 0x5f9   :  { %5396 = vrcp.f32 %v2614_v8 }
 0x5fa   :  { %5398 = vrcp.f32 %v2616_v52 }
 0x604   :  { %v5393_v22 = vpop.eup %5392 }
 0x605   :  { %v5395_v23 = vpop.eup %5394  ;;  %v2625_v58 = vmul.f32 %v5393_v22, %v2597_v41 }
 0x606   :  { %v2627_v25 = vmul.f32 %v5395_v23, %v2599_v42  ;;  %v5397_v29 = vpop.eup %5396 }
 0x607   :  { %v2651_v35 = vmul.f32 %v2646_v24, %v2625_v58  ;;  %v5399_v43 = vpop.eup %5398  ;;  %v2626_v37 = vmul.f32 %v5397_v29, %v2598_v60 }
 0x608   :  { %v2653_v11 = vmul.f32 %v2646_v24, %v2627_v25  ;;  %v2628_v40 = vmul.f32 %v5399_v43, %v2600_v63 }
 0x609   :  { %v6431_v39 = vadd.f32 %v2651_v35, %v2639_v33  ;;  %v2652_v30 = vmul.f32 %v2650_v38, %v2626_v37 }
 0x60a   :  { %v6433_v45 = vadd.f32 %v2653_v11, %v2641_v36  ;;  %v2654_v51 = vmul.f32 %v2650_v38, %v2628_v40 }
 0x60b   :  { %v2663_v44 = vsel %vm6424_vm14, %v6431_v39, 0.0  ;;  %v6451_v19 = vadd.f32 %v2652_v30, %v2640_v7 }
 0x60c   :  { %v2665_v59 = vsel %vm6424_vm14, %v6433_v45, 0.0  ;;  %v4584_v42 = vpack.c.bf16 %v6433_v45, %v6431_v39  ;;  %v6455_v49 = vadd.f32 %v2654_v51, %v2642_v50 }
 0x60d   :  { %v5102_v28 = vpack.i.bf16 %v2665_v59, %v2663_v44  ;;  %v2664_v47 = vsel %vm6439_vm15, %v6451_v19, 0.0 }
 0x60e   :  { %v2666_v48 = vsel %vm6439_vm15, %v6455_v49, 0.0  ;;  %v4581_v10 = vpack.c.bf16 %v6455_v49, %v6451_v19 }
 0x60f   :  { %5103 = vrot.lane.b32.xlu0 %v5102_v28, %s5461_s0  ;;  %v5222_v57 = vpack.i.bf16 %v2666_v48, %v2664_v47 }
 0x611   :  { %5223 = vrot.lane.b32.xlu1 %v5222_v57, %s5461_s0  ;;  %s6958_s0 = smov 118  }
 0x613   :  { %5108 = vrot.lane.b32.xlu0 %v5102_v28, %s5462_s22 }
 0x615   :  { %5228 = vrot.lane.b32.xlu1 %v5222_v57, %s5462_s22  ;;  %s6959_s22 = smov 126  }
 0x617   :  { %5113 = vrot.lane.b32.xlu0 %v5102_v28, %s5463_s23 }
 0x619   :  { %5233 = vrot.lane.b32.xlu1 %v5222_v57, %s5463_s23  ;;  %s6960_s23 = smov 119  }
 0x61b   :  { %5118 = vrot.lane.b32.xlu0 %v5102_v28, %s5464_s24 }
 0x61d   :  { %5238 = vrot.lane.b32.xlu1 %v5222_v57, %s5464_s24  ;;  %s6961_s24 = smov 127  }
 0x61f   :  { %5123 = vrot.lane.b32.xlu0 %v5102_v28, %s5465_s25 }
 0x621   :  { %5243 = vrot.lane.b32.xlu1 %v5222_v57, %s5465_s25 }
 0x623   :  { %5128 = vrot.lane.b32.xlu0 %v5102_v28, %s5466_s26 }
 0x625   :  { %5248 = vrot.lane.b32.xlu1 %v5222_v57, %s5466_s26 }
 0x627   :  { %5133 = vrot.lane.b32.xlu0 %v5102_v28, %s5467_s27 }
 0x629   :  { %5253 = vrot.lane.b32.xlu1 %v5222_v57, %s5467_s27 }
 0x62b   :  { %5138 = vrot.lane.b32.xlu0 %v5102_v28, %s5468_s28 }
 0x62d   :  { %5258 = vrot.lane.b32.xlu1 %v5222_v57, %s5468_s28 }
 0x62f   :  { %5143 = vrot.lane.b32.xlu0 %v5102_v28, %s5469_s29 }
 0x631   :  { %5263 = vrot.lane.b32.xlu1 %v5222_v57, %s5469_s29 }
 0x633   :  { %5148 = vrot.lane.b32.xlu0 %v5102_v28, %s5470_s30 }
 0x635   :  { %5268 = vrot.lane.b32.xlu1 %v5222_v57, %s5470_s30 }
 0x637   :  { %5153 = vrot.lane.b32.xlu0 %v5102_v28, %s6958_s0 }
 0x639   :  { %5273 = vrot.lane.b32.xlu1 %v5222_v57, %s6958_s0 }
 0x63b   :  { %5158 = vrot.lane.b32.xlu0 %v5102_v28, %s6959_s22 }
 0x63d   :  { %5278 = vrot.lane.b32.xlu1 %v5222_v57, %s6959_s22 }
 0x63f   :  { %5163 = vrot.lane.b32.xlu0 %v5102_v28, %s6960_s23 }
 0x641   :  { %5283 = vrot.lane.b32.xlu1 %v5222_v57, %s6960_s23 }
 0x643   :  { %5168 = vrot.lane.b32.xlu0 %v5102_v28, %s6961_s24 }
 0x645   :  { %5288 = vrot.lane.b32.xlu1 %v5222_v57, %s6961_s24 }
 0x647   :  { %5173 = vrot.lane.b32.xlu0 %v5102_v28, %s6883_s17 }
 0x649   :  { %5293 = vrot.lane.b32.xlu1 %v5222_v57, %s6883_s17 }
 0x64b   :  { %5178 = vrot.lane.b32.xlu0 %v5102_v28, %s6884_s6 }
 0x64d   :  { %5298 = vrot.lane.b32.xlu1 %v5222_v57, %s6884_s6 }
 0x64f   :  { %5183 = vrot.lane.b32.xlu0 %v5102_v28, %s6885_s18 }
 0x651   :  { %5303 = vrot.lane.b32.xlu1 %v5222_v57, %s6885_s18 }
 0x653   :  { %5188 = vrot.lane.b32.xlu0 %v5102_v28, %s6886_s19 }
 0x655   :  { %5308 = vrot.lane.b32.xlu1 %v5222_v57, %s6886_s19 }
 0x657   :  { %5193 = vrot.lane.b32.xlu0 %v5102_v28, %s6887_s2 }
 0x659   :  { %5313 = vrot.lane.b32.xlu1 %v5222_v57, %s6887_s2 }
 0x65b   :  { %5198 = vrot.lane.b32.xlu0 %v5102_v28, %s6888_s5 }
 0x65d   :  { %5318 = vrot.lane.b32.xlu1 %v5222_v57, %s6888_s5 }
 0x65f   :  { %5203 = vrot.lane.b32.xlu0 %v5102_v28, %s6889_s14 }
 0x661   :  { %5323 = vrot.lane.b32.xlu1 %v5222_v57, %s6889_s14 }
 0x663   :  { %5208 = vrot.lane.b32.xlu0 %v5102_v28, %s6890_s15 }
 0x665   :  { %5328 = vrot.lane.b32.xlu1 %v5222_v57, %s6890_s15 }
 0x667   :  { %5213 = vrot.lane.b32.xlu0 %v5102_v28, %s6891_s16 }
 0x669   :  { %5333 = vrot.lane.b32.xlu1 %v5222_v57, %s6891_s16 }
 0x66b   :  { %5218 = vrot.lane.b32.xlu0 %v5102_v28, %s6892_s20 }
 0x66d   :  { %5338 = vrot.lane.b32.xlu1 %v5222_v57, %s6892_s20 }
 0x66f   :  { %159 = vrot.lane.b32.xlu0 %v6011_v32, %s6959_s22 }
 0x671   :  { %165 = vrot.lane.b32.xlu1 %v6013_v34, %s6959_s22 }
 0x673   :  { %155 = vrot.lane.b32.xlu0 %v6022_v55, %s6959_s22 }
 0x675   :  { %157 = vrot.lane.b32.xlu1 %v6025_v56, %s6959_s22 }
 0x677   :  { %161 = vrot.lane.b32.xlu0 %v6031_v61, %s6959_s22 }
 0x679   :  { %163 = vrot.lane.b32.xlu1 %v6034_v62, %s6959_s22 }
 0x681   :  { %v5104_v54 = vpop.permute.xlu0 %5103 }
 0x682   :  { %v5106_v60 = vunpack.i.h.bf16 %v5104_v54  ;;  %v5105_v63 = vunpack.i.l.bf16 %v5104_v54 }
 0x683   :  { %v5224_v6 = vpop.permute.xlu1 %5223 }
 0x684   :  { %v5226_v32 = vunpack.i.h.bf16 %v5224_v6  ;;  %v5225_v9 = vunpack.i.l.bf16 %v5224_v6 }
 0x685   :  { %v5109_v0 = vpop.permute.xlu0 %5108 }
 0x686   :  { %v2860_v34 = vsel %vm452_vm7, %v5226_v32, %v5106_v60  ;;  %v2859_v55 = vsel %vm452_vm7, %v5225_v9, %v5105_v63  ;;  %v2857_v56 = vsel %vm452_vm7, %v5105_v63, %v5225_v9  ;;  %v2858_v61 = vsel %vm452_vm7, %v5106_v60, %v5226_v32 }
 0x687   :  { %v4544_v62 = vpack.c.bf16 %v2860_v34, %v2859_v55  ;;  %v5229_v1 = vpop.permute.xlu1 %5228  ;;  %v4545_v3 = vpack.c.bf16 %v2858_v61, %v2857_v56  ;;  %v5111_v14 = vunpack.i.h.bf16 %v5109_v0  ;;  %v5110_v53 = vunpack.i.l.bf16 %v5109_v0 }
 0x688   :  { %v5231_v4 = vunpack.i.h.bf16 %v5229_v1  ;;  %v5230_v5 = vunpack.i.l.bf16 %v5229_v1  ;;  %vm6962_vm7 = vcmp.lt.s32.totalorder %v5566_v12, 10 }
 0x689   :  { %v5114_v8 = vpop.permute.xlu0 %5113  ;;  %3605 = vmatprep.subr.bf16.mxu1 %v4545_v3 }
 0x68a   :  { %v2834_v52 = vsel %vm425_vm8, %v5231_v4, %v5111_v14  ;;  %v2833_v20 = vsel %vm425_vm8, %v5230_v5, %v5110_v53  ;;  %3606 = vmatpush1.bf16.msra.mxu1 %v4544_v62  ;;  %v2831_v21 = vsel %vm425_vm8, %v5110_v53, %v5230_v5  ;;  %v2832_v18 = vsel %vm425_vm8, %v5111_v14, %v5231_v4  ;;  %vm6963_vm8 = vmmov %vm6962_vm7 }
 0x68b   :  { %v4542_v22 = vpack.c.bf16 %v2834_v52, %v2833_v20  ;;  %v5234_v23 = vpop.permute.xlu1 %5233  ;;  %v4543_v58 = vpack.c.bf16 %v2832_v18, %v2831_v21  ;;  %v5116_v24 = vunpack.i.h.bf16 %v5114_v8  ;;  %v5115_v25 = vunpack.i.l.bf16 %v5114_v8 }
 0x68c   :  { %v5236_v27 = vunpack.i.h.bf16 %v5234_v23  ;;  %v5235_v29 = vunpack.i.l.bf16 %v5234_v23 }
 0x68d   :  { %v5119_v33 = vpop.permute.xlu0 %5118  ;;  %3607 = vmatprep.subr.bf16.mxu1 %v4543_v58 }
 0x68e   :  { %v2808_v35 = vsel %vm398_vm9, %v5236_v27, %v5116_v24  ;;  %v2807_v43 = vsel %vm398_vm9, %v5235_v29, %v5115_v25  ;;  %3608 = vmatpush1.bf16.msra.mxu1 %v4542_v22  ;;  %v2805_v36 = vsel %vm398_vm9, %v5115_v25, %v5235_v29  ;;  %v2806_v11 = vsel %vm398_vm9, %v5116_v24, %v5236_v27  ;;  %vm6964_vm9 = vmmov %vm6962_vm7 }
 0x68f   :  { %v4540_v37 = vpack.c.bf16 %v2808_v35, %v2807_v43  ;;  %v5239_v38 = vpop.permute.xlu1 %5238  ;;  %v4541_v40 = vpack.c.bf16 %v2806_v11, %v2805_v36  ;;  %v5121_v7 = vunpack.i.h.bf16 %v5119_v33  ;;  %v5120_v30 = vunpack.i.l.bf16 %v5119_v33 }
 0x690   :  { %v5241_v44 = vunpack.i.h.bf16 %v5239_v38  ;;  %v5240_v50 = vunpack.i.l.bf16 %v5239_v38 }
 0x691   :  { %v5124_v51 = vpop.permute.xlu0 %5123  ;;  %3609 = vmatprep.subr.bf16.mxu1 %v4541_v40 }
 0x692   :  { %v2782_v59 = vsel %vm371_vm10, %v5241_v44, %v5121_v7  ;;  %v2781_v28 = vsel %vm371_vm10, %v5240_v50, %v5120_v30  ;;  %3610 = vmatpush1.bf16.msra.mxu1 %v4540_v37  ;;  %v2779_v47 = vsel %vm371_vm10, %v5120_v30, %v5240_v50  ;;  %v2780_v48 = vsel %vm371_vm10, %v5121_v7, %v5241_v44  ;;  %vm6965_vm10 = vmmov %vm6962_vm7 }
 0x693   :  { %v4538_v57 = vpack.c.bf16 %v2782_v59, %v2781_v28  ;;  %v5244_v54 = vpop.permute.xlu1 %5243  ;;  %v4539_v6 = vpack.c.bf16 %v2780_v48, %v2779_v47  ;;  %v5126_v60 = vunpack.i.h.bf16 %v5124_v51  ;;  %v5125_v63 = vunpack.i.l.bf16 %v5124_v51 }
 0x694   :  { %v5246_v32 = vunpack.i.h.bf16 %v5244_v54  ;;  %v5245_v9 = vunpack.i.l.bf16 %v5244_v54 }
 0x695   :  { %v5129_v0 = vpop.permute.xlu0 %5128  ;;  %3611 = vmatprep.subr.bf16.mxu1 %v4539_v6 }
 0x696   :  { %v2756_v34 = vsel %vm344_vm11, %v5246_v32, %v5126_v60  ;;  %v2755_v55 = vsel %vm344_vm11, %v5245_v9, %v5125_v63  ;;  %3612 = vmatpush1.bf16.msra.mxu1 %v4538_v57  ;;  %v2753_v56 = vsel %vm344_vm11, %v5125_v63, %v5245_v9  ;;  %v2754_v61 = vsel %vm344_vm11, %v5126_v60, %v5246_v32 }
 0x697   :  { %v4536_v62 = vpack.c.bf16 %v2756_v34, %v2755_v55  ;;  %v5249_v1 = vpop.permute.xlu1 %5248  ;;  %v4537_v3 = vpack.c.bf16 %v2754_v61, %v2753_v56  ;;  %v5131_v14 = vunpack.i.h.bf16 %v5129_v0  ;;  %v5130_v53 = vunpack.i.l.bf16 %v5129_v0 }
 0x698   :  { %v5251_v4 = vunpack.i.h.bf16 %v5249_v1  ;;  %v5250_v5 = vunpack.i.l.bf16 %v5249_v1  ;;  %vm6966_vm11 = vcmp.lt.s32.totalorder %v5566_v12, 11 }
 0x699   :  { %v5134_v8 = vpop.permute.xlu0 %5133  ;;  %3613 = vmatprep.subr.bf16.mxu1 %v4537_v3  ;;  %vm6967_vm0 = vmmov %vm6966_vm11 }
 0x69a   :  { %v2730_v52 = vsel %vm6962_vm7, %v5251_v4, %v5131_v14  ;;  %v2729_v20 = vsel %vm6963_vm8, %v5250_v5, %v5130_v53  ;;  %3614 = vmatpush1.bf16.msra.mxu1 %v4536_v62  ;;  %v2727_v21 = vsel %vm6964_vm9, %v5130_v53, %v5250_v5  ;;  %v2728_v18 = vsel %vm6965_vm10, %v5131_v14, %v5251_v4  ;;  %vm6968_vm6 = vmmov %vm6967_vm0 }
 0x69b   :  { %v4534_v22 = vpack.c.bf16 %v2730_v52, %v2729_v20  ;;  %v5254_v23 = vpop.permute.xlu1 %5253  ;;  %v4535_v58 = vpack.c.bf16 %v2728_v18, %v2727_v21  ;;  %v5136_v24 = vunpack.i.h.bf16 %v5134_v8  ;;  %v5135_v25 = vunpack.i.l.bf16 %v5134_v8  ;;  %vm6969_vm13 = vmmov %vm6967_vm0 }
 0x69c   :  { %v5256_v27 = vunpack.i.h.bf16 %v5254_v23  ;;  %v5255_v29 = vunpack.i.l.bf16 %v5254_v23  ;;  %vm6971_vm7 = vmmov %vm6970_vm12  ;;  %vm6974_vm10 = vcmp.lt.s32.totalorder %v5566_v12, 117 }
 0x69d   :  { %v5139_v33 = vpop.permute.xlu0 %5138  ;;  %3615 = vmatprep.subr.bf16.mxu1 %v4535_v58  ;;  %vm6972_vm8 = vmmov %vm6971_vm7 }
 0x69e   :  { %v2704_v35 = vsel %vm6966_vm11, %v5256_v27, %v5136_v24  ;;  %v2703_v43 = vsel %vm6967_vm0, %v5255_v29, %v5135_v25  ;;  %3616 = vmatpush1.bf16.msra.mxu1 %v4534_v22  ;;  %v2701_v36 = vsel %vm6968_vm6, %v5135_v25, %v5255_v29  ;;  %v2702_v11 = vsel %vm6969_vm13, %v5136_v24, %v5256_v27  ;;  %vm6973_vm9 = vmmov %vm6971_vm7 }
 0x69f   :  { %v4532_v37 = vpack.c.bf16 %v2704_v35, %v2703_v43  ;;  %v5259_v38 = vpop.permute.xlu1 %5258  ;;  %v4533_v40 = vpack.c.bf16 %v2702_v11, %v2701_v36  ;;  %v5141_v7 = vunpack.i.h.bf16 %v5139_v33  ;;  %v5140_v30 = vunpack.i.l.bf16 %v5139_v33  ;;  %vm6975_vm11 = vmmov %vm6974_vm10 }
 0x6a0   :  { %v5261_v44 = vunpack.i.h.bf16 %v5259_v38  ;;  %v5260_v50 = vunpack.i.l.bf16 %v5259_v38  ;;  %vm6976_vm0 = vmmov %vm6974_vm10  ;;  %vm6978_vm13 = vcmp.lt.s32.totalorder %v5566_v12, 125 }
 0x6a1   :  { %v5144_v51 = vpop.permute.xlu0 %5143  ;;  %3617 = vmatprep.subr.bf16.mxu1 %v4533_v40  ;;  %vm6977_vm6 = vmmov %vm6976_vm0 }
 0x6a2   :  { %v2678_v59 = vsel %vm6970_vm12, %v5261_v44, %v5141_v7  ;;  %v2677_v28 = vsel %vm6971_vm7, %v5260_v50, %v5140_v30  ;;  %3618 = vmatpush1.bf16.msra.mxu1 %v4532_v37  ;;  %v2675_v47 = vsel %vm6972_vm8, %v5140_v30, %v5260_v50  ;;  %v2676_v48 = vsel %vm6973_vm9, %v5141_v7, %v5261_v44  ;;  %vm6979_vm12 = vmmov %vm6978_vm13 }
 0x6a3   :  { %v4530_v57 = vpack.c.bf16 %v2678_v59, %v2677_v28  ;;  %v5264_v54 = vpop.permute.xlu1 %5263  ;;  %v4531_v6 = vpack.c.bf16 %v2676_v48, %v2675_v47  ;;  %v5146_v60 = vunpack.i.h.bf16 %v5144_v51  ;;  %v5145_v63 = vunpack.i.l.bf16 %v5144_v51  ;;  %vm6980_vm7 = vmmov %vm6979_vm12 }
 0x6a4   :  { %v5266_v32 = vunpack.i.h.bf16 %v5264_v54  ;;  %v5265_v9 = vunpack.i.l.bf16 %v5264_v54  ;;  %vm6981_vm8 = vmmov %vm6980_vm7  ;;  %vm6982_vm9 = vcmp.lt.s32.totalorder %v5566_v12, 118 }
 0x6a5   :  { %v5149_v0 = vpop.permute.xlu0 %5148  ;;  %3619 = vmatprep.subr.bf16.mxu1 %v4531_v6 }
 0x6a6   :  { %v3262_v34 = vsel %vm6974_vm10, %v5146_v60, %v5266_v32  ;;  %v3261_v55 = vsel %vm6975_vm11, %v5145_v63, %v5265_v9  ;;  %3620 = vmatpush1.bf16.msra.mxu1 %v4530_v57  ;;  %v3263_v56 = vsel %vm6976_vm0, %v5265_v9, %v5145_v63  ;;  %v3264_v61 = vsel %vm6977_vm6, %v5266_v32, %v5146_v60  ;;  %vm6983_vm10 = vmmov %vm6982_vm9 }
 0x6a7   :  { %v4576_v62 = vpack.c.bf16 %v3262_v34, %v3261_v55  ;;  %v5269_v1 = vpop.permute.xlu1 %5268  ;;  %v4577_v3 = vpack.c.bf16 %v3264_v61, %v3263_v56  ;;  %v5151_v14 = vunpack.i.h.bf16 %v5149_v0  ;;  %v5150_v53 = vunpack.i.l.bf16 %v5149_v0  ;;  %vm6984_vm11 = vmmov %vm6982_vm9 }
 0x6a8   :  { %v5271_v4 = vunpack.i.h.bf16 %v5269_v1  ;;  %v5270_v5 = vunpack.i.l.bf16 %v5269_v1  ;;  %vm6985_vm0 = vmmov %vm6982_vm9  ;;  %vm6986_vm6 = vcmp.lt.s32.totalorder %v5566_v12, 126 }
 0x6a9   :  { %v5154_v8 = vpop.permute.xlu0 %5153  ;;  %3648 = vmatprep.subr.bf16.mxu0 %v4577_v3 }
 0x6aa   :  { %v3054_v52 = vsel %vm6978_vm13, %v5151_v14, %v5271_v4  ;;  %v3053_v20 = vsel %vm6979_vm12, %v5150_v53, %v5270_v5  ;;  %3649 = vmatpush1.bf16.msra.mxu0 %v4576_v62  ;;  %v3055_v21 = vsel %vm6980_vm7, %v5270_v5, %v5150_v53  ;;  %v3056_v18 = vsel %vm6981_vm8, %v5271_v4, %v5151_v14  ;;  %vm6987_vm13 = vmmov %vm6986_vm6 }
 0x6ab   :  { %v4560_v22 = vpack.c.bf16 %v3054_v52, %v3053_v20  ;;  %v5274_v23 = vpop.permute.xlu1 %5273  ;;  %v4561_v58 = vpack.c.bf16 %v3056_v18, %v3055_v21  ;;  %v5156_v24 = vunpack.i.h.bf16 %v5154_v8  ;;  %v5155_v25 = vunpack.i.l.bf16 %v5154_v8  ;;  %vm6988_vm12 = vmmov %vm6986_vm6 }
 0x6ac   :  { %v5276_v27 = vunpack.i.h.bf16 %v5274_v23  ;;  %v5275_v29 = vunpack.i.l.bf16 %v5274_v23  ;;  %vm6989_vm7 = vmmov %vm6986_vm6  ;;  %vm6990_vm8 = vcmp.lt.s32.totalorder %v5566_v12, 119 }
 0x6ad   :  { %v5159_v33 = vpop.permute.xlu0 %5158  ;;  %3621 = vmatprep.subr.bf16.mxu1 %v4561_v58 }
 0x6ae   :  { %v3236_v35 = vsel %vm6982_vm9, %v5156_v24, %v5276_v27  ;;  %v3235_v43 = vsel %vm6983_vm10, %v5155_v25, %v5275_v29  ;;  %3622 = vmatpush2.bf16.msra.mxu1 %v4560_v22  ;;  %v3237_v36 = vsel %vm6984_vm11, %v5275_v29, %v5155_v25  ;;  %v3238_v11 = vsel %vm6985_vm0, %v5276_v27, %v5156_v24  ;;  %vm6991_vm9 = vmmov %vm6990_vm8 }
 0x6af   :  { %v4574_v37 = vpack.c.bf16 %v3236_v35, %v3235_v43  ;;  %v5279_v38 = vpop.permute.xlu1 %5278  ;;  %v4575_v40 = vpack.c.bf16 %v3238_v11, %v3237_v36  ;;  %v5161_v7 = vunpack.i.h.bf16 %v5159_v33  ;;  %v5160_v30 = vunpack.i.l.bf16 %v5159_v33  ;;  %vm6992_vm10 = vmmov %vm6990_vm8 }
 0x6b0   :  { %v5281_v44 = vunpack.i.h.bf16 %v5279_v38  ;;  %v5280_v50 = vunpack.i.l.bf16 %v5279_v38  ;;  %vm6993_vm11 = vmmov %vm6990_vm8  ;;  %vm6994_vm0 = vcmp.lt.s32.totalorder %v5566_v12, 127 }
 0x6b1   :  { %v5164_v51 = vpop.permute.xlu0 %5163  ;;  %3650 = vmatprep.subr.bf16.mxu0 %v4575_v40 }
 0x6b2   :  { %v3028_v59 = vsel %vm6986_vm6, %v5161_v7, %v5281_v44  ;;  %v3027_v28 = vsel %vm6987_vm13, %v5160_v30, %v5280_v50  ;;  %3651 = vmatpush1.bf16.msra.mxu0 %v4574_v37  ;;  %v3029_v47 = vsel %vm6988_vm12, %v5280_v50, %v5160_v30  ;;  %v3030_v48 = vsel %vm6989_vm7, %v5281_v44, %v5161_v7  ;;  %vm6995_vm6 = vmmov %vm6994_vm0 }
 0x6b3   :  { %v4558_v57 = vpack.c.bf16 %v3028_v59, %v3027_v28  ;;  %v5284_v54 = vpop.permute.xlu1 %5283  ;;  %v4559_v6 = vpack.c.bf16 %v3030_v48, %v3029_v47  ;;  %v5166_v60 = vunpack.i.h.bf16 %v5164_v51  ;;  %v5165_v63 = vunpack.i.l.bf16 %v5164_v51  ;;  %vm6996_vm13 = vmmov %vm6994_vm0 }
 0x6b4   :  { %v5286_v32 = vunpack.i.h.bf16 %v5284_v54  ;;  %v5285_v9 = vunpack.i.l.bf16 %v5284_v54  ;;  %vm6997_vm12 = vmmov %vm6994_vm0 }
 0x6b5   :  { %v5169_v0 = vpop.permute.xlu0 %5168  ;;  %3623 = vmatprep.subr.bf16.mxu1 %v4559_v6  ;;  %vm4580_vm7 = vmpackc.low %vm6439_vm15, %vm6439_vm15 }
 0x6b6   :  { %v3210_v34 = vsel %vm6990_vm8, %v5166_v60, %v5286_v32  ;;  %v3209_v55 = vsel %vm6991_vm9, %v5165_v63, %v5285_v9  ;;  %3624 = vmatpush2.bf16.msra.mxu1 %v4558_v57  ;;  %v3211_v56 = vsel %vm6992_vm10, %v5285_v9, %v5165_v63  ;;  %v3212_v61 = vsel %vm6993_vm11, %v5286_v32, %v5166_v60  ;;  %vm4583_vm15 = vmpackc.low %vm6424_vm14, %vm6424_vm14 }
 0x6b7   :  { %v4572_v62 = vpack.c.bf16 %v3210_v34, %v3209_v55  ;;  %v5289_v1 = vpop.permute.xlu1 %5288  ;;  %v4573_v3 = vpack.c.bf16 %v3212_v61, %v3211_v56  ;;  %v5171_v14 = vunpack.i.h.bf16 %v5169_v0  ;;  %v5170_v53 = vunpack.i.l.bf16 %v5169_v0 }
 0x6b8   :  { %v5291_v4 = vunpack.i.h.bf16 %v5289_v1  ;;  %v5290_v5 = vunpack.i.l.bf16 %v5289_v1  ;;  %vm7002_vm8 = vcmp.lt.s32.totalorder %v5566_v12, 2 }
 0x6b9   :  { %v5174_v8 = vpop.permute.xlu0 %5173  ;;  %3652 = vmatprep.subr.bf16.mxu0 %v4573_v3  ;;  %vm7003_vm9 = vmmov %vm7002_vm8 }
 0x6ba   :  { %v3002_v52 = vsel %vm6994_vm0, %v5171_v14, %v5291_v4  ;;  %v3001_v20 = vsel %vm6995_vm6, %v5170_v53, %v5290_v5  ;;  %3653 = vmatpush1.bf16.msra.mxu0 %v4572_v62  ;;  %v3003_v21 = vsel %vm6996_vm13, %v5290_v5, %v5170_v53  ;;  %v3004_v18 = vsel %vm6997_vm12, %v5291_v4, %v5171_v14  ;;  %vm7004_vm10 = vmmov %vm7002_vm8 }
 0x6bb   :  { %v4556_v22 = vpack.c.bf16 %v3002_v52, %v3001_v20  ;;  %v5294_v23 = vpop.permute.xlu1 %5293  ;;  %v4557_v58 = vpack.c.bf16 %v3004_v18, %v3003_v21  ;;  %v5176_v24 = vunpack.i.h.bf16 %v5174_v8  ;;  %v5175_v25 = vunpack.i.l.bf16 %v5174_v8  ;;  %vm7005_vm11 = vmmov %vm7002_vm8 }
 0x6bc   :  { %v5296_v27 = vunpack.i.h.bf16 %v5294_v23  ;;  %v5295_v29 = vunpack.i.l.bf16 %v5294_v23  ;;  %vm7006_vm0 = vcmp.lt.s32.totalorder %v5566_v12, 123 }
 0x6bd   :  { %v5179_v33 = vpop.permute.xlu0 %5178  ;;  %3625 = vmatprep.subr.bf16.mxu1 %v4557_v58  ;;  %vm7007_vm6 = vmmov %vm7006_vm0 }
 0x6be   :  { %v3184_v35 = vsel %vm788_vm4, %v5176_v24, %v5296_v27  ;;  %v3183_v43 = vsel %vm788_vm4, %v5175_v25, %v5295_v29  ;;  %3626 = vmatpush2.bf16.msra.mxu1 %v4556_v22  ;;  %v3185_v36 = vsel %vm788_vm4, %v5295_v29, %v5175_v25  ;;  %v3186_v11 = vsel %vm788_vm4, %v5296_v27, %v5176_v24  ;;  %vm7008_vm13 = vmmov %vm7006_vm0 }
 0x6bf   :  { %v4570_v37 = vpack.c.bf16 %v3184_v35, %v3183_v43  ;;  %v5299_v38 = vpop.permute.xlu1 %5298  ;;  %4582 = vmatprep.subr.msk.bf16.mxu1 %vm4580_vm7, %v4581_v10  ;;  %v4571_v41 = vpack.c.bf16 %v3186_v11, %v3185_v36  ;;  %v5181_v40 = vunpack.i.h.bf16 %v5179_v33  ;;  %v5180_v7 = vunpack.i.l.bf16 %v5179_v33  ;;  %vm7009_vm12 = vmmov %vm7006_vm0 }
 0x6c0   :  { %v5301_v30 = vunpack.i.h.bf16 %v5299_v38  ;;  %v5300_v44 = vunpack.i.l.bf16 %v5299_v38  ;;  %vm7010_vm7 = vcmp.lt.s32.totalorder %v5566_v12, 3 }
 0x6c1   :  { %v5184_v50 = vpop.permute.xlu0 %5183  ;;  %3654 = vmatprep.subr.bf16.mxu0 %v4571_v41 }
 0x6c2   :  { %v3158_v51 = vsel %vm761_vm2, %v5181_v40, %v5301_v30  ;;  %v3157_v59 = vsel %vm761_vm2, %v5180_v7, %v5300_v44  ;;  %4585 = vmatpush2.bf16.msk.msra.mxu1 %vm4583_vm15, %v4584_v42  ;;  %3655 = vmatpush1.bf16.msra.mxu0 %v4570_v37  ;;  %v3159_v13 = vsel %vm761_vm2, %v5300_v44, %v5180_v7  ;;  %v5186_v49 = vunpack.i.h.bf16 %v5184_v50  ;;  %vm7011_vm15 = vmmov %vm7010_vm7 }
 0x6c3   :  { %v4568_v19 = vpack.c.bf16 %v3158_v51, %v3157_v59  ;;  %v5304_v10 = vpop.permute.xlu1 %5303  ;;  %v3160_v28 = vsel %vm761_vm2, %v5301_v30, %v5181_v40  ;;  %v5185_v47 = vunpack.i.l.bf16 %v5184_v50  ;;  %vm6998_vm2 = vcmp.lt.s32.totalorder %v5566_v12, 122 }
 0x6c4   :  { %v5306_v48 = vunpack.i.h.bf16 %v5304_v10  ;;  %v5305_v57 = vunpack.i.l.bf16 %v5304_v10  ;;  %v4569_v6 = vpack.c.bf16 %v3160_v28, %v3159_v13  ;;  %vm6999_vm4 = vmmov %vm6998_vm2 }
 0x6c5   :  { %v5189_v54 = vpop.permute.xlu0 %5188  ;;  %vm7000_vm14 = vmmov %vm6998_vm2 }
 0x6c6   :  { %v2964_v60 = vsel %vm560_vm5, %v5306_v48, %v5186_v49  ;;  %v2963_v39 = vsel %vm560_vm5, %v5305_v57, %v5185_v47  ;;  %3656 = vmatprep.subr.bf16.mxu0 %v4569_v6  ;;  %v2961_v45 = vsel %vm560_vm5, %v5185_v47, %v5305_v57  ;;  %v2962_v42 = vsel %vm560_vm5, %v5186_v49, %v5306_v48  ;;  %vm7001_vm5 = vmmov %vm6998_vm2 }
 0x6c7   :  { %v4552_v63 = vpack.c.bf16 %v2964_v60, %v2963_v39  ;;  %3657 = vmatpush1.bf16.msra.mxu0 %v4568_v19  ;;  %v5309_v32 = vpop.permute.xlu1 %5308  ;;  %v4553_v9 = vpack.c.bf16 %v2962_v42, %v2961_v45  ;;  %v5191_v0 = vunpack.i.h.bf16 %v5189_v54  ;;  %v5190_v34 = vunpack.i.l.bf16 %v5189_v54 }
 0x6c8   :  { %v5311_v55 = vunpack.i.h.bf16 %v5309_v32  ;;  %v5310_v56 = vunpack.i.l.bf16 %v5309_v32 }
 0x6c9   :  { %v5194_v61 = vpop.permute.xlu0 %5193  ;;  %3629 = vmatprep.subr.bf16.mxu1 %v4553_v9 }
 0x6ca   :  { %v3132_v62 = vsel %vm6998_vm2, %v5191_v0, %v5311_v55  ;;  %v3131_v1 = vsel %vm6999_vm4, %v5190_v34, %v5310_v56  ;;  %3630 = vmatpush2.bf16.msra.mxu1 %v4552_v63  ;;  %v3133_v3 = vsel %vm7000_vm14, %v5310_v56, %v5190_v34  ;;  %v3134_v14 = vsel %vm7001_vm5, %v5311_v55, %v5191_v0  ;;  %vm7012_vm2 = vmmov %vm7010_vm7 }
 0x6cb   :  { %v4566_v53 = vpack.c.bf16 %v3132_v62, %v3131_v1  ;;  %v5314_v4 = vpop.permute.xlu1 %5313  ;;  %v4567_v5 = vpack.c.bf16 %v3134_v14, %v3133_v3  ;;  %v5196_v8 = vunpack.i.h.bf16 %v5194_v61  ;;  %v5195_v52 = vunpack.i.l.bf16 %v5194_v61  ;;  %vm7013_vm4 = vmmov %vm7012_vm2 }
 0x6cc   :  { %v5316_v20 = vunpack.i.h.bf16 %v5314_v4  ;;  %v5315_v21 = vunpack.i.l.bf16 %v5314_v4  ;;  %vm7014_vm14 = vcmp.lt.s32.totalorder %v5566_v12, 124 }
 0x6cd   :  { %v5199_v18 = vpop.permute.xlu0 %5198  ;;  %3658 = vmatprep.subr.bf16.mxu0 %v4567_v5  ;;  %vm7015_vm5 = vmmov %vm7014_vm14 }
 0x6ce   :  { %v2938_v22 = vsel %vm7002_vm8, %v5316_v20, %v5196_v8  ;;  %v2937_v23 = vsel %vm7003_vm9, %v5315_v21, %v5195_v52  ;;  %3659 = vmatpush1.bf16.msra.mxu0 %v4566_v53  ;;  %v2935_v58 = vsel %vm7004_vm10, %v5195_v52, %v5315_v21  ;;  %v2936_v24 = vsel %vm7005_vm11, %v5196_v8, %v5316_v20  ;;  %vm7016_vm8 = vmmov %vm7015_vm5 }
 0x6cf   :  { %v4550_v25 = vpack.c.bf16 %v2938_v22, %v2937_v23  ;;  %v5319_v27 = vpop.permute.xlu1 %5318  ;;  %v4551_v29 = vpack.c.bf16 %v2936_v24, %v2935_v58  ;;  %v5201_v33 = vunpack.i.h.bf16 %v5199_v18  ;;  %v5200_v35 = vunpack.i.l.bf16 %v5199_v18  ;;  %vm7017_vm9 = vmmov %vm7015_vm5 }
 0x6d0   :  { %v5321_v43 = vunpack.i.h.bf16 %v5319_v27  ;;  %v5320_v36 = vunpack.i.l.bf16 %v5319_v27  ;;  %vm7018_vm10 = vcmp.lt.s32.totalorder %v5566_v12, 4 }
 0x6d1   :  { %v5204_v11 = vpop.permute.xlu0 %5203  ;;  %3631 = vmatprep.subr.bf16.mxu1 %v4551_v29  ;;  %vm7019_vm11 = vmmov %vm7018_vm10 }
 0x6d2   :  { %v3106_v37 = vsel %vm7006_vm0, %v5201_v33, %v5321_v43  ;;  %v3105_v38 = vsel %vm7007_vm6, %v5200_v35, %v5320_v36  ;;  %3632 = vmatpush2.bf16.msra.mxu1 %v4550_v25  ;;  %v3107_v41 = vsel %vm7008_vm13, %v5320_v36, %v5200_v35  ;;  %v3108_v40 = vsel %vm7009_vm12, %v5321_v43, %v5201_v33  ;;  %vm7020_vm0 = vmmov %vm7018_vm10  ;;  %v5434_v43 = vld [vmem:[%s6821_s1] ss:$16 sps:$4 sm:$0xff]   ;;  %v5435_v36 = vld [vmem:[%s6821_s1 + $0x8] ss:$16 sps:$4 sm:$0xff]  }
 0x6d3   :  { %v4564_v7 = vpack.c.bf16 %v3106_v37, %v3105_v38  ;;  %v5324_v30 = vpop.permute.xlu1 %5323  ;;  %v4565_v44 = vpack.c.bf16 %v3108_v40, %v3107_v41  ;;  %v5206_v50 = vunpack.i.h.bf16 %v5204_v11  ;;  %v5205_v51 = vunpack.i.l.bf16 %v5204_v11  ;;  %vm7021_vm6 = vmmov %vm7020_vm0 }
 0x6d4   :  { %v5326_v59 = vunpack.i.h.bf16 %v5324_v30  ;;  %v5325_v13 = vunpack.i.l.bf16 %v5324_v30  ;;  %vm7022_vm13 = vcmp.lt.s32.totalorder %v5566_v12, 116 }
 0x6d5   :  { %v5209_v19 = vpop.permute.xlu0 %5208  ;;  %3660 = vmatprep.subr.bf16.mxu0 %v4565_v44  ;;  %vm7023_vm12 = vmmov %vm7022_vm13 }
 0x6d6   :  { %v2912_v49 = vsel %vm7010_vm7, %v5326_v59, %v5206_v50  ;;  %v2911_v10 = vsel %vm7011_vm15, %v5325_v13, %v5205_v51  ;;  %3661 = vmatpush1.bf16.msra.mxu0 %v4564_v7  ;;  %v2909_v28 = vsel %vm7012_vm2, %v5205_v51, %v5325_v13  ;;  %v2910_v47 = vsel %vm7013_vm4, %v5206_v50, %v5326_v59  ;;  %vm7024_vm7 = vmmov %vm7023_vm12 }
 0x6d7   :  { %v4548_v48 = vpack.c.bf16 %v2912_v49, %v2911_v10  ;;  %v5329_v57 = vpop.permute.xlu1 %5328  ;;  %v4549_v54 = vpack.c.bf16 %v2910_v47, %v2909_v28  ;;  %v5211_v6 = vunpack.i.h.bf16 %v5209_v19  ;;  %v5210_v60 = vunpack.i.l.bf16 %v5209_v19  ;;  %vm7025_vm15 = vmmov %vm7024_vm7 }
 0x6d8   :  { %v5331_v39 = vunpack.i.h.bf16 %v5329_v57  ;;  %v5330_v45 = vunpack.i.l.bf16 %v5329_v57  ;;  %vm7026_vm2 = vcmask 130048  }
 0x6d9   :  { %v5214_v42 = vpop.permute.xlu0 %5213  ;;  %3633 = vmatprep.subr.bf16.mxu1 %v4549_v54  ;;  %vm7027_vm4 = vmmov %vm7026_vm2 }
 0x6da   :  { %v3080_v63 = vsel %vm7014_vm14, %v5211_v6, %v5331_v39  ;;  %v3079_v32 = vsel %vm7015_vm5, %v5210_v60, %v5330_v45  ;;  %3634 = vmatpush2.bf16.msra.mxu1 %v4548_v48  ;;  %v3081_v9 = vsel %vm7016_vm8, %v5330_v45, %v5210_v60  ;;  %v3082_v0 = vsel %vm7017_vm9, %v5331_v39, %v5211_v6  ;;  %v5436_v6 = vld [vmem:[%s6824_s4] sm:$0xff]   ;;  %v5437_v60 = vld [vmem:[%s6824_s4 + $0x8] ss:$0 sps:$4 sm:$0x11]  }
 0x6db   :  { %v4562_v34 = vpack.c.bf16 %v3080_v63, %v3079_v32  ;;  %v5334_v55 = vpop.permute.xlu1 %5333  ;;  %v4563_v56 = vpack.c.bf16 %v3082_v0, %v3081_v9  ;;  %v5216_v61 = vunpack.i.h.bf16 %v5214_v42  ;;  %v5215_v62 = vunpack.i.l.bf16 %v5214_v42 }
 0x6dc   :  { %v5336_v1 = vunpack.i.h.bf16 %v5334_v55  ;;  %v5335_v3 = vunpack.i.l.bf16 %v5334_v55  ;;  %vm7028_vm14 = vcmp.lt.s32.totalorder %v5566_v12, 126 }
 0x6dd   :  { %v5219_v14 = vpop.permute.xlu0 %5218  ;;  %3662 = vmatprep.subr.bf16.mxu0 %v4563_v56  ;;  %vm7029_vm5 = vmmov %vm7028_vm14 }
 0x6de   :  { %v2886_v53 = vsel %vm7018_vm10, %v5336_v1, %v5216_v61  ;;  %v2885_v4 = vsel %vm7019_vm11, %v5335_v3, %v5215_v62  ;;  %3663 = vmatpush1.bf16.msra.mxu0 %v4562_v34  ;;  %v2883_v5 = vsel %vm7020_vm0, %v5215_v62, %v5335_v3  ;;  %v2884_v8 = vsel %vm7021_vm6, %v5216_v61, %v5336_v1  ;;  %vm7030_vm8 = vmmov %vm7029_vm5 }
 0x6df   :  { %v4546_v52 = vpack.c.bf16 %v2886_v53, %v2885_v4  ;;  %v5339_v20 = vpop.permute.xlu1 %5338  ;;  %v4547_v21 = vpack.c.bf16 %v2884_v8, %v2883_v5  ;;  %v5221_v18 = vunpack.i.h.bf16 %v5219_v14  ;;  %v5220_v22 = vunpack.i.l.bf16 %v5219_v14  ;;  %vm7031_vm9 = vmmov %vm7029_vm5 }
 0x6e0   :  { %v5341_v23 = vunpack.i.h.bf16 %v5339_v20  ;;  %v5340_v58 = vunpack.i.l.bf16 %v5339_v20  ;;  %vm7032_vm10 = vmmov %vm7029_vm5  ;;  %vm239_vm0 = vcmp.lt.s32.totalorder %v5570_v15, 61  ;;  %vm240_vm6 = vcmp.lt.s32.totalorder %v5572_v16, 61 }
 0x6e1   :  { %3635 = vmatprep.subr.bf16.mxu1 %v4547_v21  ;;  %v160_v9 = vpop.permute.xlu0 %159  ;;  %vm7033_vm11 = vmmov %vm7029_vm5 }
 0x6e2   :  { %v3288_v24 = vsel %vm7022_vm13, %v5221_v18, %v5341_v23  ;;  %v3287_v25 = vsel %vm7023_vm12, %v5220_v22, %v5340_v58  ;;  %3636 = vmatpush2.bf16.msra.mxu1 %v4546_v52  ;;  %v3289_v27 = vsel %vm7024_vm7, %v5340_v58, %v5220_v22  ;;  %v3290_v29 = vsel %vm7025_vm15, %v5341_v23, %v5221_v18  ;;  %vm241_vm13 = vmand %vm225_vm1, %vm239_vm0 }
 0x6e3   :  { %v4578_v33 = vpack.c.bf16 %v3288_v24, %v3287_v25  ;;  %v4579_v35 = vpack.c.bf16 %v3290_v29, %v3289_v27  ;;  %v166_v63 = vpop.permute.xlu1 %165  ;;  %vm242_vm12 = vmand %vm226_vm3, %vm240_vm6 }
 0x6e4   :  { %v170_v0 = vsel %vm7028_vm14, %v160_v9, %v166_v63 }
 0x6e5   :  { %3638 = vmatmul.mubr.bf16.vlgmr.msra.gmra.mxu1 %v5434_v43  ;;  %3678 = vmatprep.subr.bf16.mxu0 %v4579_v35  ;;  %v156_v20 = vpop.permute.xlu0 %155 }
 0x6e6   :  { %3679 = vmatpush2.bf16.msra.mxu0 %v4578_v33 }
 0x6e7   :  { %v158_v52 = vpop.permute.xlu1 %157 }
 0x6e9   :  { %3681 = vmatmul.mubr.bf16.vlgmr.msra.gmra.mxu0 %v5435_v36  ;;  %v162_v58 = vpop.permute.xlu0 %161 }
 0x6ea   :  { %3729 = vmatprep.mubr.bf16.mxu0 %v5460_v2  ;;  %v168_v33 = vsel %vm7031_vm9, %v156_v20, %v162_v58 }
 0x6eb   :  { %v164_v18 = vpop.permute.xlu1 %163 }
 0x6ec   :  { %v169_v27 = vsel %vm7030_vm8, %v158_v52, %v164_v18  ;;  %v172_v36 = vsel %vm7032_vm10, %v164_v18, %v158_v52 }
 0x7a5   :  { %v3639_v11 = vpop.f32.mrf.mxu1 }
 0x7a6   :  { %v3640_v50 = vadd.f32 %v3639_v11, %v5975_v17 }
 0x7a7   :  { %v3641_v37 = vpop.f32.mrf.mxu1 }
 0x7a8   :  { %v3642_v30 = vadd.f32 %v3641_v37, %v5975_v17 }
 0x7a9   :  { %v3643_v38 = vpop.f32.mrf.mxu1  ;;  %v3682_v41 = vpop.f32.mrf.mxu0 }
 0x7aa   :  { %v3644_v44 = vadd.f32 %v3643_v38, %v5973_v31  ;;  %v6744_v49 = vadd.f32 %v3682_v41, %v3640_v50  ;;  %v171_v38 = vsel %vm7033_vm11, %v162_v58, %v156_v20 }
 0x7ab   :  { %v3645_v40 = vpop.f32.mrf.mxu1  ;;  %v3684_v7 = vpop.f32.mrf.mxu0 }
 0x7ac   :  { %v3646_v59 = vadd.f32 %v3645_v40, %v5973_v31  ;;  %v6740_v13 = vadd.f32 %v3684_v7, %v3642_v30  ;;  %v3691_v17 = vmax.f32 %v6744_v49, 0.0 }
 0x7ad   :  { %v3686_v51 = vpop.f32.mrf.mxu0 }
 0x7ae   :  { %v6742_v19 = vadd.f32 %v3686_v51, %v3644_v44  ;;  %v3692_v48 = vmax.f32 %v6740_v13, 0.0 }
 0x7af   :  { %v3688_v10 = vpop.f32.mrf.mxu0 }
 0x7b0   :  { %v6746_v28 = vadd.f32 %v3688_v10, %v3646_v59  ;;  %v3693_v47 = vmax.f32 %v6742_v19, 0.0 }
 0x7b2   :  { %v3694_v57 = vmax.f32 %v6746_v28, 0.0  ;;  %v3695_v54 = vpack.c.bf16 %v3693_v47, %v3691_v17 }
 0x7b4   :  { %v3696_v31 = vpack.c.bf16 %v3694_v57, %v3692_v48 }
 0x7b6   :  { %3711 = vmatprep.subr.bf16.mxu0 %v3696_v31 }
 0x7b7   :  { %3712 = vmatpush1.bf16.msra.mxu0 %v3695_v54 }
 0x7ba   :  { %4260 = vmatmul.mubr.msk.bf16.vlgmr.msra.gmra.mxu0 %vm7026_vm2, %v5436_v6 }
 0x7bb   :  { %3739 = vmatprep.mubr.bf16.mxu0 %v5460_v2  ;;  %v173_v2 = vsel %vm7029_vm5, %v166_v63, %v160_v9 }
 0x7c2   :  { %4261 = vmatmul.mubr.msk.bf16.gmra.mxu0 %vm7027_vm4, %v5437_v60 }
 0x87a   :  { %v3731_v39 = vpop.f32.mrf.mxu0 }
 0x87c   :  { %v3733_v45 = vpop.f32.mrf.mxu0 }
 0x87e   :  { %v3735_v42 = vpop.f32.mrf.mxu0 }
 0x880   :  { %v3737_v32 = vpop.f32.mrf.mxu0 }
 0x882   :  { %v3741_v34 = vpop.f32.mrf.mxu0 }
 0x883   :  { %v3748_v55 = vadd.f32 %v3741_v34, %v170_v0 }
 0x884   :  { %v3743_v56 = vpop.f32.mrf.mxu0 }
 0x885   :  { %v4262_v61 = vmul.f32 -1.442695, %v3748_v55  ;;  %v3749_v62 = vadd.f32 %v3743_v56, %v173_v2 }
 0x886   :  { %v3745_v1 = vpop.f32.mrf.mxu0 }
 0x887   :  { %5400 = vpow2.f32 %v4262_v61  ;;  %v4263_v3 = vmul.f32 -1.442695, %v3749_v62 }
 0x888   :  { %v3746_v14 = vpop.f32.mrf.mxu0 }
 0x889   :  { %5402 = vpow2.f32 %v4263_v3 }
 0x894   :  { %v5401_v53 = vpop.eup %5400 }
 0x895   :  { %v3756_v4 = vadd.f32 1.0, %v5401_v53 }
 0x896   :  { %v5403_v5 = vpop.eup %5402 }
 0x897   :  { %5404 = vrcp.f32 %v3756_v4  ;;  %v3757_v8 = vadd.f32 1.0, %v5403_v5  ;;  %v5485_v4 = vmov 0.0  }
 0x898   :  { %v3933_v15 = vsel %vm241_vm13, 1.0, %v5485_v4  ;;  %v3934_v52 = vsel %vm242_vm12, 1.0, %v5485_v4 }
 0x899   :  { %5406 = vrcp.f32 %v3757_v8 }
 0x8a4   :  { %v5405_v21 = vpop.eup %5404 }
 0x8a5   :  { %v3765_v22 = vrot.slane %v5405_v21, %v6018_v46  ;;  %v3806_v60 = vsub.f32 1.0, %v5405_v21  ;;  %v3823_v0 = vrot.slane %v5405_v21, %v6038_v26 }
 0x8a6   :  { %v5407_v23 = vpop.eup %5406 }
 0x8a7   :  { %v3769_v24 = vrot.slane %v5407_v23, %v6018_v46  ;;  %v3772_v25 = vmul.f32 %v3765_v22, %v3735_v42  ;;  %v3770_v29 = vmul.f32 %v3765_v22, %v3731_v39  ;;  %v3807_v39 = vsub.f32 1.0, %v5407_v23 }
 0x8a8   :  { %v3827_v62 = vrot.slane %v5407_v23, %v6038_v26 }
 0x8a9   :  { %v3773_v35 = vmul.f32 %v3769_v24, %v3737_v32  ;;  %v3776_v43 = vadd.f32 %v3772_v25, %v169_v27  ;;  %v3771_v11 = vmul.f32 %v3769_v24, %v3733_v45  ;;  %v3774_v37 = vadd.f32 %v3770_v29, %v168_v33 }
 0x8aa   :  { %v3811_v45 = vrot.slane %v3806_v60, %v6038_v26  ;;  %v3815_v9 = vrot.slane %v3807_v39, %v6038_v26  ;;  %v3874_v60 = vld [vmem:[%s6828_s8 + $0x8] sm:$0xff] }
 0x8ab   :  { %v3777_v41 = vadd.f32 %v3773_v35, %v172_v36  ;;  %v4266_v46 = vmul.f32 -1.442695, %v3776_v43  ;;  %v3775_v40 = vadd.f32 %v3771_v11, %v171_v38  ;;  %v4264_v7 = vmul.f32 -1.442695, %v3774_v37 }
 0x8ac   :  { %v3818_v61 = vmul.f32 %v3811_v45, %v3693_v47  ;;  %v3816_v14 = vmul.f32 %v3811_v45, %v3691_v17  ;;  %v3819_v5 = vmul.f32 %v3815_v9, %v3694_v57  ;;  %v3817_v19 = vmul.f32 %v3815_v9, %v3692_v48 }
 0x8ad   :  { %5408 = vpow2.f32 %v4266_v46  ;;  %v4267_v30 = vmul.f32 -1.442695, %v3777_v41  ;;  %v4265_v44 = vmul.f32 -1.442695, %v3775_v40 }
 0x8ae   :  { %5410 = vpow2.f32 %v4264_v7 }
 0x8af   :  { %5412 = vpow2.f32 %v4267_v30 }
 0x8b0   :  { %5414 = vpow2.f32 %v4265_v44  ;;  %v3865_v44 = vld [vmem:[%s6827_s7] sm:$0xff] }
 0x8ba   :  { %v5409_v50 = vpop.eup %5408 }
 0x8bb   :  { %v5411_v51 = vpop.eup %5410  ;;  %v3792_v59 = vadd.f32 1.0, %v5409_v50 }
 0x8bc   :  { %v5413_v10 = vpop.eup %5412  ;;  %v3790_v31 = vadd.f32 1.0, %v5411_v51 }
 0x8bd   :  { %v5415_v54 = vpop.eup %5414  ;;  %v3793_v6 = vadd.f32 1.0, %v5413_v10  ;;  %5416 = vrcp.f32 %v3792_v59  ;;  %v3873_v59 = vld [vmem:[%s6828_s8] sm:$0xff]  ;;  %v3866_v10 = vld [vmem:[%s6827_s7 + $0x8] sm:$0xff]  ;;  %s5486_s7 = smov [#allocation3]  }
 0x8be   :  { %v3791_v12 = vadd.f32 1.0, %v5415_v54  ;;  %5418 = vrcp.f32 %v3790_v31  ;;  %s3916_s16 = sshll.u32 %s5486_s7, 4  ;;  %s3917_s16 = int_to_ptr.vmem [resolvable:$true] %s3916_s16 }
 0x8bf   :  { %5420 = vrcp.f32 %v3793_v6  ;;  %s5438_s8 = scalar_lea.vmem %s3917_s16, 512  ;;  %p5443_p1 = scmp.lt.s32.totalorder %s3917_s16, %s3917_s16 }
 0x8c0   :  { %5422 = vrcp.f32 %v3791_v12  ;;  %p5439_p0 = scmp.ne.s32.totalorder %s3917_s16, %s5438_s8  ;;  %p5444_p2 = scmp.lt.s32.totalorder %s5438_s8, %s5438_s8 }
 0x8c2   :  { %p5445_p3 = por %p5444_p2, %p5443_p1 }
 0x8c4   :  { %p5446_p4 = pnand %p5445_p3, %p5439_p0 }
 0x8ca   :  { %v5417_v42 = vpop.eup %5416 }
 0x8cb   :  { %v5419_v63 = vpop.eup %5418  ;;  %v3804_v32 = vmul.f32 %v5417_v42, %v3776_v43 }
 0x8cc   :  { %v5421_v34 = vpop.eup %5420  ;;  %v3802_v55 = vmul.f32 %v5419_v63, %v3774_v37 }
 0x8cd   :  { %v5423_v2 = vpop.eup %5422  ;;  %v3805_v56 = vmul.f32 %v5421_v34, %v3777_v41  ;;  %v3830_v1 = vmul.f32 %v3823_v0, %v3804_v32 }
 0x8ce   :  { %v3803_v3 = vmul.f32 %v5423_v2, %v3775_v40  ;;  %v3828_v53 = vmul.f32 %v3823_v0, %v3802_v55 }
 0x8cf   :  { %v3831_v8 = vmul.f32 %v3827_v62, %v3805_v56  ;;  %v6799_v16 = vadd.f32 %v3830_v1, %v3818_v61 }
 0x8d0   :  { %v3829_v47 = vmul.f32 %v3827_v62, %v3803_v3  ;;  %v3832_v26 = vadd.f32 %v3828_v53, %v3816_v14 }
 0x8d1   :  { %v3835_v20 = vadd.f32 %v3831_v8, %v3819_v5  ;;  %v3838_v49 = vmul.f32 %v3933_v15, %v6799_v16 }
 0x8d2   :  { %v3833_v21 = vadd.f32 %v3829_v47, %v3817_v19  ;;  %v3836_v18 = vmul.f32 %v3933_v15, %v3832_v26 }
 0x8d3   :  { %v3839_v17 = vmul.f32 %v3934_v52, %v3835_v20  ;;  %v3851_v13 = vmul.f32 %v3838_v49, %v3838_v49 }
 0x8d4   :  { %v3837_v22 = vmul.f32 %v3934_v52, %v3833_v21  ;;  %v3849_v57 = vmul.f32 %v3836_v18, %v3836_v18 }
 0x8d5   :  { %v3843_v23 = vadd.f32 %v3839_v17, %v3838_v49  ;;  %v3852_v25 = vmul.f32 %v3839_v17, %v3839_v17 }
 0x8d6   :  { %v3840_v58 = vadd.f32 %v3837_v22, %v3836_v18  ;;  %v3850_v28 = vmul.f32 %v3837_v22, %v3837_v22 }
 0x8d7   :  { %3844 = vadd.xlane.f32.xlu1 %v3843_v23  ;;  %v3856_v48 = vadd.f32 %v3852_v25, %v3851_v13 }
 0x8d8   :  { %3841 = vadd.xlane.f32.xlu0 %v3840_v58  ;;  %v3853_v24 = vadd.f32 %v3850_v28, %v3849_v57 }
 0x8dc   :  { %3854 = vadd.xlane.f32.xlu0 %v3853_v24 }
 0x8e0   :  { %3857 = vadd.xlane.f32.xlu0 %v3856_v48 }
 0x960   :  { %v3845_v33 = vpop.xlane.xlu1 %3844 }
 0x961   :  { %v3842_v27 = vpop.xlane.xlu0 %3841  ;;  %v3848_v43 = vmul.f32 0.008196721, %v3845_v33 }
 0x962   :  { %v3847_v29 = vmul.f32 0.008196721, %v3842_v27 }
 0x963   :  { %v3862_v41 = vmul.f32 %v3848_v43, %v3848_v43 }
 0x964   :  { %v3861_v36 = vmul.f32 %v3847_v29, %v3847_v29 }
 0x965   :  { %v3855_v35 = vpop.xlane.xlu0 %3854 }
 0x966   :  { %v3859_v11 = vmul.f32 0.008196721, %v3855_v35 }
 0x968   :  { %v3863_v37 = vsub.f32 %v3859_v11, %v3861_v36 }
 0x969   :  { %v3858_v38 = vpop.xlane.xlu0 %3857 }
 0x96a   :  { %v3867_v46 = vadd.f32 1e-05, %v3863_v37  ;;  %v3860_v40 = vmul.f32 0.008196721, %v3858_v38 }
 0x96c   :  { %5424 = vrsqrt.f32 %v3867_v46  ;;  %v3864_v7 = vsub.f32 %v3860_v40, %v3862_v41 }
 0x96e   :  { %v3868_v30 = vadd.f32 1e-05, %v3864_v7 }
 0x970   :  { %5426 = vrsqrt.f32 %v3868_v30 }
 0x979   :  { %v5425_v50 = vpop.eup %5424 }
 0x97a   :  { %v3871_v51 = vmul.f32 %v5425_v50, %v3865_v44 }
 0x97c   :  { %3881 = vperm.xlu1 %4861, %v3871_v51   ;;  %v3875_v31 = vmul.f32 %v3871_v51, %v3847_v29 }
 0x97d   :  { %v5427_v54 = vpop.eup %5426 }
 0x97e   :  { %v3877_v6 = vsub.f32 %v3873_v59, %v3875_v31  ;;  %v3872_v12 = vmul.f32 %v5427_v54, %v3866_v10 }
 0x980   :  { %3895 = vperm.xlu1 %4861, %v3877_v6   ;;  %3886 = vperm.xlu0 %4615, %v3872_v12   ;;  %v3876_v39 = vmul.f32 %v3872_v12, %v3848_v43 }
 0x982   :  { %v3878_v45 = vsub.f32 %v3874_v60, %v3876_v39 }
 0x984   :  { %3900 = vperm.xlu1 %4861, %v3878_v45  }
 0x9f7   :  { %v3882_v42 = vpop.permute.xlu1 %3881 }
 0x9f8   :  { %v3889_v63 = vmul.f32 %v3882_v42, %v3832_v26  ;;  %v3890_v32 = vmul.f32 %v3882_v42, %v3833_v21 }
 0x9fb   :  { %v3896_v9 = vpop.permute.xlu1 %3895  ;;  %v3887_v0 = vpop.permute.xlu0 %3886 }
 0x9fc   :  { %v3903_v34 = vadd.f32 %v3896_v9, %v3889_v63  ;;  %v3904_v55 = vadd.f32 %v3896_v9, %v3890_v32  ;;  %v3891_v2 = vmul.f32 %v3887_v0, %v6799_v16  ;;  %v3892_v56 = vmul.f32 %v3887_v0, %v3835_v20 }
 0x9fe   :  { %3907 = vst [vmem:[#allocation3] sm:$0xff] %v3903_v34  ;;  %3908 = vst [vmem:[#allocation3 + $0x8] sm:$0xff] %v3904_v55 }
 0x9ff   :  { %v3901_v61 = vpop.permute.xlu1 %3900 }
 0xa00   :  { %v3905_v62 = vadd.f32 %v3901_v61, %v3891_v2  ;;  %v3906_v1 = vadd.f32 %v3901_v61, %v3892_v56 }
 0xa02   :  { %3909 = vst [vmem:[#allocation3 + $0x10] sm:$0xff] %v3905_v62  ;;  %3910 = vst [vmem:[#allocation3 + $0x18] sm:$0xff] %v3906_v1 }
 0xa03   :  { %5449 = shalt.err (!%p5446_p4)
}
 0xa04   :  { %s5487_s20 = smov 256   ;;  %s5488_s10 = smov 16  }
 0xa05   :  { %3922 = dma.vmem_to_hbm [thread:$0]  %s3917_s16, 512, %s6829_s9, [#allocation4], %s5487_s20, %s5487_s20, %s5488_s10  }
 0xa06   :  { %5458 = dma.done.wait [#allocation4], 512  }
 0xa07   :  { %5459 = vsyncadd [#allocation4], 4294966784 }
 0xa08   :  { %3926 = vsyncpa [#allocation4], 1 }

</bundles_post_ra>
